<compile_context>
chip_gen: v7x
topology: tpu7x:2x2x1
jax: 0.10.0
libtpu: 0.0.40
codegen_flags: <defaults>
</compile_context>

<pallas_src>
import functools

import jax
import jax.numpy as jnp
from jax import lax
from jax.experimental import pallas as pl
from jax.experimental.pallas import tpu as pltpu


def _round_up(x, m):
    return (x + m - 1) // m * m


def _silu(x):
    return x * jax.nn.sigmoid(x)


# ------------------------------ kernel ------------------------------

def sppf_kernel(x_ref, w1_ref, b1_ref, w2_ref, b2_ref, o_ref,
                pbuf_ref, acc_ref, *, H, W, k):
    C1 = x_ref.shape[-1]
    Cp = w1_ref.shape[-1]           # padded cv1 out-channels (multiple of 128)
    C2p = w2_ref.shape[-1]          # padded cv2 out-channels (multiple of 128)
    pad = k // 2
    HW = H * W
    Hp, Wp, _ = pbuf_ref.shape

    # ---- -inf halo: border strips only (the interior is rewritten by every
    # pool pass).  Written each grid step so correctness does not depend on
    # which core runs which batch element.
    ninf = jnp.float32(-jnp.inf)
    if pad:
        pbuf_ref[pl.ds(0, pad), :, :] = jnp.full((pad, Wp, Cp), ninf, jnp.float32)
        pbuf_ref[pl.ds(pad + H, Hp - pad - H), :, :] = jnp.full(
            (Hp - pad - H, Wp, Cp), ninf, jnp.float32)
        pbuf_ref[:, pl.ds(0, pad), :] = jnp.full((Hp, pad, Cp), ninf, jnp.float32)
        pbuf_ref[:, pl.ds(pad + W, Wp - pad - W), :] = jnp.full(
            (Hp, Wp - pad - W, Cp), ninf, jnp.float32)

    # ---- cv1: 1x1 conv (+ folded BN) + SiLU.  bf16 MXU operands, f32 accum.
    x = x_ref[...].reshape(HW, C1)                              # bf16 (wrapper-cast)
    y = _silu(jnp.dot(x, w1_ref[...], preferred_element_type=jnp.float32)
              + b1_ref[...])                                    # (HW, Cp) f32

    # ---- cv2 partial matmul, branch 0 (interleaves MXU with the pool phase).
    acc_ref[...] = jnp.dot(y.astype(jnp.bfloat16), w2_ref[pl.ds(0, Cp), :],
                           preferred_element_type=jnp.float32)

    # ---- three chained k x k stride-1 max pools (separable) using the -inf
    # padded VMEM scratch; each branch feeds its cv2 partial matmul right away.
    y = y.reshape(H, W, Cp)
    for p in range(1, 4):
        pbuf_ref[pl.ds(pad, H), pl.ds(pad, W), :] = y
        # pool along H: shifted ref slices (leading axis -> cheap row selects)
        t = pbuf_ref[pl.ds(0, H), :, :]
        for d in range(1, k):
            t = jnp.maximum(t, pbuf_ref[pl.ds(d, H), :, :])
        # pool along W: static shifted slices of the padded row block
        y = t[:, 0:W, :]
        for d in range(1, k):
            y = jnp.maximum(y, t[:, d:d + W, :])
        acc_ref[...] += jnp.dot(y.reshape(HW, Cp).astype(jnp.bfloat16),
                                w2_ref[pl.ds(p * Cp, Cp), :],
                                preferred_element_type=jnp.float32)

    # ---- cv2 bias + SiLU + lane-dense store (f32 to match module semantics).
    o_ref[...] = _silu(acc_ref[...] + b2_ref[...]).reshape(1, H, W, C2p)


# ----------------------------- wrapper ------------------------------

def sppf_forward(x_nchw, params, k=5):
    """x_nchw: (N, C1, H, W) float32. params = (w1, b1, w2, b2), BN-fused."""
    w1, b1, w2, b2 = params
    N, C1, H, W = x_nchw.shape
    C_ = w1.shape[1]
    C2 = w2.shape[1]

    LANE = 128
    Cp = _round_up(C_, LANE)
    C2p = _round_up(C2, LANE)
    pad = k // 2
    Hp = H + 2 * pad
    Wp = _round_up(W + 2 * pad, 8)
    HW = H * W

    # Lane-dense, bf16 weights (zero padding is exact for the real channels:
    # padded cv1 channels come out as SiLU(0)=0, pool of 0 is 0, and the
    # matching w2 rows/cols are zero, so padded outputs are just sliced off).
    # Note: demo C_=4 -> Cp=128 wastes lanes; negligible at real SPPF widths.
    w1p = jnp.zeros((C1, Cp), jnp.float32).at[:, :C_].set(w1).astype(jnp.bfloat16)
    b1p = jnp.zeros((1, Cp), jnp.float32).at[:, :C_].set(b1)
    w2p = jnp.zeros((4 * Cp, C2p), jnp.float32)
    for i in range(4):
        w2p = w2p.at[i * Cp:i * Cp + C_, :C2].set(w2[i * C_:(i + 1) * C_, :])
    w2p = w2p.astype(jnp.bfloat16)
    b2p = jnp.zeros((1, C2p), jnp.float32).at[:, :C2].set(b2)

    # bf16 activations: the kernel only ever consumes x as bf16, so cast before
    # the DMA (halves input HBM traffic and the double-buffered VMEM block).
    x_nhwc = jnp.transpose(x_nchw, (0, 2, 3, 1)).astype(jnp.bfloat16)

    # Scoped-VMEM budget from the actual footprint (double-buffered operands +
    # scratch) plus headroom, instead of relying on the per-chip default.
    in_blk = H * W * C1 * 2                       # bf16 input block
    out_blk = H * W * C2p * 4                     # f32 output block
    weights = (w1p.size * 2 + b1p.size * 4 + w2p.size * 2 + b2p.size * 4)
    scratch = Hp * Wp * Cp * 4 + HW * C2p * 4     # pool buf + accumulator
    vmem_limit = int(1.5 * (2 * (in_blk + out_blk + weights) + scratch)) + (8 << 20)
    vmem_limit = max(vmem_limit, 16 << 20)

    out = pl.pallas_call(
        functools.partial(sppf_kernel, H=H, W=W, k=k),
        out_shape=jax.ShapeDtypeStruct((N, H, W, C2p), jnp.float32),
        grid_spec=pltpu.PrefetchScalarGridSpec(
            num_scalar_prefetch=0,
            grid=(N,),
            in_specs=[
                pl.BlockSpec((1, H, W, C1), lambda n: (n, 0, 0, 0)),
                pl.BlockSpec((C1, Cp), lambda n: (0, 0)),
                pl.BlockSpec((1, Cp), lambda n: (0, 0)),
                pl.BlockSpec((4 * Cp, C2p), lambda n: (0, 0)),
                pl.BlockSpec((1, C2p), lambda n: (0, 0)),
            ],
            out_specs=pl.BlockSpec((1, H, W, C2p), lambda n: (n, 0, 0, 0)),
            scratch_shapes=[
                pltpu.VMEM((Hp, Wp, Cp), jnp.float32),   # -inf halo pool buffer
                pltpu.VMEM((HW, C2p), jnp.float32),      # cv2 f32 accumulator
            ]),
        compiler_params=pltpu.CompilerParams(
            dimension_semantics=("parallel",),
            vmem_limit_bytes=vmem_limit),
    )(x_nhwc, w1p, b1p, w2p, b2p)

    out = out[..., :C2]
    return jnp.transpose(out, (0, 3, 1, 2))  # back to NCHW


# ------------------- deterministic parameter setup -------------------

def make_params(key, c1, c2, eps=1e-3):
    """Build SPPF params and fold BatchNorm into the 1x1 conv weights."""
    c_ = c1 // 2

    def conv_bn(key, cin, cout):
        k_w, k_g, k_b, k_m, k_v = jax.random.split(key, 5)
        w_conv = jax.random.normal(k_w, (cout, cin), jnp.float32) * 0.1   # 1x1 conv
        gamma = 1.0 + 0.1 * jax.random.normal(k_g, (cout,), jnp.float32)
        beta = 0.1 * jax.random.normal(k_b, (cout,), jnp.float32)
        mean = 0.1 * jax.random.normal(k_m, (cout,), jnp.float32)
        var = jax.random.uniform(k_v, (cout,), jnp.float32, 0.5, 1.5)
        scale = gamma / jnp.sqrt(var + eps)
        w_fused = (w_conv * scale[:, None]).T          # (cin, cout) for x @ w
        b_fused = (beta - mean * scale)[None, :]       # (1, cout)
        return w_fused, b_fused

    k1, k2 = jax.random.split(key)
    w1, b1 = conv_bn(k1, c1, c_)
    w2, b2 = conv_bn(k2, 4 * c_, c2)
    return w1, b1, w2, b2


# --------------------------- JAX reference ---------------------------

def sppf_reference(x_nchw, params, k=5):
    w1, b1, w2, b2 = params
    x = jnp.transpose(x_nchw, (0, 2, 3, 1))
    y0 = jax.nn.silu(jnp.einsum('nhwc,cd->nhwd', x, w1) + b1[0])

    def mp(y):
        return lax.reduce_window(
            y, -jnp.inf, lax.max,
            window_dimensions=(1, k, k, 1), window_strides=(1, 1, 1, 1),
            padding=[(0, 0), (k // 2, k // 2), (k // 2, k // 2), (0, 0)])

    y1 = mp(y0); y2 = mp(y1); y3 = mp(y2)
    cat = jnp.concatenate([y0, y1, y2, y3], axis=-1)
    out = jax.nn.silu(jnp.einsum('nhwc,cd->nhwd', cat, w2) + b2[0])
    return jnp.transpose(out, (0, 3, 1, 2))


# ------------------------------- main --------------------------------

if __name__ == "__main__":
    N, C1, H, W = 2, 8, 16, 16
    C2, K = 16, 5

    key = jax.random.PRNGKey(0)
    kx, kp = jax.random.split(key)
    x = jax.random.normal(kx, (N, C1, H, W), jnp.float32)
    params = make_params(kp, C1, C2)

    out = jax.jit(functools.partial(sppf_forward, k=K))(x, params)
    out = jax.block_until_ready(out)

    ref = jax.block_until_ready(sppf_reference(x, params, k=K))
    assert out.shape == (N, C2, H, W), out.shape
    # bf16 MXU operands -> compare against the f32 reference with a bf16-level tol
    assert jnp.allclose(out, ref, atol=2e-2, rtol=2e-2), \
        float(jnp.max(jnp.abs(out - ref)))

    print("KERNEL_OK")
</pallas_src>

<mosaic_0001>
module attributes {stable_mosaic.version = 11 : i64} {
  func.func @sppf_kernel(%arg0: i32, %arg1: memref<1x16x16x8xbf16, #tpu.memory_space<vmem>>, %arg2: memref<8x128xbf16, #tpu.memory_space<vmem>>, %arg3: memref<1x128xf32, #tpu.memory_space<vmem>>, %arg4: memref<512x128xbf16, #tpu.memory_space<vmem>>, %arg5: memref<1x128xf32, #tpu.memory_space<vmem>>, %arg6: memref<1x16x16x128xf32, #tpu.memory_space<vmem>>, %arg7: memref<20x24x128xf32, #tpu.memory_space<vmem>>, %arg8: memref<256x128xf32, #tpu.memory_space<vmem>>) attributes {dimension_semantics = [#tpu.dimension_semantics<parallel>], iteration_bounds = array<i64: 2>, scalar_prefetch = 0 : i64, scratch_operands = 2 : i64, tpu.core_type = #tpu.core_type<tc>, window_params = [{transform_indices = @transform_0, window_bounds = array<i64: 1, 16, 16, 8>}, {pipeline_mode = #tpu.pipeline_mode<synchronous>, transform_indices = @transform_1, window_bounds = array<i64: 8, 128>}, {pipeline_mode = #tpu.pipeline_mode<synchronous>, transform_indices = @transform_2, window_bounds = array<i64: 1, 128>}, {pipeline_mode = #tpu.pipeline_mode<synchronous>, transform_indices = @transform_3, window_bounds = array<i64: 512, 128>}, {pipeline_mode = #tpu.pipeline_mode<synchronous>, transform_indices = @transform_4, window_bounds = array<i64: 1, 128>}, {transform_indices = @transform_5, window_bounds = array<i64: 1, 16, 16, 128>}]} {
    %cst = arith.constant 0xFF800000 : f32
    %0 = vector.broadcast %cst : f32 to vector<2x24x128xf32>
    %c0 = arith.constant 0 : index
    %c0_0 = arith.constant 0 : index
    %c0_1 = arith.constant 0 : index
    %1 = vector.load %arg7[%c0, %c0_0, %c0_1] : memref<20x24x128xf32, #tpu.memory_space<vmem>>, vector<2x24x128xf32>
    tpu.vector_store %arg7[%c0, %c0_0, %c0_1], %0 {strides = array<i32>} : memref<20x24x128xf32, #tpu.memory_space<vmem>>, vector<2x24x128xf32>,
    %cst_2 = arith.constant 0xFF800000 : f32
    %2 = vector.broadcast %cst_2 : f32 to vector<2x24x128xf32>
    %c18 = arith.constant 18 : index
    %c0_3 = arith.constant 0 : index
    %c0_4 = arith.constant 0 : index
    %3 = vector.load %arg7[%c18, %c0_3, %c0_4] : memref<20x24x128xf32, #tpu.memory_space<vmem>>, vector<2x24x128xf32>
    tpu.vector_store %arg7[%c18, %c0_3, %c0_4], %2 {strides = array<i32>} : memref<20x24x128xf32, #tpu.memory_space<vmem>>, vector<2x24x128xf32>,
    %cst_5 = arith.constant 0xFF800000 : f32
    %4 = vector.broadcast %cst_5 : f32 to vector<20x2x128xf32>
    %c0_6 = arith.constant 0 : index
    %c0_7 = arith.constant 0 : index
    %c0_8 = arith.constant 0 : index
    %5 = vector.load %arg7[%c0_6, %c0_7, %c0_8] : memref<20x24x128xf32, #tpu.memory_space<vmem>>, vector<20x2x128xf32>
    tpu.vector_store %arg7[%c0_6, %c0_7, %c0_8], %4 {strides = array<i32>} : memref<20x24x128xf32, #tpu.memory_space<vmem>>, vector<20x2x128xf32>,
    %cst_9 = arith.constant 0xFF800000 : f32
    %6 = vector.broadcast %cst_9 : f32 to vector<20x6x128xf32>
    %c0_10 = arith.constant 0 : index
    %c18_11 = arith.constant 18 : index
    %c0_12 = arith.constant 0 : index
    %7 = vector.load %arg7[%c0_10, %c18_11, %c0_12] : memref<20x24x128xf32, #tpu.memory_space<vmem>>, vector<20x6x128xf32>
    tpu.vector_store %arg7[%c0_10, %c18_11, %c0_12], %6 {strides = array<i32>} : memref<20x24x128xf32, #tpu.memory_space<vmem>>, vector<20x6x128xf32>,
    %c0_13 = arith.constant 0 : index
    %c0_14 = arith.constant 0 : index
    %c0_15 = arith.constant 0 : index
    %c0_16 = arith.constant 0 : index
    %8 = vector.load %arg1[%c0_13, %c0_14, %c0_15, %c0_16] : memref<1x16x16x8xbf16, #tpu.memory_space<vmem>>, vector<1x16x16x8xbf16>
    %9 = vector.shape_cast %8 : vector<1x16x16x8xbf16> to vector<256x8xbf16>
    %c0_17 = arith.constant 0 : index
    %c0_18 = arith.constant 0 : index
    %10 = vector.load %arg2[%c0_17, %c0_18] : memref<8x128xbf16, #tpu.memory_space<vmem>>, vector<8x128xbf16>
    %cst_19 = arith.constant dense<0.000000e+00> : vector<256x128xf32>
    %11 = tpu.matmul %9, %10, %cst_19 {dimension_numbers = #tpu.dot_dimension_numbers<[1], [0], [0], [1], [0, 0, 1, 1], [], []>} : vector<256x8xbf16>, vector<8x128xbf16>, vector<256x128xf32> -> vector<256x128xf32>
    %c0_20 = arith.constant 0 : index
    %c0_21 = arith.constant 0 : index
    %12 = vector.load %arg3[%c0_20, %c0_21] : memref<1x128xf32, #tpu.memory_space<vmem>>, vector<1x128xf32>
    %13 = vector.broadcast %12 : vector<1x128xf32> to vector<256x128xf32>
    %14 = arith.addf %11, %13 : vector<256x128xf32>
    %15 = arith.negf %14 : vector<256x128xf32>
    %16 = math.exp %15 : vector<256x128xf32>
    %cst_22 = arith.constant 1.000000e+00 : f32
    %17 = vector.broadcast %cst_22 : f32 to vector<256x128xf32>
    %18 = arith.addf %17, %16 : vector<256x128xf32>
    %19 = arith.divf %17, %18 : vector<256x128xf32>
    %20 = arith.mulf %14, %19 : vector<256x128xf32>
    %21 = arith.truncf %20 : vector<256x128xf32> to vector<256x128xbf16>
    %c0_23 = arith.constant 0 : index
    %c0_24 = arith.constant 0 : index
    %22 = vector.load %arg4[%c0_23, %c0_24] : memref<512x128xbf16, #tpu.memory_space<vmem>>, vector<128x128xbf16>
    %cst_25 = arith.constant dense<0.000000e+00> : vector<256x128xf32>
    %23 = tpu.matmul %21, %22, %cst_25 {dimension_numbers = #tpu.dot_dimension_numbers<[1], [0], [0], [1], [0, 0, 1, 1], [], []>} : vector<256x128xbf16>, vector<128x128xbf16>, vector<256x128xf32> -> vector<256x128xf32>
    %c0_26 = arith.constant 0 : index
    %c0_27 = arith.constant 0 : index
    %24 = vector.load %arg8[%c0_26, %c0_27] : memref<256x128xf32, #tpu.memory_space<vmem>>, vector<256x128xf32>
    tpu.vector_store %arg8[%c0_26, %c0_27], %23 {strides = array<i32>} : memref<256x128xf32, #tpu.memory_space<vmem>>, vector<256x128xf32>,
    %25 = vector.shape_cast %20 : vector<256x128xf32> to vector<16x16x128xf32>
    %c2 = arith.constant 2 : index
    %c2_28 = arith.constant 2 : index
    %c0_29 = arith.constant 0 : index
    %26 = vector.load %arg7[%c2, %c2_28, %c0_29] : memref<20x24x128xf32, #tpu.memory_space<vmem>>, vector<16x16x128xf32>
    tpu.vector_store %arg7[%c2, %c2_28, %c0_29], %25 {strides = array<i32>} : memref<20x24x128xf32, #tpu.memory_space<vmem>>, vector<16x16x128xf32>,
    %c0_30 = arith.constant 0 : index
    %c0_31 = arith.constant 0 : index
    %c0_32 = arith.constant 0 : index
    %27 = vector.load %arg7[%c0_30, %c0_31, %c0_32] : memref<20x24x128xf32, #tpu.memory_space<vmem>>, vector<16x24x128xf32>
    %c1 = arith.constant 1 : index
    %c0_33 = arith.constant 0 : index
    %c0_34 = arith.constant 0 : index
    %28 = vector.load %arg7[%c1, %c0_33, %c0_34] : memref<20x24x128xf32, #tpu.memory_space<vmem>>, vector<16x24x128xf32>
    %29 = arith.maximumf %27, %28 : vector<16x24x128xf32>
    %c2_35 = arith.constant 2 : index
    %c0_36 = arith.constant 0 : index
    %c0_37 = arith.constant 0 : index
    %30 = vector.load %arg7[%c2_35, %c0_36, %c0_37] : memref<20x24x128xf32, #tpu.memory_space<vmem>>, vector<16x24x128xf32>
    %31 = arith.maximumf %29, %30 : vector<16x24x128xf32>
    %c3 = arith.constant 3 : index
    %c0_38 = arith.constant 0 : index
    %c0_39 = arith.constant 0 : index
    %32 = vector.load %arg7[%c3, %c0_38, %c0_39] : memref<20x24x128xf32, #tpu.memory_space<vmem>>, vector<16x24x128xf32>
    %33 = arith.maximumf %31, %32 : vector<16x24x128xf32>
    %c4 = arith.constant 4 : index
    %c0_40 = arith.constant 0 : index
    %c0_41 = arith.constant 0 : index
    %34 = vector.load %arg7[%c4, %c0_40, %c0_41] : memref<20x24x128xf32, #tpu.memory_space<vmem>>, vector<16x24x128xf32>
    %35 = arith.maximumf %33, %34 : vector<16x24x128xf32>
    %36 = vector.extract_strided_slice %35 {offsets = [0, 0, 0], sizes = [16, 16, 128], strides = [1, 1, 1]} : vector<16x24x128xf32> to vector<16x16x128xf32>
    %37 = vector.extract_strided_slice %35 {offsets = [0, 1, 0], sizes = [16, 16, 128], strides = [1, 1, 1]} : vector<16x24x128xf32> to vector<16x16x128xf32>
    %38 = arith.maximumf %36, %37 : vector<16x16x128xf32>
    %39 = vector.extract_strided_slice %35 {offsets = [0, 2, 0], sizes = [16, 16, 128], strides = [1, 1, 1]} : vector<16x24x128xf32> to vector<16x16x128xf32>
    %40 = arith.maximumf %38, %39 : vector<16x16x128xf32>
    %41 = vector.extract_strided_slice %35 {offsets = [0, 3, 0], sizes = [16, 16, 128], strides = [1, 1, 1]} : vector<16x24x128xf32> to vector<16x16x128xf32>
    %42 = arith.maximumf %40, %41 : vector<16x16x128xf32>
    %43 = vector.extract_strided_slice %35 {offsets = [0, 4, 0], sizes = [16, 16, 128], strides = [1, 1, 1]} : vector<16x24x128xf32> to vector<16x16x128xf32>
    %44 = arith.maximumf %42, %43 : vector<16x16x128xf32>
    %c0_42 = arith.constant 0 : index
    %c0_43 = arith.constant 0 : index
    %45 = vector.load %arg8[%c0_42, %c0_43] : memref<256x128xf32, #tpu.memory_space<vmem>>, vector<256x128xf32>
    %46 = vector.shape_cast %44 : vector<16x16x128xf32> to vector<256x128xf32>
    %47 = arith.truncf %46 : vector<256x128xf32> to vector<256x128xbf16>
    %c128 = arith.constant 128 : index
    %c0_44 = arith.constant 0 : index
    %48 = vector.load %arg4[%c128, %c0_44] : memref<512x128xbf16, #tpu.memory_space<vmem>>, vector<128x128xbf16>
    %cst_45 = arith.constant dense<0.000000e+00> : vector<256x128xf32>
    %49 = tpu.matmul %47, %48, %cst_45 {dimension_numbers = #tpu.dot_dimension_numbers<[1], [0], [0], [1], [0, 0, 1, 1], [], []>} : vector<256x128xbf16>, vector<128x128xbf16>, vector<256x128xf32> -> vector<256x128xf32>
    %50 = arith.addf %45, %49 : vector<256x128xf32>
    %c0_46 = arith.constant 0 : index
    %c0_47 = arith.constant 0 : index
    %51 = vector.load %arg8[%c0_46, %c0_47] : memref<256x128xf32, #tpu.memory_space<vmem>>, vector<256x128xf32>
    tpu.vector_store %arg8[%c0_46, %c0_47], %50 {strides = array<i32>} : memref<256x128xf32, #tpu.memory_space<vmem>>, vector<256x128xf32>,
    %c2_48 = arith.constant 2 : index
    %c2_49 = arith.constant 2 : index
    %c0_50 = arith.constant 0 : index
    %52 = vector.load %arg7[%c2_48, %c2_49, %c0_50] : memref<20x24x128xf32, #tpu.memory_space<vmem>>, vector<16x16x128xf32>
    tpu.vector_store %arg7[%c2_48, %c2_49, %c0_50], %44 {strides = array<i32>} : memref<20x24x128xf32, #tpu.memory_space<vmem>>, vector<16x16x128xf32>,
    %c0_51 = arith.constant 0 : index
    %c0_52 = arith.constant 0 : index
    %c0_53 = arith.constant 0 : index
    %53 = vector.load %arg7[%c0_51, %c0_52, %c0_53] : memref<20x24x128xf32, #tpu.memory_space<vmem>>, vector<16x24x128xf32>
    %c1_54 = arith.constant 1 : index
    %c0_55 = arith.constant 0 : index
    %c0_56 = arith.constant 0 : index
    %54 = vector.load %arg7[%c1_54, %c0_55, %c0_56] : memref<20x24x128xf32, #tpu.memory_space<vmem>>, vector<16x24x128xf32>
    %55 = arith.maximumf %53, %54 : vector<16x24x128xf32>
    %c2_57 = arith.constant 2 : index
    %c0_58 = arith.constant 0 : index
    %c0_59 = arith.constant 0 : index
    %56 = vector.load %arg7[%c2_57, %c0_58, %c0_59] : memref<20x24x128xf32, #tpu.memory_space<vmem>>, vector<16x24x128xf32>
    %57 = arith.maximumf %55, %56 : vector<16x24x128xf32>
    %c3_60 = arith.constant 3 : index
    %c0_61 = arith.constant 0 : index
    %c0_62 = arith.constant 0 : index
    %58 = vector.load %arg7[%c3_60, %c0_61, %c0_62] : memref<20x24x128xf32, #tpu.memory_space<vmem>>, vector<16x24x128xf32>
    %59 = arith.maximumf %57, %58 : vector<16x24x128xf32>
    %c4_63 = arith.constant 4 : index
    %c0_64 = arith.constant 0 : index
    %c0_65 = arith.constant 0 : index
    %60 = vector.load %arg7[%c4_63, %c0_64, %c0_65] : memref<20x24x128xf32, #tpu.memory_space<vmem>>, vector<16x24x128xf32>
    %61 = arith.maximumf %59, %60 : vector<16x24x128xf32>
    %62 = vector.extract_strided_slice %61 {offsets = [0, 0, 0], sizes = [16, 16, 128], strides = [1, 1, 1]} : vector<16x24x128xf32> to vector<16x16x128xf32>
    %63 = vector.extract_strided_slice %61 {offsets = [0, 1, 0], sizes = [16, 16, 128], strides = [1, 1, 1]} : vector<16x24x128xf32> to vector<16x16x128xf32>
    %64 = arith.maximumf %62, %63 : vector<16x16x128xf32>
    %65 = vector.extract_strided_slice %61 {offsets = [0, 2, 0], sizes = [16, 16, 128], strides = [1, 1, 1]} : vector<16x24x128xf32> to vector<16x16x128xf32>
    %66 = arith.maximumf %64, %65 : vector<16x16x128xf32>
    %67 = vector.extract_strided_slice %61 {offsets = [0, 3, 0], sizes = [16, 16, 128], strides = [1, 1, 1]} : vector<16x24x128xf32> to vector<16x16x128xf32>
    %68 = arith.maximumf %66, %67 : vector<16x16x128xf32>
    %69 = vector.extract_strided_slice %61 {offsets = [0, 4, 0], sizes = [16, 16, 128], strides = [1, 1, 1]} : vector<16x24x128xf32> to vector<16x16x128xf32>
    %70 = arith.maximumf %68, %69 : vector<16x16x128xf32>
    %c0_66 = arith.constant 0 : index
    %c0_67 = arith.constant 0 : index
    %71 = vector.load %arg8[%c0_66, %c0_67] : memref<256x128xf32, #tpu.memory_space<vmem>>, vector<256x128xf32>
    %72 = vector.shape_cast %70 : vector<16x16x128xf32> to vector<256x128xf32>
    %73 = arith.truncf %72 : vector<256x128xf32> to vector<256x128xbf16>
    %c256 = arith.constant 256 : index
    %c0_68 = arith.constant 0 : index
    %74 = vector.load %arg4[%c256, %c0_68] : memref<512x128xbf16, #tpu.memory_space<vmem>>, vector<128x128xbf16>
    %cst_69 = arith.constant dense<0.000000e+00> : vector<256x128xf32>
    %75 = tpu.matmul %73, %74, %cst_69 {dimension_numbers = #tpu.dot_dimension_numbers<[1], [0], [0], [1], [0, 0, 1, 1], [], []>} : vector<256x128xbf16>, vector<128x128xbf16>, vector<256x128xf32> -> vector<256x128xf32>
    %76 = arith.addf %71, %75 : vector<256x128xf32>
    %c0_70 = arith.constant 0 : index
    %c0_71 = arith.constant 0 : index
    %77 = vector.load %arg8[%c0_70, %c0_71] : memref<256x128xf32, #tpu.memory_space<vmem>>, vector<256x128xf32>
    tpu.vector_store %arg8[%c0_70, %c0_71], %76 {strides = array<i32>} : memref<256x128xf32, #tpu.memory_space<vmem>>, vector<256x128xf32>,
    %c2_72 = arith.constant 2 : index
    %c2_73 = arith.constant 2 : index
    %c0_74 = arith.constant 0 : index
    %78 = vector.load %arg7[%c2_72, %c2_73, %c0_74] : memref<20x24x128xf32, #tpu.memory_space<vmem>>, vector<16x16x128xf32>
    tpu.vector_store %arg7[%c2_72, %c2_73, %c0_74], %70 {strides = array<i32>} : memref<20x24x128xf32, #tpu.memory_space<vmem>>, vector<16x16x128xf32>,
    %c0_75 = arith.constant 0 : index
    %c0_76 = arith.constant 0 : index
    %c0_77 = arith.constant 0 : index
    %79 = vector.load %arg7[%c0_75, %c0_76, %c0_77] : memref<20x24x128xf32, #tpu.memory_space<vmem>>, vector<16x24x128xf32>
    %c1_78 = arith.constant 1 : index
    %c0_79 = arith.constant 0 : index
    %c0_80 = arith.constant 0 : index
    %80 = vector.load %arg7[%c1_78, %c0_79, %c0_80] : memref<20x24x128xf32, #tpu.memory_space<vmem>>, vector<16x24x128xf32>
    %81 = arith.maximumf %79, %80 : vector<16x24x128xf32>
    %c2_81 = arith.constant 2 : index
    %c0_82 = arith.constant 0 : index
    %c0_83 = arith.constant 0 : index
    %82 = vector.load %arg7[%c2_81, %c0_82, %c0_83] : memref<20x24x128xf32, #tpu.memory_space<vmem>>, vector<16x24x128xf32>
    %83 = arith.maximumf %81, %82 : vector<16x24x128xf32>
    %c3_84 = arith.constant 3 : index
    %c0_85 = arith.constant 0 : index
    %c0_86 = arith.constant 0 : index
    %84 = vector.load %arg7[%c3_84, %c0_85, %c0_86] : memref<20x24x128xf32, #tpu.memory_space<vmem>>, vector<16x24x128xf32>
    %85 = arith.maximumf %83, %84 : vector<16x24x128xf32>
    %c4_87 = arith.constant 4 : index
    %c0_88 = arith.constant 0 : index
    %c0_89 = arith.constant 0 : index
    %86 = vector.load %arg7[%c4_87, %c0_88, %c0_89] : memref<20x24x128xf32, #tpu.memory_space<vmem>>, vector<16x24x128xf32>
    %87 = arith.maximumf %85, %86 : vector<16x24x128xf32>
    %88 = vector.extract_strided_slice %87 {offsets = [0, 0, 0], sizes = [16, 16, 128], strides = [1, 1, 1]} : vector<16x24x128xf32> to vector<16x16x128xf32>
    %89 = vector.extract_strided_slice %87 {offsets = [0, 1, 0], sizes = [16, 16, 128], strides = [1, 1, 1]} : vector<16x24x128xf32> to vector<16x16x128xf32>
    %90 = arith.maximumf %88, %89 : vector<16x16x128xf32>
    %91 = vector.extract_strided_slice %87 {offsets = [0, 2, 0], sizes = [16, 16, 128], strides = [1, 1, 1]} : vector<16x24x128xf32> to vector<16x16x128xf32>
    %92 = arith.maximumf %90, %91 : vector<16x16x128xf32>
    %93 = vector.extract_strided_slice %87 {offsets = [0, 3, 0], sizes = [16, 16, 128], strides = [1, 1, 1]} : vector<16x24x128xf32> to vector<16x16x128xf32>
    %94 = arith.maximumf %92, %93 : vector<16x16x128xf32>
    %95 = vector.extract_strided_slice %87 {offsets = [0, 4, 0], sizes = [16, 16, 128], strides = [1, 1, 1]} : vector<16x24x128xf32> to vector<16x16x128xf32>
    %96 = arith.maximumf %94, %95 : vector<16x16x128xf32>
    %c0_90 = arith.constant 0 : index
    %c0_91 = arith.constant 0 : index
    %97 = vector.load %arg8[%c0_90, %c0_91] : memref<256x128xf32, #tpu.memory_space<vmem>>, vector<256x128xf32>
    %98 = vector.shape_cast %96 : vector<16x16x128xf32> to vector<256x128xf32>
    %99 = arith.truncf %98 : vector<256x128xf32> to vector<256x128xbf16>
    %c384 = arith.constant 384 : index
    %c0_92 = arith.constant 0 : index
    %100 = vector.load %arg4[%c384, %c0_92] : memref<512x128xbf16, #tpu.memory_space<vmem>>, vector<128x128xbf16>
    %cst_93 = arith.constant dense<0.000000e+00> : vector<256x128xf32>
    %101 = tpu.matmul %99, %100, %cst_93 {dimension_numbers = #tpu.dot_dimension_numbers<[1], [0], [0], [1], [0, 0, 1, 1], [], []>} : vector<256x128xbf16>, vector<128x128xbf16>, vector<256x128xf32> -> vector<256x128xf32>
    %102 = arith.addf %97, %101 : vector<256x128xf32>
    %c0_94 = arith.constant 0 : index
    %c0_95 = arith.constant 0 : index
    %103 = vector.load %arg8[%c0_94, %c0_95] : memref<256x128xf32, #tpu.memory_space<vmem>>, vector<256x128xf32>
    tpu.vector_store %arg8[%c0_94, %c0_95], %102 {strides = array<i32>} : memref<256x128xf32, #tpu.memory_space<vmem>>, vector<256x128xf32>,
    %c0_96 = arith.constant 0 : index
    %c0_97 = arith.constant 0 : index
    %104 = vector.load %arg8[%c0_96, %c0_97] : memref<256x128xf32, #tpu.memory_space<vmem>>, vector<256x128xf32>
    %c0_98 = arith.constant 0 : index
    %c0_99 = arith.constant 0 : index
    %105 = vector.load %arg5[%c0_98, %c0_99] : memref<1x128xf32, #tpu.memory_space<vmem>>, vector<1x128xf32>
    %106 = vector.broadcast %105 : vector<1x128xf32> to vector<256x128xf32>
    %107 = arith.addf %104, %106 : vector<256x128xf32>
    %108 = arith.negf %107 : vector<256x128xf32>
    %109 = math.exp %108 : vector<256x128xf32>
    %cst_100 = arith.constant 1.000000e+00 : f32
    %110 = vector.broadcast %cst_100 : f32 to vector<256x128xf32>
    %111 = arith.addf %110, %109 : vector<256x128xf32>
    %112 = arith.divf %110, %111 : vector<256x128xf32>
    %113 = arith.mulf %107, %112 : vector<256x128xf32>
    %114 = vector.shape_cast %113 : vector<256x128xf32> to vector<1x16x16x128xf32>
    %c0_101 = arith.constant 0 : index
    %c0_102 = arith.constant 0 : index
    %c0_103 = arith.constant 0 : index
    %c0_104 = arith.constant 0 : index
    %115 = vector.load %arg6[%c0_101, %c0_102, %c0_103, %c0_104] : memref<1x16x16x128xf32, #tpu.memory_space<vmem>>, vector<1x16x16x128xf32>
    tpu.vector_store %arg6[%c0_101, %c0_102, %c0_103, %c0_104], %114 {strides = array<i32>} : memref<1x16x16x128xf32, #tpu.memory_space<vmem>>, vector<1x16x16x128xf32>,
    return
  }
  func.func @transform_0(%arg0: i32) -> (i32, i32, i32, i32) {
    %c0_i32 = arith.constant 0 : i32
    %c0_i32_0 = arith.constant 0 : i32
    %c0_i32_1 = arith.constant 0 : i32
    %c0_i32_2 = arith.constant 0 : i32
    return %arg0, %c0_i32, %c0_i32_0, %c0_i32_1 : i32, i32, i32, i32
  }
  func.func @transform_1(%arg0: i32) -> (i32, i32) {
    %c0_i32 = arith.constant 0 : i32
    %c0_i32_0 = arith.constant 0 : i32
    %c0_i32_1 = arith.constant 0 : i32
    return %c0_i32, %c0_i32_0 : i32, i32
  }
  func.func @transform_2(%arg0: i32) -> (i32, i32) {
    %c0_i32 = arith.constant 0 : i32
    %c0_i32_0 = arith.constant 0 : i32
    %c0_i32_1 = arith.constant 0 : i32
    return %c0_i32, %c0_i32_0 : i32, i32
  }
  func.func @transform_3(%arg0: i32) -> (i32, i32) {
    %c0_i32 = arith.constant 0 : i32
    %c0_i32_0 = arith.constant 0 : i32
    %c0_i32_1 = arith.constant 0 : i32
    return %c0_i32, %c0_i32_0 : i32, i32
  }
  func.func @transform_4(%arg0: i32) -> (i32, i32) {
    %c0_i32 = arith.constant 0 : i32
    %c0_i32_0 = arith.constant 0 : i32
    %c0_i32_1 = arith.constant 0 : i32
    return %c0_i32, %c0_i32_0 : i32, i32
  }
  func.func @transform_5(%arg0: i32) -> (i32, i32, i32, i32) {
    %c0_i32 = arith.constant 0 : i32
    %c0_i32_0 = arith.constant 0 : i32
    %c0_i32_1 = arith.constant 0 : i32
    %c0_i32_2 = arith.constant 0 : i32
    return %arg0, %c0_i32, %c0_i32_0, %c0_i32_1 : i32, i32, i32, i32
  }
}

</mosaic_0001>

<bundles_post_ra>
// kernel: sppf_forward.1
= control target key start
LH: loop header
LB: loop body
LE: loop exit
PB: predicated region body
PF: predicated region fallthrough
CT: control target
= control target key end

     0   :  { %s6755_s18 = smov 0   ;;  %s9387_s0 = inlined_call_operand.vmem [shape: bf16[2,16,16,8], index: 0, kind: input, shape index: {}]   ;;  %s9388_s1 = inlined_call_operand.vmem [shape: bf16[8,128], index: 1, kind: input, shape index: {}]   ;;  %s9389_s2 = inlined_call_operand.vmem [shape: f32[1,128], index: 2, kind: input, shape index: {}]   ;;  %s9390_s3 = inlined_call_operand.vmem [shape: bf16[512,128], index: 3, kind: input, shape index: {}]   ;;  %s9391_s4 = inlined_call_operand.vmem [shape: f32[1,128], index: 4, kind: input, shape index: {}]   ;;  %s9392_s5 = inlined_call_operand.vmem [shape: f32[2,16,16,128], index: 5, kind: output, shape index: {}]  }
   0x1 LB: > { %s5774_s19 = sadd.s32 4294967295, %s6722_s18   ;;  %p5778_p0 = scmp.ge.s32.totalorder %s6722_s18, 1  ;;  %s6722_s18 = sphi %s6755_s18, %s15_s18  }
   0x2   : > { %p187_p1 = scmp.lt.s32.totalorder %s6722_s18, 3 }
   0x4   : > { %p188_p2 = pnand %p5778_p0, %p187_p1 }
   0x6   : > { %191 = sbr.rel (%p188_p2) target bundleno = 1047 (0x417), region = 40 }
   0xd   : > { %v311_v0 = vld [vmem:[%s9388_s1] sm:$0xf]  ;;  %vm448_vm0 = vcmask 1043456   ;;  %p215_p3 = scmp.lt.s32.totalorder %s5774_s19, 1  ;;  %vm399_vm1 = vcmask 64512   ;;  %v6395_v19 = vld [vmem:[%s9390_s3 + $0x8] sm:$0xff]  }
   0xe   : > { %6368 = vmatprep.subr.msk.bf16.mxu0 %vm448_vm0, %v311_v0  ;;  %v450_v1 = vsel %vm448_vm0, %v311_v0, 0  ;;  %v6394_v18 = vld [vmem:[%s9390_s3] sm:$0xff]   ;;  %v6396_v20 = vld [vmem:[%s9390_s3 + $0x10] sm:$0xff]   ;;  %v6397_v21 = vld [vmem:[%s9390_s3 + $0x18] sm:$0xff]   ;;  %v6724_v25 = vmov -inf   ;;  %vm1626_vm2 = vcmask 1046528  }
   0xf   : > { %6031 = vmatpush3.bf16.msra.mxu0 %v450_v1  ;;  %s9434_s19 = smov (!%p215_p3, %s5774_s19), 1  ;;  %v6398_v22 = vld [vmem:[%s9390_s3 + $0x20] sm:$0xff]   ;;  %v6399_v23 = vld [vmem:[%s9390_s3 + $0x28] sm:$0xff]   ;;  %v6400_v24 = vld [vmem:[%s9390_s3 + $0x30] sm:$0xff]   ;;  %226 = vst [vmem:[#allocation2] sm:$0xff] %v6724_v25  ;;  %vm1771_vm3 = vcmask 1045504  }
  0x10   : > { %s5915_s22 = sshll.u32 %s9434_s19, 7  ;;  %6064 = vmatprep.subr.bf16.mxu0 %v6394_v18  ;;  %227 = vst [vmem:[#allocation2 + $0x8] sm:$0xff] %v6724_v25  ;;  %228 = vst [vmem:[#allocation2 + $0x10] sm:$0xff] %v6724_v25  ;;  %v6401_v26 = vld [vmem:[%s9390_s3 + $0x38] sm:$0xff]   ;;  %v6402_v27 = vld [vmem:[%s9390_s3 + $0x40] sm:$0xff]   ;;  %vm1916_vm4 = vcmask 1044480  }
  0x11   : > { %s6774_s25 = scalar_lea.vmem %s9387_s0, %s5915_s22  ;;  %229 = vst [vmem:[#allocation2 + $0x18] sm:$0xff] %v6724_v25  ;;  %231 = vst [vmem:[#allocation2 + $0x28] sm:$0xff] %v6724_v25  ;;  %6112 = vmatprep.subr.bf16.mxu1 %v6402_v27  ;;  %v6403_v28 = vld [vmem:[%s9390_s3 + $0x48] sm:$0xff]   ;;  %v6404_v29 = vld [vmem:[%s9390_s3 + $0x50] sm:$0xff]   ;;  %s5916_s20 = sshll.u32 %s9434_s19, 8 }
  0x12   : > { %v6378_v2 = vld [vmem:[%s6774_s25] sm:$0xff]   ;;  %v6379_v3 = vld [vmem:[%s6774_s25 + $0x8] sm:$0xff]   ;;  %v6380_v4 = vld [vmem:[%s6774_s25 + $0x10] sm:$0xff]   ;;  %241 = vst [vmem:[#allocation2 + $0x30] sm:$0x3] %v6724_v25  ;;  %6113 = vmatpush3.bf16.msra.mxu1 %v6402_v27  ;;  %s9263_s22 = scalar_lea.vmem %s9392_s5, %s5916_s20 }
  0x13   : > { %6032 = vmatprep.mubr.msk.bf16.mxu0 %vm399_vm1, %v6378_v2  ;;  %v6381_v5 = vld [vmem:[%s6774_s25 + $0x18] sm:$0xff]   ;;  %v6382_v6 = vld [vmem:[%s6774_s25 + $0x20] sm:$0xff]   ;;  %v6383_v7 = vld [vmem:[%s6774_s25 + $0x28] sm:$0xff]   ;;  %242 = vst [vmem:[#allocation2 + $0x48] sm:$0x3] %v6724_v25  ;;  %6114 = vmatprep.subr.bf16.mxu1 %v6403_v28 }
  0x14   : > { %6033 = vmatmul.mubr.msk.bf16.vlgmr.msra.gmra.mrb[0].mxu0 %vm399_vm1, %v6379_v3  ;;  %v6384_v8 = vld [vmem:[%s6774_s25 + $0x30] sm:$0xff]   ;;  %v6385_v9 = vld [vmem:[%s6774_s25 + $0x38] sm:$0xff]   ;;  %v6386_v10 = vld [vmem:[%s6774_s25 + $0x40] sm:$0xff]   ;;  %243 = vst [vmem:[#allocation2 + $0x60] sm:$0x3] %v6724_v25 }
  0x15   : > { %6036 = vmatprep.mubr.msk.bf16.mxu0 %vm399_vm1, %v6380_v4  ;;  %v6387_v11 = vld [vmem:[%s6774_s25 + $0x48] sm:$0xff]   ;;  %v6388_v12 = vld [vmem:[%s6774_s25 + $0x50] sm:$0xff]   ;;  %v6389_v13 = vld [vmem:[%s6774_s25 + $0x58] sm:$0xff]   ;;  %6065 = vmatpush3.bf16.msra.mxu0 %v6394_v18  ;;  %261 = vst [vmem:[#allocation2 + $0x42] sm:$0x3f] %v6724_v25 }
  0x16   : > { %v6390_v14 = vld [vmem:[%s6774_s25 + $0x60] sm:$0xff]   ;;  %v6391_v15 = vld [vmem:[%s6774_s25 + $0x68] sm:$0xff]   ;;  %v6392_v16 = vld [vmem:[%s6774_s25 + $0x70] sm:$0xff]   ;;  %6066 = vmatprep.subr.bf16.mxu0 %v6395_v19  ;;  %262 = vst [vmem:[#allocation2 + $0x5a] sm:$0x3f] %v6724_v25  ;;  %6115 = vmatpush3.bf16.msra.mxu1 %v6403_v28 }
  0x17   : > { %v6393_v17 = vld [vmem:[%s6774_s25 + $0x78] sm:$0xff]   ;;  %263 = vst [vmem:[#allocation2 + $0x72] sm:$0x3f] %v6724_v25  ;;  %233 = vst [vmem:[#allocation2 + $0x1b0] sm:$0xff] %v6724_v25  ;;  %6116 = vmatprep.subr.bf16.mxu1 %v6404_v29  ;;  %v6406_v31 = vld [vmem:[%s9390_s3 + $0x60] sm:$0xff]  }
  0x18   : > { %235 = vst [vmem:[#allocation2 + $0x1c0] sm:$0xff] %v6724_v25  ;;  %236 = vst [vmem:[#allocation2 + $0x1c8] sm:$0xff] %v6724_v25  ;;  %v6405_v30 = vld [vmem:[%s9390_s3 + $0x58] sm:$0xff]   ;;  %v6407_v32 = vld [vmem:[%s9390_s3 + $0x68] sm:$0xff]  }
  0x19   : > { %6067 = vmatpush3.bf16.msra.mxu0 %v6395_v19  ;;  %238 = vst [vmem:[#allocation2 + $0x1d8] sm:$0xff] %v6724_v25  ;;  %244 = vst [vmem:[#allocation2 + $0x78] sm:$0x3] %v6724_v25  ;;  %v6408_v33 = vld [vmem:[%s9390_s3 + $0x70] sm:$0xff]   ;;  %v6409_v34 = vld [vmem:[%s9390_s3 + $0x78] sm:$0xff]  }
  0x1a   : > { %6068 = vmatprep.subr.bf16.mxu0 %v6396_v20  ;;  %245 = vst [vmem:[#allocation2 + $0x90] sm:$0x3] %v6724_v25  ;;  %246 = vst [vmem:[#allocation2 + $0xa8] sm:$0x3] %v6724_v25  ;;  %6117 = vmatpush3.bf16.msra.mxu1 %v6404_v29  ;;  %v6859_v35 = vld [vmem:[%s9390_s3 + $0x80] sm:$0xff]  }
  0x1b   : > { %247 = vst [vmem:[#allocation2 + $0xc0] sm:$0x3] %v6724_v25  ;;  %248 = vst [vmem:[#allocation2 + $0xd8] sm:$0x3] %v6724_v25  ;;  %6118 = vmatprep.subr.bf16.mxu1 %v6405_v30  ;;  %v6865_v36 = vld [vmem:[%s9389_s2] ss:$0 sm:$0xff] }
  0x1c   : > { %6037 = vmatmul.mubr.msk.bf16.gmra.mrb[4].mxu0 %vm399_vm1, %v6381_v5  ;;  %249 = vst [vmem:[#allocation2 + $0xf0] sm:$0x3] %v6724_v25  ;;  %250 = vst [vmem:[#allocation2 + $0x108] sm:$0x3] %v6724_v25 }
  0x1d   : > { %6040 = vmatprep.mubr.msk.bf16.mxu0 %vm399_vm1, %v6382_v6  ;;  %6069 = vmatpush3.bf16.msra.mxu0 %v6396_v20  ;;  %251 = vst [vmem:[#allocation2 + $0x120] sm:$0x3] %v6724_v25  ;;  %252 = vst [vmem:[#allocation2 + $0x138] sm:$0x3] %v6724_v25 }
  0x1e   : > { %6070 = vmatprep.subr.bf16.mxu0 %v6397_v21  ;;  %253 = vst [vmem:[#allocation2 + $0x150] sm:$0x3] %v6724_v25  ;;  %254 = vst [vmem:[#allocation2 + $0x168] sm:$0x3] %v6724_v25  ;;  %6119 = vmatpush3.bf16.msra.mxu1 %v6405_v30 }
  0x1f   : > { %255 = vst [vmem:[#allocation2 + $0x180] sm:$0x3] %v6724_v25  ;;  %256 = vst [vmem:[#allocation2 + $0x198] sm:$0x3] %v6724_v25  ;;  %6120 = vmatprep.subr.bf16.mxu1 %v6406_v31 }
  0x20   : > { %264 = vst [vmem:[#allocation2 + $0x8a] sm:$0x3f] %v6724_v25  ;;  %265 = vst [vmem:[#allocation2 + $0xa2] sm:$0x3f] %v6724_v25 }
  0x21   : > { %6071 = vmatpush3.bf16.msra.mxu0 %v6397_v21  ;;  %266 = vst [vmem:[#allocation2 + $0xba] sm:$0x3f] %v6724_v25  ;;  %267 = vst [vmem:[#allocation2 + $0xd2] sm:$0x3f] %v6724_v25 }
  0x22   : > { %6072 = vmatprep.subr.bf16.mxu0 %v6398_v22  ;;  %268 = vst [vmem:[#allocation2 + $0xea] sm:$0x3f] %v6724_v25  ;;  %269 = vst [vmem:[#allocation2 + $0x102] sm:$0x3f] %v6724_v25  ;;  %6121 = vmatpush3.bf16.msra.mxu1 %v6406_v31 }
  0x23   : > { %270 = vst [vmem:[#allocation2 + $0x11a] sm:$0x3f] %v6724_v25  ;;  %271 = vst [vmem:[#allocation2 + $0x132] sm:$0x3f] %v6724_v25  ;;  %6122 = vmatprep.subr.bf16.mxu1 %v6407_v32 }
  0x24   : > { %6041 = vmatmul.mubr.msk.bf16.gmra.mrb[8].mxu0 %vm399_vm1, %v6383_v7  ;;  %272 = vst [vmem:[#allocation2 + $0x14a] sm:$0x3f] %v6724_v25  ;;  %273 = vst [vmem:[#allocation2 + $0x162] sm:$0x3f] %v6724_v25 }
  0x25   : > { %6044 = vmatprep.mubr.msk.bf16.mxu0 %vm399_vm1, %v6384_v8  ;;  %6073 = vmatpush3.bf16.msra.mxu0 %v6398_v22  ;;  %274 = vst [vmem:[#allocation2 + $0x17a] sm:$0x3f] %v6724_v25  ;;  %275 = vst [vmem:[#allocation2 + $0x192] sm:$0x3f] %v6724_v25 }
  0x26   : > { %6074 = vmatprep.subr.bf16.mxu0 %v6399_v23  ;;  %276 = vst [vmem:[#allocation2 + $0x1aa] sm:$0x3f] %v6724_v25  ;;  %239 = vst [vmem:[#allocation2] sm:$0x3] %v6724_v25  ;;  %6123 = vmatpush3.bf16.msra.mxu1 %v6407_v32 }
  0x27   : > { %240 = vst [vmem:[#allocation2 + $0x18] sm:$0x3] %v6724_v25  ;;  %259 = vst [vmem:[#allocation2 + $0x12] sm:$0x3f] %v6724_v25  ;;  %6124 = vmatprep.subr.bf16.mxu1 %v6408_v33 }
  0x28   : > { %260 = vst [vmem:[#allocation2 + $0x2a] sm:$0x3f] %v6724_v25  ;;  %257 = vst [vmem:[#allocation2 + $0x1b0] sm:$0x3] %v6724_v25 }
  0x29   : > { %6075 = vmatpush3.bf16.msra.mxu0 %v6399_v23  ;;  %258 = vst [vmem:[#allocation2 + $0x1c8] sm:$0x3] %v6724_v25  ;;  %277 = vst [vmem:[#allocation2 + $0x1c2] sm:$0x3f] %v6724_v25 }
  0x2a   : > { %6076 = vmatprep.subr.bf16.mxu0 %v6400_v24  ;;  %278 = vst [vmem:[#allocation2 + $0x1da] sm:$0x3f] %v6724_v25  ;;  %6125 = vmatpush3.bf16.msra.mxu1 %v6408_v33 }
  0x2b   : > { %6126 = vmatprep.subr.bf16.mxu1 %v6409_v34 }
  0x2c   : > { %6045 = vmatmul.mubr.msk.bf16.gmra.mrb[12].mxu0 %vm399_vm1, %v6385_v9 }
  0x2d   : > { %6048 = vmatprep.mubr.msk.bf16.mxu0 %vm399_vm1, %v6386_v10  ;;  %6077 = vmatpush3.bf16.msra.mxu0 %v6400_v24 }
  0x2e   : > { %6078 = vmatprep.subr.bf16.mxu0 %v6401_v26  ;;  %6127 = vmatpush3.bf16.msra.mxu1 %v6409_v34 }
  0x2f   : > { %6160 = vmatprep.subr.bf16.mxu1 %v6859_v35 }
  0x31   : > { %6079 = vmatpush3.bf16.msra.mxu0 %v6401_v26 }
  0x34   : > { %6049 = vmatmul.mubr.msk.bf16.gmra.mrb[16].mxu0 %vm399_vm1, %v6387_v11 }
  0x35   : > { %6052 = vmatprep.mubr.msk.bf16.mxu0 %vm399_vm1, %v6388_v12 }
  0x3c   : > { %6053 = vmatmul.mubr.msk.bf16.gmra.mrb[20].mxu0 %vm399_vm1, %v6389_v13 }
  0x3d   : > { %6056 = vmatprep.mubr.msk.bf16.mxu0 %vm399_vm1, %v6390_v14 }
  0x44   : > { %6057 = vmatmul.mubr.msk.bf16.gmra.mrb[24].mxu0 %vm399_vm1, %v6391_v15 }
  0x45   : > { %6060 = vmatprep.mubr.msk.bf16.mxu0 %vm399_vm1, %v6392_v16 }
  0x4c   : > { %6061 = vmatmul.mubr.msk.bf16.gmra.mrb[28].mxu0 %vm399_vm1, %v6393_v17 }
  0xe7   : > { %v6034_v37 = vpop.f32.mrb[0].mxu0 }
  0xe8   : > { %v6868_v38 = vadd.f32 %v6034_v37, %v6865_v36  ;;  %v486_v39 = vpop.f32.mrb[1].mxu0 }
  0xe9   : > { %v6871_v40 = vadd.f32 %v6865_v36, %v486_v39  ;;  %v6035_v41 = vpop.f32.mrb[2].mxu0 }
  0xea   : > { %v5818_v42 = vmul.f32 -1.442695, %v6868_v38  ;;  %v6875_v43 = vadd.f32 %v6035_v41, %v6865_v36  ;;  %v489_v44 = vpop.f32.mrb[3].mxu0 }
  0xeb   : > { %v5816_v45 = vmul.f32 -1.442695, %v6871_v40  ;;  %v6879_v46 = vadd.f32 %v6865_v36, %v489_v44 }
  0xec   : > { %6426 = vpow2.f32 %v5818_v42  ;;  %v5819_v47 = vmul.f32 -1.442695, %v6875_v43 }
  0xed   : > { %6428 = vpow2.f32 %v5816_v45  ;;  %v5817_v48 = vmul.f32 -1.442695, %v6879_v46 }
  0xee   : > { %6430 = vpow2.f32 %v5819_v47 }
  0xef   : > { %6432 = vpow2.f32 %v5817_v48  ;;  %v6038_v49 = vpop.f32.mrb[4].mxu0 }
  0xf0   : > { %v6884_v50 = vadd.f32 %v6038_v49, %v6865_v36  ;;  %v502_v51 = vpop.f32.mrb[5].mxu0 }
  0xf1   : > { %v6887_v52 = vadd.f32 %v6865_v36, %v502_v51  ;;  %v6039_v53 = vpop.f32.mrb[6].mxu0  ;;  %v1143_v51 = vld [vmem:[#allocation2] sm:$0xff] }
  0xf2   : > { %v5822_v54 = vmul.f32 -1.442695, %v6884_v50  ;;  %v6891_v55 = vadd.f32 %v6039_v53, %v6865_v36  ;;  %v505_v56 = vpop.f32.mrb[7].mxu0  ;;  %v6934_v53 = vld [vmem:[#allocation2 + $0x18] sm:$0xff] }
  0xf3   : > { %v5820_v57 = vmul.f32 -1.442695, %v6887_v52  ;;  %v6895_v58 = vadd.f32 %v6865_v36, %v505_v56 }
  0xf4   : > { %6434 = vpow2.f32 %v5822_v54  ;;  %v5823_v59 = vmul.f32 -1.442695, %v6891_v55 }
  0xf5   : > { %6436 = vpow2.f32 %v5820_v57  ;;  %v5821_v60 = vmul.f32 -1.442695, %v6895_v58 }
  0xf6   : > { %v6427_v61 = vpop.eup %6426  ;;  %6438 = vpow2.f32 %v5823_v59 }
  0xf7   : > { %v6429_v62 = vpop.eup %6428  ;;  %v711_v63 = vadd.f32 1.0, %v6427_v61  ;;  %6440 = vpow2.f32 %v5821_v60  ;;  %v6042_v0 = vpop.f32.mrb[8].mxu0 }
  0xf8   : > { %v6431_v1 = vpop.eup %6430  ;;  %v709_v2 = vadd.f32 1.0, %v6429_v62  ;;  %v6900_v3 = vadd.f32 %v6042_v0, %v6865_v36  ;;  %v518_v4 = vpop.f32.mrb[9].mxu0 }
  0xf9   : > { %v6433_v5 = vpop.eup %6432  ;;  %6442 = vrcp.f32 %v711_v63  ;;  %v712_v6 = vadd.f32 1.0, %v6431_v1  ;;  %v6903_v7 = vadd.f32 %v6865_v36, %v518_v4  ;;  %v6043_v8 = vpop.f32.mrb[10].mxu0 }
  0xfa   : > { %6444 = vrcp.f32 %v709_v2  ;;  %v710_v9 = vadd.f32 1.0, %v6433_v5  ;;  %v5826_v10 = vmul.f32 -1.442695, %v6900_v3  ;;  %v6907_v11 = vadd.f32 %v6043_v8, %v6865_v36  ;;  %v521_v12 = vpop.f32.mrb[11].mxu0 }
  0xfb   : > { %6446 = vrcp.f32 %v712_v6  ;;  %v5824_v13 = vmul.f32 -1.442695, %v6903_v7  ;;  %v6911_v14 = vadd.f32 %v6865_v36, %v521_v12 }
  0xfc   : > { %6448 = vrcp.f32 %v710_v9  ;;  %v5827_v15 = vmul.f32 -1.442695, %v6907_v11 }
  0xfd   : > { %6450 = vpow2.f32 %v5826_v10  ;;  %v5825_v16 = vmul.f32 -1.442695, %v6911_v14 }
  0xfe   : > { %v6435_v17 = vpop.eup %6434  ;;  %6452 = vpow2.f32 %v5824_v13 }
  0xff   : > { %v6437_v18 = vpop.eup %6436  ;;  %v715_v19 = vadd.f32 1.0, %v6435_v17  ;;  %6454 = vpow2.f32 %v5827_v15  ;;  %v6046_v20 = vpop.f32.mrb[12].mxu0  ;;  %v1145_v15 = vld [vmem:[#allocation2 + $0x10] sm:$0xff] }
 0x100   : > { %v6439_v21 = vpop.eup %6438  ;;  %v713_v22 = vadd.f32 1.0, %v6437_v18  ;;  %6456 = vpow2.f32 %v5825_v16  ;;  %v6916_v23 = vadd.f32 %v6046_v20, %v6865_v36  ;;  %v534_v24 = vpop.f32.mrb[13].mxu0  ;;  %v6954_v16 = vld [vmem:[#allocation2 + $0x28] sm:$0xff] }
 0x101   : > { %v6441_v25 = vpop.eup %6440  ;;  %6458 = vrcp.f32 %v715_v19  ;;  %v716_v26 = vadd.f32 1.0, %v6439_v21  ;;  %v6919_v27 = vadd.f32 %v6865_v36, %v534_v24  ;;  %v6047_v28 = vpop.f32.mrb[14].mxu0 }
 0x102   : > { %6460 = vrcp.f32 %v713_v22  ;;  %v714_v29 = vadd.f32 1.0, %v6441_v25  ;;  %v5830_v30 = vmul.f32 -1.442695, %v6916_v23  ;;  %v6923_v31 = vadd.f32 %v6047_v28, %v6865_v36  ;;  %v537_v32 = vpop.f32.mrb[15].mxu0 }
 0x103   : > { %v6443_v33 = vpop.eup %6442  ;;  %6462 = vrcp.f32 %v716_v26  ;;  %v5828_v34 = vmul.f32 -1.442695, %v6919_v27  ;;  %v6927_v37 = vadd.f32 %v6865_v36, %v537_v32  ;;  %v6962_v26 = vmax.f32 %v1145_v15, %v6954_v16 }
 0x104   : > { %v6445_v39 = vpop.eup %6444  ;;  %v807_v41 = vmul.f32 %v6443_v33, %v6868_v38  ;;  %6464 = vrcp.f32 %v714_v29  ;;  %v5831_v42 = vmul.f32 -1.442695, %v6923_v31 }
 0x105   : > { %v6447_v44 = vpop.eup %6446  ;;  %v805_v45 = vmul.f32 %v6445_v39, %v6871_v40  ;;  %6466 = vpow2.f32 %v5830_v30  ;;  %v5829_v47 = vmul.f32 -1.442695, %v6927_v37 }
 0x106   : > { %v6449_v48 = vpop.eup %6448  ;;  %1113 = vst [vmem:[#allocation2 + $0x4a] sm:$0xff] %v807_v41  ;;  %v808_v49 = vmul.f32 %v6447_v44, %v6875_v43  ;;  %6468 = vpow2.f32 %v5828_v34 }
 0x107   : > { %v6451_v54 = vpop.eup %6450  ;;  %1111 = vst [vmem:[#allocation2 + $0x32] sm:$0xff] %v805_v45  ;;  %v806_v38 = vmul.f32 %v6449_v48, %v6879_v46  ;;  %6470 = vpow2.f32 %v5831_v42  ;;  %v6050_v56 = vpop.f32.mrb[16].mxu0  ;;  %v6944_v46 = vmax.f32 %v1143_v51, %v6934_v53 }
 0x108   : > { %v6453_v57 = vpop.eup %6452  ;;  %v838_v59 = vpack.c.bf16 %v808_v49, %v807_v41  ;;  %1114 = vst [vmem:[#allocation2 + $0x52] sm:$0xff] %v808_v49  ;;  %v719_v40 = vadd.f32 1.0, %v6451_v54  ;;  %6472 = vpow2.f32 %v5829_v47  ;;  %v6938_v60 = vadd.f32 %v6050_v56, %v6865_v36  ;;  %v550_v61 = vpop.f32.mrb[17].mxu0 }
 0x109   : > { %v6455_v43 = vpop.eup %6454  ;;  %1112 = vst [vmem:[#allocation2 + $0x3a] sm:$0xff] %v806_v38  ;;  %v717_v62 = vadd.f32 1.0, %v6453_v57  ;;  %v6941_v63 = vadd.f32 %v6865_v36, %v550_v61  ;;  %v6051_v0 = vpop.f32.mrb[18].mxu0  ;;  %v837_v1 = vpack.c.bf16 %v806_v38, %v805_v45 }
 0x10a   : > { %v6457_v2 = vpop.eup %6456  ;;  %6474 = vrcp.f32 %v719_v40  ;;  %v720_v4 = vadd.f32 1.0, %v6455_v43  ;;  %v5834_v5 = vmul.f32 -1.442695, %v6938_v60  ;;  %v6948_v6 = vadd.f32 %v6051_v0, %v6865_v36  ;;  %v553_v8 = vpop.f32.mrb[19].mxu0 }
 0x10b   : > { %v6459_v9 = vpop.eup %6458  ;;  %6476 = vrcp.f32 %v717_v62  ;;  %v718_v10 = vadd.f32 1.0, %v6457_v2  ;;  %v5832_v12 = vmul.f32 -1.442695, %v6941_v63  ;;  %v6952_v13 = vadd.f32 %v6865_v36, %v553_v8  ;;  %6080 = vmatprep.mubr.bf16.mxu0 %v837_v1 }
 0x10c   : > { %v6461_v17 = vpop.eup %6460  ;;  %v811_v18 = vmul.f32 %v6459_v9, %v6884_v50  ;;  %6478 = vrcp.f32 %v720_v4  ;;  %v5835_v19 = vmul.f32 -1.442695, %v6948_v6  ;;  %6081 = vmatmul.mubr.bf16.vlgmr.msra.gmra.mrb[32].mxu0 %v838_v59 }
 0x10d   : > { %v6463_v20 = vpop.eup %6462  ;;  %v809_v21 = vmul.f32 %v6461_v17, %v6887_v52  ;;  %6480 = vrcp.f32 %v718_v10  ;;  %v5833_v22 = vmul.f32 -1.442695, %v6952_v13  ;;  %v6992_v1 = vld [vmem:[#allocation2 + $0x48] sm:$0xff] }
 0x10e   : > { %v6465_v24 = vpop.eup %6464  ;;  %1117 = vst [vmem:[#allocation2 + $0x7a] sm:$0xff] %v811_v18  ;;  %v812_v25 = vmul.f32 %v6463_v20, %v6891_v55  ;;  %6482 = vpow2.f32 %v5834_v5  ;;  %v6964_v28 = vld [vmem:[#allocation2 + $0x30] sm:$0xff] }
 0x10f   : > { %v6467_v50 = vpop.eup %6466  ;;  %1115 = vst [vmem:[#allocation2 + $0x62] sm:$0xff] %v809_v21  ;;  %v810_v29 = vmul.f32 %v6465_v24, %v6895_v58  ;;  %6484 = vpow2.f32 %v5832_v12  ;;  %v6054_v30 = vpop.f32.mrb[20].mxu0  ;;  %v1336_v52 = vmax.f32 %v6944_v46, %v6964_v28  ;;  %v1243_v32 = vmax.f32 %v6934_v53, %v6964_v28  ;;  %v6996_v8 = vld [vmem:[#allocation2 + $0x50] sm:$0xff]  ;;  %v6998_v9 = vld [vmem:[#allocation2 + $0x58] sm:$0xff] }
 0x110   : > { %v6469_v33 = vpop.eup %6468  ;;  %1118 = vst [vmem:[#allocation2 + $0x82] sm:$0xff] %v812_v25  ;;  %v723_v55 = vadd.f32 1.0, %v6467_v50  ;;  %6486 = vpow2.f32 %v5835_v19  ;;  %v6972_v34 = vadd.f32 %v6054_v30, %v6865_v36  ;;  %v566_v39 = vpop.f32.mrb[21].mxu0  ;;  %v840_v41 = vpack.c.bf16 %v812_v25, %v811_v18  ;;  %v6977_v48 = vld [vmem:[#allocation2 + $0x38] sm:$0xff]  ;;  %v6979_v49 = vld [vmem:[#allocation2 + $0x40] sm:$0xff] }
 0x111   : > { %v6471_v42 = vpop.eup %6470  ;;  %1116 = vst [vmem:[#allocation2 + $0x6a] sm:$0xff] %v810_v29  ;;  %v721_v58 = vadd.f32 1.0, %v6469_v33  ;;  %6488 = vpow2.f32 %v5833_v22  ;;  %v6975_v44 = vadd.f32 %v6865_v36, %v566_v39  ;;  %v6055_v45 = vpop.f32.mrb[22].mxu0  ;;  %v839_v47 = vpack.c.bf16 %v810_v29, %v809_v21 }
 0x112   : > { %v6473_v51 = vpop.eup %6472  ;;  %6490 = vrcp.f32 %v723_v55  ;;  %v724_v54 = vadd.f32 1.0, %v6471_v42  ;;  %v5838_v38 = vmul.f32 -1.442695, %v6972_v34  ;;  %v6983_v56 = vadd.f32 %v6055_v45, %v6865_v36  ;;  %v569_v57 = vpop.f32.mrb[23].mxu0 }
 0x113   : > { %6492 = vrcp.f32 %v721_v58  ;;  %v722_v59 = vadd.f32 1.0, %v6473_v51  ;;  %v5836_v40 = vmul.f32 -1.442695, %v6975_v44  ;;  %v6987_v61 = vadd.f32 %v6865_v36, %v569_v57  ;;  %6084 = vmatprep.mubr.bf16.mxu0 %v839_v47 }
 0x114   : > { %v6475_v43 = vpop.eup %6474  ;;  %6494 = vrcp.f32 %v724_v54  ;;  %v5839_v62 = vmul.f32 -1.442695, %v6983_v56  ;;  %6085 = vmatmul.mubr.bf16.gmra.mrb[36].mxu0 %v840_v41  ;;  %v1338_v0 = vmax.f32 %v6962_v26, %v6979_v49  ;;  %v1433_v10 = vmax.f32 %v1336_v52, %v6992_v1 }
 0x115   : > { %v6477_v2 = vpop.eup %6476  ;;  %v815_v4 = vmul.f32 %v6475_v43, %v6900_v3  ;;  %6496 = vrcp.f32 %v722_v59  ;;  %v5837_v5 = vmul.f32 -1.442695, %v6987_v61  ;;  %v1434_v17 = vmax.f32 %v6977_v48, %v6996_v8 }
 0x116   : > { %v6479_v12 = vpop.eup %6478  ;;  %v813_v15 = vmul.f32 %v6477_v2, %v6903_v7  ;;  %6498 = vpow2.f32 %v5838_v38  ;;  %v1435_v18 = vmax.f32 %v1338_v0, %v6998_v9  ;;  %v7005_v3 = vld [vmem:[#allocation2 + $0x60] sm:$0xff]  ;;  %v1245_v29 = vmax.f32 %v6954_v16, %v6979_v49 }
 0x117   : > { %v6481_v19 = vpop.eup %6480  ;;  %1121 = vst [vmem:[#allocation2 + $0xaa] sm:$0xff] %v815_v4  ;;  %v816_v20 = vmul.f32 %v6479_v12, %v6907_v11  ;;  %6500 = vpow2.f32 %v5836_v40  ;;  %v6058_v21 = vpop.f32.mrb[24].mxu0  ;;  %v7009_v22 = vmax.f32 %v1433_v10, %v7005_v3 }
 0x118   : > { %v6483_v24 = vpop.eup %6482  ;;  %1119 = vst [vmem:[#allocation2 + $0x92] sm:$0xff] %v813_v15  ;;  %v814_v7 = vmul.f32 %v6481_v19, %v6911_v14  ;;  %6502 = vpow2.f32 %v5839_v62  ;;  %v7013_v25 = vadd.f32 %v6058_v21, %v6865_v36  ;;  %v582_v50 = vpop.f32.mrb[25].mxu0  ;;  %v7020_v39 = vld [vmem:[#allocation2 + $0x68] sm:$0xff]  ;;  %v7026_v48 = vld [vmem:[#allocation2 + $0x70] sm:$0xff] }
 0x119   : > { %v6485_v30 = vpop.eup %6484  ;;  %1122 = vst [vmem:[#allocation2 + $0xb2] sm:$0xff] %v816_v20  ;;  %v727_v11 = vadd.f32 1.0, %v6483_v24  ;;  %6504 = vpow2.f32 %v5837_v5  ;;  %v7018_v52 = vadd.f32 %v6865_v36, %v582_v50  ;;  %v6059_v33 = vpop.f32.mrb[26].mxu0  ;;  %v842_v55 = vpack.c.bf16 %v816_v20, %v815_v4 }
 0x11a   : > { %v6487_v14 = vpop.eup %6486  ;;  %1120 = vst [vmem:[#allocation2 + $0x9a] sm:$0xff] %v814_v7  ;;  %v725_v41 = vadd.f32 1.0, %v6485_v30  ;;  %v5842_v42 = vmul.f32 -1.442695, %v7013_v25  ;;  %v7024_v58 = vadd.f32 %v6059_v33, %v6865_v36  ;;  %v585_v45 = vpop.f32.mrb[27].mxu0  ;;  %v841_v47 = vpack.c.bf16 %v814_v7, %v813_v15 }
 0x11b   : > { %v6489_v51 = vpop.eup %6488  ;;  %6506 = vrcp.f32 %v727_v11  ;;  %v728_v54 = vadd.f32 1.0, %v6487_v14  ;;  %v5840_v38 = vmul.f32 -1.442695, %v7018_v52  ;;  %v7030_v57 = vadd.f32 %v6865_v36, %v585_v45 }
 0x11c   : > { %v6491_v59 = vpop.eup %6490  ;;  %6508 = vrcp.f32 %v725_v41  ;;  %v726_v40 = vadd.f32 1.0, %v6489_v51  ;;  %v5843_v43 = vmul.f32 -1.442695, %v7024_v58  ;;  %6088 = vmatprep.mubr.bf16.mxu0 %v841_v47  ;;  %v7034_v62 = vmax.f32 %v1434_v17, %v7020_v39 }
 0x11d   : > { %v6493_v0 = vpop.eup %6492  ;;  %v7037_v2 = vmul.f32 %v6491_v59, %v6916_v23  ;;  %6510 = vrcp.f32 %v728_v54  ;;  %v5841_v4 = vmul.f32 -1.442695, %v7030_v57  ;;  %6089 = vmatmul.mubr.bf16.gmra.mrb[40].mxu0 %v842_v55  ;;  %v7041_v5 = vmax.f32 %v1435_v18, %v7026_v48 }
 0x11e   : > { %v6495_v10 = vpop.eup %6494  ;;  %v817_v12 = vmul.f32 %v6493_v0, %v6919_v27  ;;  %6512 = vrcp.f32 %v726_v40  ;;  %v1627_v15 = vrot.slane %v7009_v22, 1  ;;  %v1628_v17 = vrot.slane %v7034_v62, 1 }
 0x11f   : > { %v6497_v19 = vpop.eup %6496  ;;  %1125 = vst [vmem:[#allocation2 + $0xda] sm:$0xff] %v7037_v2  ;;  %v820_v23 = vmul.f32 %v6495_v10, %v6923_v31  ;;  %6514 = vpow2.f32 %v5842_v42  ;;  %v6062_v20 = vpop.f32.mrb[28].mxu0  ;;  %v1630_v21 = vrot.slane %v7041_v5, 1  ;;  %v1772_v18 = vrot.slane %v7009_v22, 2 }
 0x120   : > { %v6499_v24 = vpop.eup %6498  ;;  %1123 = vst [vmem:[#allocation2 + $0xc2] sm:$0xff] %v817_v12  ;;  %v818_v27 = vmul.f32 %v6497_v19, %v6927_v37  ;;  %6516 = vpow2.f32 %v5840_v38  ;;  %v7052_v7 = vadd.f32 %v6062_v20, %v6865_v36  ;;  %v598_v50 = vpop.f32.mrb[29].mxu0  ;;  %v1629_v30 = vsel %vm1626_vm2, %v1627_v15, %v1628_v17 }
 0x121   : > { %v6501_v11 = vpop.eup %6500  ;;  %1126 = vst [vmem:[#allocation2 + $0xe2] sm:$0xff] %v820_v23  ;;  %v731_v31 = vadd.f32 1.0, %v6499_v24  ;;  %6518 = vpow2.f32 %v5843_v43  ;;  %v7056_v33 = vadd.f32 %v6865_v36, %v598_v50  ;;  %v6063_v55 = vpop.f32.mrb[30].mxu0  ;;  %v844_v14 = vpack.c.bf16 %v820_v23, %v7037_v2 }
 0x122   : > { %v6503_v41 = vpop.eup %6502  ;;  %1124 = vst [vmem:[#allocation2 + $0xca] sm:$0xff] %v818_v27  ;;  %v729_v37 = vadd.f32 1.0, %v6501_v11  ;;  %6520 = vpow2.f32 %v5841_v4  ;;  %v5846_v42 = vmul.f32 -1.442695, %v7052_v7  ;;  %v7061_v45 = vadd.f32 %v6063_v55, %v6865_v36  ;;  %v601_v47 = vpop.f32.mrb[31].mxu0 }
 0x123   : > { %v6505_v51 = vpop.eup %6504  ;;  %6522 = vrcp.f32 %v731_v31  ;;  %v732_v54 = vadd.f32 1.0, %v6503_v41  ;;  %v5844_v38 = vmul.f32 -1.442695, %v7056_v33  ;;  %v7065_v59 = vadd.f32 %v6865_v36, %v601_v47 }
 0x124   : > { %6524 = vrcp.f32 %v729_v37  ;;  %v730_v40 = vadd.f32 1.0, %v6505_v51  ;;  %v5847_v43 = vmul.f32 -1.442695, %v7061_v45  ;;  %v843_v0 = vpack.c.bf16 %v818_v27, %v817_v12 }
 0x125   : > { %v6507_v2 = vpop.eup %6506  ;;  %6526 = vrcp.f32 %v732_v54  ;;  %v5845_v4 = vmul.f32 -1.442695, %v7065_v59  ;;  %v1631_v10 = vsel %vm1626_vm2, %v1628_v17, %v1630_v21  ;;  %v1739_v15 = vmax.f32 %v7009_v22, %v1629_v30 }
 0x126   : > { %v6509_v19 = vpop.eup %6508  ;;  %v7072_v23 = vmul.f32 %v6507_v2, %v6938_v60  ;;  %6528 = vrcp.f32 %v730_v40  ;;  %6092 = vmatprep.mubr.bf16.mxu0 %v843_v0  ;;  %v1740_v36 = vmax.f32 %v7034_v62, %v1631_v10  ;;  %v1773_v20 = vrot.slane %v7034_v62, 2 }
 0x127   : > { %v6511_v24 = vpop.eup %6510  ;;  %v7077_v12 = vmul.f32 %v6509_v19, %v6941_v63  ;;  %6530 = vpow2.f32 %v5846_v42  ;;  %6093 = vmatmul.mubr.bf16.gmra.mrb[44].mxu0 %v844_v14  ;;  %v1775_v17 = vrot.slane %v7041_v5, 2  ;;  %v1917_v21 = vrot.slane %v7009_v22, 3 }
 0x128   : > { %v6513_v27 = vpop.eup %6512  ;;  %1129 = vst [vmem:[#allocation2 + $0x10a] sm:$0xff] %v7072_v23  ;;  %v7083_v60 = vmul.f32 %v6511_v24, %v6948_v6  ;;  %6532 = vpow2.f32 %v5844_v38  ;;  %v1774_v50 = vsel %vm1771_vm3, %v1772_v18, %v1773_v20  ;;  %v1918_v30 = vrot.slane %v7034_v62, 3 }
 0x129   : > { %v6515_v11 = vpop.eup %6514  ;;  %1127 = vst [vmem:[#allocation2 + $0xf2] sm:$0xff] %v7077_v12  ;;  %v7089_v63 = vmul.f32 %v6513_v27, %v6952_v13  ;;  %6534 = vpow2.f32 %v5847_v43  ;;  %v1776_v31 = vsel %vm1771_vm3, %v1773_v20, %v1775_v17  ;;  %v1884_v55 = vmax.f32 %v1739_v15, %v1774_v50 }
 0x12a   : > { %v6517_v14 = vpop.eup %6516  ;;  %1130 = vst [vmem:[#allocation2 + $0x112] sm:$0xff] %v7083_v60  ;;  %v735_v6 = vadd.f32 1.0, %v6515_v11  ;;  %6536 = vpow2.f32 %v5845_v4  ;;  %v1885_v41 = vmax.f32 %v1740_v36, %v1776_v31  ;;  %v1919_v18 = vsel %vm1916_vm4, %v1917_v21, %v1918_v30 }
 0x12b   : > { %v6519_v37 = vpop.eup %6518  ;;  %1128 = vst [vmem:[#allocation2 + $0xfa] sm:$0xff] %v7089_v63  ;;  %v733_v42 = vadd.f32 1.0, %v6517_v14  ;;  %v1920_v47 = vrot.slane %v7041_v5, 3  ;;  %v2029_v13 = vmax.f32 %v1884_v55, %v1919_v18  ;;  %v2061_v51 = vrot.slane %v7009_v22, 4  ;;  %v6414_v22 = vld [vmem:[%s9390_s3 + $0xc0] sm:$0xff]  }
 0x12c   : > { %v6521_v54 = vpop.eup %6520  ;;  %6538 = vrcp.f32 %v735_v6  ;;  %v736_v38 = vadd.f32 1.0, %v6519_v37  ;;  %v2062_v40 = vrot.slane %v7034_v62, 4  ;;  %v2064_v43 = vrot.slane %v7041_v5, 4  ;;  %6208 = vmatprep.subr.bf16.mxu0 %v6414_v22  ;;  %v7137_v37 = vld [vmem:[#allocation2 + $0x80] sm:$0xff] }
 0x12d   : > { %v6523_v0 = vpop.eup %6522  ;;  %6540 = vrcp.f32 %v733_v42  ;;  %v734_v2 = vadd.f32 1.0, %v6521_v54  ;;  %v1921_v4 = vsel %vm1916_vm4, %v1918_v30, %v1920_v47  ;;  %v1339_v10 = vmax.f32 %v1243_v32, %v6992_v1  ;;  %6209 = vmatpush3.bf16.msra.mxu0 %v6414_v22 }
 0x12e   : > { %v6525_v15 = vpop.eup %6524  ;;  %v7108_v19 = vmul.f32 %v6523_v0, %v6972_v34  ;;  %6542 = vrcp.f32 %v736_v38  ;;  %v2030_v5 = vmax.f32 %v1885_v41, %v1921_v4  ;;  %v2063_v36 = vsel %vm448_vm0, %v2061_v51, %v2062_v40  ;;  %v7134_v41 = vld [vmem:[#allocation2 + $0x78] sm:$0xff] }
 0x12f   : > { %v6527_v20 = vpop.eup %6526  ;;  %v7112_v24 = vmul.f32 %v6525_v15, %v6975_v44  ;;  %6544 = vrcp.f32 %v734_v2  ;;  %v2065_v17 = vsel %vm448_vm0, %v2062_v40, %v2064_v43  ;;  %v2173_v32 = vmax.f32 %v2029_v13, %v2063_v36 }
 0x130   : > { %v6529_v21 = vpop.eup %6528  ;;  %1133 = vst [vmem:[#allocation2 + $0x13a] sm:$0xff] %v7108_v19  ;;  %v7117_v27 = vmul.f32 %v6527_v20, %v6983_v56  ;;  %v2174_v34 = vmax.f32 %v2030_v5, %v2065_v17  ;;  %v1341_v50 = vmax.f32 %v1245_v29, %v6998_v9  ;;  %v1436_v11 = vmax.f32 %v1339_v10, %v7005_v3 }
 0x131   : > { %v6531_v44 = vpop.eup %6530  ;;  %1131 = vst [vmem:[#allocation2 + $0x122] sm:$0xff] %v7112_v24  ;;  %v7125_v30 = vmul.f32 %v6529_v21, %v6987_v61  ;;  %v845_v31 = vpack.c.bf16 %v7089_v63, %v7077_v12  ;;  %v846_v56 = vpack.c.bf16 %v7083_v60, %v7072_v23  ;;  %2542 = vst [vmem:[#allocation2 + $0x32] sm:$0xff] %v2173_v32  ;;  %v7139_v12 = vld [vmem:[#allocation2 + $0x88] sm:$0xff] }
 0x132   : > { %v6533_v55 = vpop.eup %6532  ;;  %1134 = vst [vmem:[#allocation2 + $0x142] sm:$0xff] %v7117_v27  ;;  %v739_v29 = vadd.f32 1.0, %v6531_v44  ;;  %v2237_v14 = vpack.c.bf16 %v2174_v34, %v2173_v32  ;;  %v1438_v6 = vmax.f32 %v1341_v50, %v7026_v48  ;;  %2543 = vst [vmem:[#allocation2 + $0x3a] sm:$0xff] %v2174_v34  ;;  %v1533_v23 = vmax.f32 %v1436_v11, %v7134_v41 }
 0x133   : > { %v6535_v61 = vpop.eup %6534  ;;  %1132 = vst [vmem:[#allocation2 + $0x12a] sm:$0xff] %v7125_v30  ;;  %v737_v18 = vadd.f32 1.0, %v6533_v55  ;;  %6096 = vmatprep.mubr.bf16.mxu0 %v845_v31  ;;  %v1246_v60 = vmax.f32 %v6964_v28, %v6992_v1  ;;  %v7146_v47 = vmax.f32 %v7034_v62, %v7137_v37 }
 0x134   : > { %v6537_v63 = vpop.eup %6536  ;;  %6546 = vrcp.f32 %v739_v29  ;;  %v740_v42 = vadd.f32 1.0, %v6535_v61  ;;  %6128 = vmatprep.mubr.bf16.mxu1 %v2237_v14  ;;  %v1535_v13 = vmax.f32 %v1438_v6, %v7139_v12  ;;  %6097 = vmatmul.mubr.bf16.gmra.mrb[48].mxu0 %v846_v56  ;;  %v1632_v54 = vrot.slane %v1533_v23, 1 }
 0x135   : > { %6548 = vrcp.f32 %v737_v18  ;;  %v738_v51 = vadd.f32 1.0, %v6537_v63  ;;  %v1777_v38 = vrot.slane %v1533_v23, 2  ;;  %v1633_v43 = vrot.slane %v7146_v47, 1 }
 0x136   : > { %v6539_v40 = vpop.eup %6538  ;;  %6550 = vrcp.f32 %v740_v42  ;;  %v1635_v28 = vrot.slane %v1535_v13, 1  ;;  %v1778_v0 = vrot.slane %v7146_v47, 2  ;;  %v1780_v62 = vrot.slane %v1535_v13, 2 }
 0x137   : > { %v6541_v2 = vpop.eup %6540  ;;  %v7152_v4 = vmul.f32 %v6539_v40, %v7013_v25  ;;  %6552 = vrcp.f32 %v738_v51  ;;  %v1922_v10 = vrot.slane %v1533_v23, 3  ;;  %v1634_v5 = vsel %vm1626_vm2, %v1632_v54, %v1633_v43  ;;  %v7185_v51 = vld [vmem:[#allocation2 + $0x90] sm:$0xff] }
 0x138   : > { %v6543_v22 = vpop.eup %6542  ;;  %v7155_v15 = vmul.f32 %v6541_v2, %v7018_v52  ;;  %v1636_v36 = vsel %vm1626_vm2, %v1633_v43, %v1635_v28  ;;  %v1779_v20 = vsel %vm1771_vm3, %v1777_v38, %v1778_v0  ;;  %v1741_v25 = vmax.f32 %v1533_v23, %v1634_v5  ;;  %v7173_v29 = vld [vmem:[#allocation2 + $0x30] sm:$0xff] }
 0x139   : > { %v6545_v17 = vpop.eup %6544  ;;  %1137 = vst [vmem:[#allocation2 + $0x16a] sm:$0xff] %v7152_v4  ;;  %v7162_v32 = vmul.f32 %v6543_v22, %v7024_v58  ;;  %v1742_v21 = vmax.f32 %v7146_v47, %v1636_v36  ;;  %v1781_v34 = vsel %vm1771_vm3, %v1778_v0, %v1780_v62  ;;  %v1923_v50 = vrot.slane %v7146_v47, 3  ;;  %v7181_v18 = vld [vmem:[#allocation2 + $0x38] sm:$0xff]  ;;  %v7189_v43 = vld [vmem:[#allocation2 + $0x40] sm:$0xff]  ;;  %v7200_v22 = vld [vmem:[#allocation2 + $0x8] sm:$0xff] }
 0x13a   : > { %1135 = vst [vmem:[#allocation2 + $0x152] sm:$0xff] %v7155_v15  ;;  %v7168_v52 = vmul.f32 %v6545_v17, %v7030_v57  ;;  %v1925_v44 = vrot.slane %v1535_v13, 3  ;;  %v2066_v11 = vrot.slane %v1533_v23, 4  ;;  %v1886_v31 = vmax.f32 %v1741_v25, %v1779_v20  ;;  %v7196_v62 = vld [vmem:[#allocation2 + $0x98] sm:$0xff] }
 0x13b   : > { %1138 = vst [vmem:[#allocation2 + $0x172] sm:$0xff] %v7162_v32  ;;  %v1887_v56 = vmax.f32 %v1742_v21, %v1781_v34  ;;  %v2067_v58 = vrot.slane %v7146_v47, 4  ;;  %v2069_v55 = vrot.slane %v1535_v13, 4  ;;  %v1924_v14 = vsel %vm1916_vm4, %v1922_v10, %v1923_v50  ;;  %v7198_v10 = vld [vmem:[#allocation2 + $0xa0] sm:$0xff] }
 0x13c   : > { %1136 = vst [vmem:[#allocation2 + $0x15a] sm:$0xff] %v7168_v52  ;;  %v1926_v57 = vsel %vm1916_vm4, %v1923_v50, %v1925_v44  ;;  %v1248_v6 = vmax.f32 %v6979_v49, %v6998_v9  ;;  %v1342_v61 = vmax.f32 %v1246_v60, %v7005_v3  ;;  %v2031_v23 = vmax.f32 %v1886_v31, %v1924_v14 }
 0x13d   : > { %v2032_v63 = vmax.f32 %v1887_v56, %v1926_v57  ;;  %v2068_v42 = vsel %vm448_vm0, %v2066_v11, %v2067_v58  ;;  %v2070_v13 = vsel %vm448_vm0, %v2067_v58, %v2069_v55  ;;  %v2673_v49 = vmax.f32 %v6934_v53, %v7173_v29  ;;  %v6415_v11 = vld [vmem:[%s9390_s3 + $0xc8] sm:$0xff]  }
 0x13e   : > { %v6547_v54 = vpop.eup %6546  ;;  %v1344_v38 = vmax.f32 %v1248_v6, %v7026_v48  ;;  %v1439_v40 = vmax.f32 %v1342_v61, %v7134_v41  ;;  %v2175_v0 = vmax.f32 %v2031_v23, %v2068_v42  ;;  %v2674_v5 = vmax.f32 %v7200_v22, %v7181_v18  ;;  %6210 = vmatprep.subr.bf16.mxu0 %v6415_v11  ;;  %v7295_v22 = vld [vmem:[#allocation2 + $0xb8] sm:$0xff] }
 0x13f   : > { %v6549_v60 = vpop.eup %6548  ;;  %v7194_v28 = vmul.f32 %v6547_v54, %v7052_v7  ;;  %v2176_v2 = vmax.f32 %v2032_v63, %v2070_v13  ;;  %v2675_v50 = vmax.f32 %v6954_v16, %v7189_v43  ;;  %v2766_v44 = vmax.f32 %v6944_v46, %v7173_v29  ;;  %6211 = vmatpush3.bf16.msra.mxu0 %v6415_v11  ;;  %v6412_v54 = vld [vmem:[%s9390_s3 + $0x90] sm:$0xff]  }
 0x140   : > { %v6551_v36 = vpop.eup %6550  ;;  %v7205_v20 = vmul.f32 %v6549_v60, %v7056_v33  ;;  %v1441_v17 = vmax.f32 %v1344_v38, %v7139_v12  ;;  %v1536_v7 = vmax.f32 %v1439_v40, %v7185_v51  ;;  %v6411_v33 = vld [vmem:[%s9390_s3 + $0x88] sm:$0xff]   ;;  %2544 = vst [vmem:[#allocation2 + $0x4a] sm:$0xff] %v2175_v0  ;;  %v1537_v31 = vmax.f32 %v7146_v47, %v7196_v62 }
 0x141   : > { %v6553_v25 = vpop.eup %6552  ;;  %1141 = vst [vmem:[#allocation2 + $0x19a] sm:$0xff] %v7194_v28  ;;  %v7211_v21 = vmul.f32 %v6551_v36, %v7061_v45  ;;  %v2238_v34 = vpack.c.bf16 %v2176_v2, %v2175_v0  ;;  %2545 = vst [vmem:[#allocation2 + $0x52] sm:$0xff] %v2176_v2  ;;  %v2768_v11 = vmax.f32 %v6962_v26, %v7189_v43  ;;  %v6413_v26 = vld [vmem:[%s9390_s3 + $0x98] sm:$0xff]  }
 0x142   : > { %1139 = vst [vmem:[#allocation2 + $0x182] sm:$0xff] %v7205_v20  ;;  %v7225_v45 = vmul.f32 %v6553_v25, %v7065_v59  ;;  %v1538_v56 = vmax.f32 %v1441_v17, %v7198_v10  ;;  %v1637_v58 = vrot.slane %v1536_v7, 1  ;;  %v1782_v55 = vrot.slane %v1536_v7, 2 }
 0x143   : > { %1142 = vst [vmem:[#allocation2 + $0x1a2] sm:$0xff] %v7211_v21  ;;  %6129 = vmatmul.mubr.bf16.vlgmr.msra.gmra.mrb[0].mxu1 %v2238_v34  ;;  %v1927_v14 = vrot.slane %v1536_v7, 3  ;;  %v2071_v57 = vrot.slane %v1536_v7, 4  ;;  %v1638_v6 = vrot.slane %v1537_v31, 1  ;;  %v1783_v61 = vrot.slane %v1537_v31, 2 }
 0x144   : > { %1140 = vst [vmem:[#allocation2 + $0x18a] sm:$0xff] %v7225_v45  ;;  %6161 = vmatpush3.bf16.msra.mxu1 %v6859_v35  ;;  %v1640_v59 = vrot.slane %v1538_v56, 1  ;;  %v1785_v23 = vrot.slane %v1538_v56, 2  ;;  %v1928_v47 = vrot.slane %v1537_v31, 3  ;;  %v1930_v63 = vrot.slane %v1538_v56, 3 }
 0x145   : > { %v2072_v42 = vrot.slane %v1537_v31, 4  ;;  %v2074_v13 = vrot.slane %v1538_v56, 4  ;;  %6162 = vmatprep.subr.bf16.mxu1 %v6411_v33  ;;  %v1639_v38 = vsel %vm1626_vm2, %v1637_v58, %v1638_v6  ;;  %v1784_v35 = vsel %vm1771_vm3, %v1782_v55, %v1783_v61 }
 0x146   : > { %v1641_v40 = vsel %vm1626_vm2, %v1638_v6, %v1640_v59  ;;  %v1786_v60 = vsel %vm1771_vm3, %v1783_v61, %v1785_v23  ;;  %v1743_v0 = vmax.f32 %v1536_v7, %v1639_v38  ;;  %v1929_v36 = vsel %vm1916_vm4, %v1927_v14, %v1928_v47 }
 0x147   : > { %v1744_v2 = vmax.f32 %v1537_v31, %v1641_v40  ;;  %v1931_v17 = vsel %vm1916_vm4, %v1928_v47, %v1930_v63  ;;  %v2073_v25 = vsel %vm448_vm0, %v2071_v57, %v2072_v42  ;;  %v2075_v34 = vsel %vm448_vm0, %v2072_v42, %v2074_v13  ;;  %v7248_v58 = vld [vmem:[#allocation2 + $0x48] sm:$0xff] }
 0x148   : > { %v1249_v56 = vmax.f32 %v6992_v1, %v7005_v3  ;;  %v7250_v55 = vld [vmem:[#allocation2 + $0x50] sm:$0xff]  ;;  %v7252_v7 = vld [vmem:[#allocation2 + $0x58] sm:$0xff]  ;;  %6163 = vmatpush3.bf16.msra.mxu1 %v6411_v33  ;;  %v1888_v31 = vmax.f32 %v1743_v0, %v1784_v35  ;;  %v1250_v57 = vmax.f32 %v6996_v8, %v7020_v39  ;;  %v1251_v6 = vmax.f32 %v6998_v9, %v7026_v48 }
 0x149   : > { %v1889_v14 = vmax.f32 %v1744_v2, %v1786_v60  ;;  %6164 = vmatprep.subr.bf16.mxu1 %v6412_v54  ;;  %v2676_v59 = vmax.f32 %v7173_v29, %v7248_v58  ;;  %v2677_v33 = vmax.f32 %v7181_v18, %v7250_v55  ;;  %v2678_v61 = vmax.f32 %v7189_v43, %v7252_v7  ;;  %v7293_v0 = vld [vmem:[#allocation2 + $0xb0] sm:$0xff] }
 0x14a   : > { %v1345_v1 = vmax.f32 %v1249_v56, %v7134_v41  ;;  %v2033_v8 = vmax.f32 %v1888_v31, %v1929_v36  ;;  %v1346_v9 = vmax.f32 %v1250_v57, %v7137_v37  ;;  %v1347_v47 = vmax.f32 %v1251_v6, %v7139_v12 }
 0x14b   : > { %v2034_v23 = vmax.f32 %v1889_v14, %v1931_v17  ;;  %v7275_v42 = vmax.f32 %v2673_v49, %v7248_v58  ;;  %v7281_v13 = vmax.f32 %v2674_v5, %v7250_v55  ;;  %v7287_v38 = vmax.f32 %v2675_v50, %v7252_v7  ;;  %v7291_v49 = vld [vmem:[#allocation2 + $0xa8] sm:$0xff] }
 0x14c   : > { %v1442_v63 = vmax.f32 %v1345_v1, %v7185_v51  ;;  %6165 = vmatpush3.bf16.msra.mxu1 %v6412_v54  ;;  %v2177_v40 = vmax.f32 %v2033_v8, %v2073_v25  ;;  %v1443_v60 = vmax.f32 %v1346_v9, %v7196_v62  ;;  %v1444_v53 = vmax.f32 %v1347_v47, %v7198_v10  ;;  %v6416_v54 = vld [vmem:[%s9390_s3 + $0xa0] sm:$0xff]  }
 0x14d   : > { %v2178_v35 = vmax.f32 %v2034_v23, %v2075_v34  ;;  %6166 = vmatprep.subr.bf16.mxu1 %v6413_v26  ;;  %v7302_v16 = vmax.f32 %v2766_v44, %v7248_v58  ;;  %v7305_v50 = vmax.f32 %v2768_v11, %v7252_v7  ;;  %v847_v25 = vpack.c.bf16 %v7125_v30, %v7112_v24 }
 0x14e   : > { %v1539_v5 = vmax.f32 %v1442_v63, %v7291_v49  ;;  %v1540_v36 = vmax.f32 %v1443_v60, %v7293_v0  ;;  %v1541_v17 = vmax.f32 %v1444_v53, %v7295_v22  ;;  %2546 = vst [vmem:[#allocation2 + $0x62] sm:$0xff] %v2177_v40 }
 0x14f   : > { %v2239_v2 = vpack.c.bf16 %v2178_v35, %v2177_v40  ;;  %2547 = vst [vmem:[#allocation2 + $0x6a] sm:$0xff] %v2178_v35  ;;  %6100 = vmatprep.mubr.bf16.mxu0 %v847_v25 }
 0x150   : > { %v1642_v46 = vrot.slane %v1539_v5, 1  ;;  %v1787_v44 = vrot.slane %v1539_v5, 2  ;;  %v1932_v34 = vrot.slane %v1539_v5, 3  ;;  %v2076_v56 = vrot.slane %v1539_v5, 4  ;;  %6167 = vmatpush3.bf16.msra.mxu1 %v6413_v26 }
 0x151   : > { %6132 = vmatprep.mubr.bf16.mxu1 %v2239_v2  ;;  %v1643_v11 = vrot.slane %v1540_v36, 1  ;;  %v1645_v31 = vrot.slane %v1541_v17, 1  ;;  %v1788_v14 = vrot.slane %v1540_v36, 2  ;;  %v1790_v57 = vrot.slane %v1541_v17, 2  ;;  %6168 = vmatprep.subr.bf16.mxu1 %v6416_v54 }
 0x152   : > { %v1933_v6 = vrot.slane %v1540_v36, 3  ;;  %v1935_v1 = vrot.slane %v1541_v17, 3  ;;  %v2077_v8 = vrot.slane %v1540_v36, 4  ;;  %v2079_v23 = vrot.slane %v1541_v17, 4 }
 0x153   : > { %v1644_v24 = vsel %vm1626_vm2, %v1642_v46, %v1643_v11  ;;  %v1646_v30 = vsel %vm1626_vm2, %v1643_v11, %v1645_v31  ;;  %v1789_v9 = vsel %vm1771_vm3, %v1787_v44, %v1788_v14  ;;  %v1791_v47 = vsel %vm1771_vm3, %v1788_v14, %v1790_v57  ;;  %v7348_v57 = vld [vmem:[#allocation2 + $0xc0] sm:$0xff] }
 0x154   : > { %v1745_v26 = vmax.f32 %v1539_v5, %v1644_v24  ;;  %v1746_v63 = vmax.f32 %v1540_v36, %v1646_v30  ;;  %v1934_v40 = vsel %vm1916_vm4, %v1932_v34, %v1933_v6  ;;  %v1936_v35 = vsel %vm1916_vm4, %v1933_v6, %v1935_v1  ;;  %6169 = vmatpush3.bf16.msra.mxu1 %v6416_v54  ;;  %v6417_v5 = vld [vmem:[%s9390_s3 + $0xd0] sm:$0xff]   ;;  %v7351_v1 = vld [vmem:[#allocation2 + $0xc8] sm:$0xff] }
 0x155   : > { %v2078_v60 = vsel %vm448_vm0, %v2076_v56, %v2077_v8  ;;  %v2080_v53 = vsel %vm448_vm0, %v2077_v8, %v2079_v23  ;;  %v848_v2 = vpack.c.bf16 %v7117_v27, %v7108_v19  ;;  %v1252_v17 = vmax.f32 %v7005_v3, %v7134_v41  ;;  %v7333_v44 = vld [vmem:[#allocation2 + $0x60] sm:$0xff]  ;;  %6212 = vmatprep.subr.bf16.mxu0 %v6417_v5  ;;  %v7353_v8 = vld [vmem:[#allocation2 + $0xd0] sm:$0xff] }
 0x156   : > { %v1890_v36 = vmax.f32 %v1745_v26, %v1789_v9  ;;  %v1891_v25 = vmax.f32 %v1746_v63, %v1791_v47  ;;  %v1253_v46 = vmax.f32 %v7020_v39, %v7137_v37  ;;  %v1254_v54 = vmax.f32 %v7026_v48, %v7139_v12  ;;  %v7335_v34 = vld [vmem:[#allocation2 + $0x68] sm:$0xff]  ;;  %v7337_v19 = vld [vmem:[#allocation2 + $0x70] sm:$0xff]  ;;  %6213 = vmatpush3.bf16.msra.mxu0 %v6417_v5 }
 0x157   : > { %6101 = vmatmul.mubr.bf16.gmra.mrb[52].mxu0 %v848_v2  ;;  %v1348_v3 = vmax.f32 %v1252_v17, %v7185_v51  ;;  %v2679_v27 = vmax.f32 %v7248_v58, %v7333_v44  ;;  %v2680_v56 = vmax.f32 %v7250_v55, %v7335_v34  ;;  %v2681_v39 = vmax.f32 %v7252_v7, %v7337_v19 }
 0x158   : > { %v2035_v11 = vmax.f32 %v1890_v36, %v1934_v40  ;;  %v2036_v48 = vmax.f32 %v1891_v25, %v1936_v35  ;;  %v1349_v31 = vmax.f32 %v1253_v46, %v7196_v62  ;;  %v1350_v14 = vmax.f32 %v1254_v54, %v7198_v10 }
 0x159   : > { %v1445_v6 = vmax.f32 %v1348_v3, %v7291_v49  ;;  %v7359_v23 = vmax.f32 %v2676_v59, %v7333_v44  ;;  %v7365_v24 = vmax.f32 %v2677_v33, %v7335_v34  ;;  %v7371_v30 = vmax.f32 %v2678_v61, %v7337_v19 }
 0x15a   : > { %v2179_v9 = vmax.f32 %v2035_v11, %v2078_v60  ;;  %v2180_v47 = vmax.f32 %v2036_v48, %v2080_v53  ;;  %v1446_v26 = vmax.f32 %v1349_v31, %v7293_v0  ;;  %v1447_v29 = vmax.f32 %v1350_v14, %v7295_v22 }
 0x15b   : > { %v1542_v59 = vmax.f32 %v1445_v6, %v7348_v57  ;;  %v2865_v18 = vmax.f32 %v7275_v42, %v7333_v44  ;;  %v7386_v35 = vmax.f32 %v7302_v16, %v7333_v44 }
 0x15c   : > { %v2240_v61 = vpack.c.bf16 %v2180_v47, %v2179_v9  ;;  %v1543_v63 = vmax.f32 %v1446_v26, %v7351_v1  ;;  %v1544_v40 = vmax.f32 %v1447_v29, %v7353_v8  ;;  %2548 = vst [vmem:[#allocation2 + $0x7a] sm:$0xff] %v2179_v9  ;;  %2549 = vst [vmem:[#allocation2 + $0x82] sm:$0xff] %v2180_v47 }
 0x15d   : > { %v1647_v60 = vrot.slane %v1542_v59, 1  ;;  %v1792_v53 = vrot.slane %v1542_v59, 2  ;;  %v1937_v2 = vrot.slane %v1542_v59, 3  ;;  %v2081_v17 = vrot.slane %v1542_v59, 4 }
 0x15e   : > { %6133 = vmatmul.mubr.bf16.gmra.mrb[4].mxu1 %v2240_v61  ;;  %v1648_v5 = vrot.slane %v1543_v63, 1  ;;  %v1650_v36 = vrot.slane %v1544_v40, 1  ;;  %v1793_v25 = vrot.slane %v1543_v63, 2  ;;  %v1795_v46 = vrot.slane %v1544_v40, 2 }
 0x15f   : > { %v1938_v54 = vrot.slane %v1543_v63, 3  ;;  %v1940_v3 = vrot.slane %v1544_v40, 3  ;;  %v2082_v11 = vrot.slane %v1543_v63, 4  ;;  %v2084_v48 = vrot.slane %v1544_v40, 4 }
 0x160   : > { %v1649_v31 = vsel %vm1626_vm2, %v1647_v60, %v1648_v5  ;;  %v1651_v16 = vsel %vm1626_vm2, %v1648_v5, %v1650_v36  ;;  %v1794_v14 = vsel %vm1771_vm3, %v1792_v53, %v1793_v25  ;;  %v1796_v6 = vsel %vm1771_vm3, %v1793_v25, %v1795_v46 }
 0x161   : > { %v1747_v9 = vmax.f32 %v1542_v59, %v1649_v31  ;;  %v1748_v47 = vmax.f32 %v1543_v63, %v1651_v16  ;;  %v1939_v26 = vsel %vm1916_vm4, %v1937_v2, %v1938_v54  ;;  %v1941_v29 = vsel %vm1916_vm4, %v1938_v54, %v1940_v3 }
 0x162   : > { %v2083_v61 = vsel %vm448_vm0, %v2081_v17, %v2082_v11  ;;  %v2085_v43 = vsel %vm448_vm0, %v2082_v11, %v2084_v48  ;;  %v2960_v40 = vmax.f32 %v7305_v50, %v7337_v19  ;;  %v3054_v5 = vrot.slane %v7386_v35, 1 }
 0x163   : > { %v1892_v60 = vmax.f32 %v1747_v9, %v1794_v14  ;;  %v1893_v33 = vmax.f32 %v1748_v47, %v1796_v6  ;;  %v3198_v53 = vrot.slane %v7386_v35, 2  ;;  %v3055_v59 = vrot.slane %v7365_v24, 1 }
 0x164   : > { %v3057_v63 = vrot.slane %v2960_v40, 1  ;;  %v3199_v2 = vrot.slane %v7365_v24, 2  ;;  %v3201_v36 = vrot.slane %v2960_v40, 2  ;;  %v3342_v17 = vrot.slane %v7386_v35, 3 }
 0x165   : > { %v2037_v25 = vmax.f32 %v1892_v60, %v1939_v26  ;;  %v2038_v46 = vmax.f32 %v1893_v33, %v1941_v29  ;;  %v3343_v54 = vrot.slane %v7365_v24, 3  ;;  %v3056_v50 = vsel %vm1626_vm2, %v3054_v5, %v3055_v59  ;;  %v7413_v29 = vld [vmem:[#allocation2 + $0x78] sm:$0xff] }
 0x166   : > { %v3058_v3 = vsel %vm1626_vm2, %v3055_v59, %v3057_v63  ;;  %v3200_v11 = vsel %vm1771_vm3, %v3198_v53, %v3199_v2  ;;  %v3202_v48 = vsel %vm1771_vm3, %v3199_v2, %v3201_v36  ;;  %v3166_v14 = vmax.f32 %v7386_v35, %v3056_v50  ;;  %v7415_v63 = vld [vmem:[#allocation2 + $0x80] sm:$0xff] }
 0x167   : > { %v2181_v31 = vmax.f32 %v2037_v25, %v2083_v61  ;;  %v2182_v16 = vmax.f32 %v2038_v46, %v2085_v43  ;;  %v3167_v6 = vmax.f32 %v7365_v24, %v3058_v3  ;;  %v3344_v33 = vsel %vm1916_vm4, %v3342_v17, %v3343_v54  ;;  %v6418_v43 = vld [vmem:[%s9390_s3 + $0xd8] sm:$0xff]   ;;  %v7429_v25 = vld [vmem:[#allocation2 + $0x88] sm:$0xff] }
 0x168   : > { %v3345_v9 = vrot.slane %v2960_v40, 3  ;;  %v3486_v47 = vrot.slane %v7386_v35, 4  ;;  %v3487_v26 = vrot.slane %v7365_v24, 4  ;;  %v3310_v5 = vmax.f32 %v3166_v14, %v3200_v11  ;;  %v6419_v35 = vld [vmem:[%s9390_s3 + $0xa8] sm:$0xff]   ;;  %6214 = vmatprep.subr.bf16.mxu0 %v6418_v43 }
 0x169   : > { %v2241_v60 = vpack.c.bf16 %v2182_v16, %v2181_v31  ;;  %v3311_v53 = vmax.f32 %v3167_v6, %v3202_v48  ;;  %v3489_v59 = vrot.slane %v2960_v40, 4  ;;  %2550 = vst [vmem:[#allocation2 + $0x92] sm:$0xff] %v2181_v31  ;;  %2551 = vst [vmem:[#allocation2 + $0x9a] sm:$0xff] %v2182_v16  ;;  %v1255_v36 = vmax.f32 %v7134_v41, %v7185_v51 }
 0x16a   : > { %v3346_v61 = vsel %vm1916_vm4, %v3343_v54, %v3345_v9  ;;  %v3488_v2 = vsel %vm448_vm0, %v3486_v47, %v3487_v26  ;;  %v1256_v40 = vmax.f32 %v7137_v37, %v7196_v62  ;;  %v3454_v46 = vmax.f32 %v3310_v5, %v3344_v33  ;;  %6170 = vmatprep.subr.bf16.mxu1 %v6419_v35 }
 0x16b   : > { %6136 = vmatprep.mubr.bf16.mxu1 %v2241_v60  ;;  %v3455_v17 = vmax.f32 %v3311_v53, %v3346_v61  ;;  %v3490_v50 = vsel %vm448_vm0, %v3487_v26, %v3489_v59  ;;  %v1257_v3 = vmax.f32 %v7139_v12, %v7198_v10  ;;  %v1351_v54 = vmax.f32 %v1255_v36, %v7291_v49  ;;  %v7458_v26 = vld [vmem:[#allocation2 + $0xd8] sm:$0xff]  ;;  %v7460_v60 = vld [vmem:[#allocation2 + $0xe0] sm:$0xff] }
 0x16c   : > { %v1352_v11 = vmax.f32 %v1256_v40, %v7293_v0  ;;  %v2682_v41 = vmax.f32 %v7333_v44, %v7413_v29  ;;  %v2683_v37 = vmax.f32 %v7335_v34, %v7415_v63  ;;  %v3598_v48 = vmax.f32 %v3454_v46, %v3488_v2  ;;  %6215 = vmatpush3.bf16.msra.mxu0 %v6418_v43 }
 0x16d   : > { %v3599_v31 = vmax.f32 %v3455_v17, %v3490_v50  ;;  %v1353_v16 = vmax.f32 %v1257_v3, %v7295_v22  ;;  %v2684_v14 = vmax.f32 %v7337_v19, %v7429_v25  ;;  %v1448_v12 = vmax.f32 %v1351_v54, %v7348_v57  ;;  %6171 = vmatpush3.bf16.msra.mxu1 %v6419_v35 }
 0x16e   : > { %v1449_v6 = vmax.f32 %v1352_v11, %v7351_v1  ;;  %v7449_v33 = vmax.f32 %v2679_v27, %v7413_v29  ;;  %v7455_v9 = vmax.f32 %v2680_v56, %v7415_v63  ;;  %3967 = vst [vmem:[#allocation2 + $0x32] sm:$0xff] %v3598_v48  ;;  %v7466_v58 = vmax.f32 %v2681_v39, %v7429_v25  ;;  %v7472_v56 = vld [vmem:[#allocation2 + $0xe8] sm:$0xff] }
 0x16f   : > { %3968 = vst [vmem:[#allocation2 + $0x3a] sm:$0xff] %v3599_v31  ;;  %v1450_v47 = vmax.f32 %v1353_v16, %v7353_v8  ;;  %v2868_v55 = vmax.f32 %v7359_v23, %v7413_v29  ;;  %v2869_v27 = vmax.f32 %v7365_v24, %v7415_v63  ;;  %v1545_v5 = vmax.f32 %v1448_v12, %v7458_v26 }
 0x170   : > { %v1546_v53 = vmax.f32 %v1449_v6, %v7460_v60  ;;  %v7482_v7 = vmax.f32 %v2865_v18, %v7413_v29  ;;  %v9393_v43 = vmax.f32 %v7281_v13, %v7335_v34  ;;  %v9394_v61 = vmax.f32 %v7287_v38, %v7337_v19 }
 0x171   : > { %v1547_v39 = vmax.f32 %v1450_v47, %v7472_v56  ;;  %v849_v36 = vpack.c.bf16 %v7168_v52, %v7155_v15  ;;  %v1652_v42 = vrot.slane %v1545_v5, 1  ;;  %v1797_v40 = vrot.slane %v1545_v5, 2 }
 0x172   : > { %v7489_v35 = vmax.f32 %v9393_v43, %v7415_v63  ;;  %v7495_v2 = vmax.f32 %v9394_v61, %v7429_v25  ;;  %v1653_v18 = vrot.slane %v1546_v53, 1  ;;  %v1798_v46 = vrot.slane %v1546_v53, 2 }
 0x173   : > { %v1655_v17 = vrot.slane %v1547_v39, 1  ;;  %v1800_v50 = vrot.slane %v1547_v39, 2  ;;  %v1942_v3 = vrot.slane %v1545_v5, 3  ;;  %v1943_v54 = vrot.slane %v1546_v53, 3  ;;  %6104 = vmatprep.mubr.bf16.mxu0 %v849_v36 }
 0x174   : > { %v1654_v13 = vsel %vm1626_vm2, %v1652_v42, %v1653_v18  ;;  %v1799_v11 = vsel %vm1771_vm3, %v1797_v40, %v1798_v46  ;;  %v1945_v48 = vrot.slane %v1547_v39, 3  ;;  %v2086_v38 = vrot.slane %v1545_v5, 4 }
 0x175   : > { %v1656_v31 = vsel %vm1626_vm2, %v1653_v18, %v1655_v17  ;;  %v1749_v16 = vmax.f32 %v1545_v5, %v1654_v13  ;;  %v1801_v15 = vsel %vm1771_vm3, %v1798_v46, %v1800_v50  ;;  %v1944_v52 = vsel %vm1916_vm4, %v1942_v3, %v1943_v54 }
 0x176   : > { %v1750_v12 = vmax.f32 %v1546_v53, %v1656_v31  ;;  %v1946_v6 = vsel %vm1916_vm4, %v1943_v54, %v1945_v48  ;;  %v2087_v47 = vrot.slane %v1546_v53, 4  ;;  %v2089_v43 = vrot.slane %v1547_v39, 4 }
 0x177   : > { %v1894_v61 = vmax.f32 %v1749_v16, %v1799_v11  ;;  %v3059_v36 = vrot.slane %v7482_v7, 1  ;;  %v3060_v42 = vrot.slane %v7489_v35, 1  ;;  %v3062_v40 = vrot.slane %v7495_v2, 1 }
 0x178   : > { %v1895_v59 = vmax.f32 %v1750_v12, %v1801_v15  ;;  %v2088_v18 = vsel %vm448_vm0, %v2086_v38, %v2087_v47  ;;  %v2090_v5 = vsel %vm448_vm0, %v2087_v47, %v2089_v43  ;;  %v3203_v46 = vrot.slane %v7482_v7, 2 }
 0x179   : > { %v2039_v17 = vmax.f32 %v1894_v61, %v1944_v52  ;;  %v3061_v50 = vsel %vm1626_vm2, %v3059_v36, %v3060_v42  ;;  %v3063_v53 = vsel %vm1626_vm2, %v3060_v42, %v3062_v40  ;;  %v3204_v39 = vrot.slane %v7489_v35, 2  ;;  %v6420_v36 = vld [vmem:[%s9390_s3 + $0xe0] sm:$0xff]  }
 0x17a   : > { %v2040_v3 = vmax.f32 %v1895_v59, %v1946_v6  ;;  %v3168_v54 = vmax.f32 %v7482_v7, %v3061_v50  ;;  %v3169_v13 = vmax.f32 %v7489_v35, %v3063_v53  ;;  %v3206_v11 = vrot.slane %v7495_v2, 2  ;;  %6216 = vmatprep.subr.bf16.mxu0 %v6420_v36 }
 0x17b   : > { %v2183_v48 = vmax.f32 %v2039_v17, %v2088_v18  ;;  %v3205_v38 = vsel %vm1771_vm3, %v3203_v46, %v3204_v39  ;;  %v3347_v31 = vrot.slane %v7482_v7, 3  ;;  %v3348_v16 = vrot.slane %v7489_v35, 3  ;;  %v7530_v46 = vld [vmem:[#allocation2 + $0x90] sm:$0xff]  ;;  %v7532_v17 = vld [vmem:[#allocation2 + $0x98] sm:$0xff]  ;;  %6217 = vmatpush3.bf16.msra.mxu0 %v6420_v36 }
 0x17c   : > { %v2184_v15 = vmax.f32 %v2040_v3, %v2090_v5  ;;  %v3207_v52 = vsel %vm1771_vm3, %v3204_v39, %v3206_v11  ;;  %v3312_v12 = vmax.f32 %v3168_v54, %v3205_v38  ;;  %v3350_v47 = vrot.slane %v7495_v2, 3  ;;  %v7539_v39 = vld [vmem:[#allocation2 + $0xa0] sm:$0xff] }
 0x17d   : > { %v3313_v59 = vmax.f32 %v3169_v13, %v3207_v52  ;;  %v3349_v6 = vsel %vm1916_vm4, %v3347_v31, %v3348_v16  ;;  %v3491_v43 = vrot.slane %v7482_v7, 4  ;;  %v3492_v61 = vrot.slane %v7489_v35, 4  ;;  %2552 = vst [vmem:[#allocation2 + $0xaa] sm:$0xff] %v2183_v48  ;;  %v7553_v31 = vld [vmem:[#allocation2 + $0xf0] sm:$0xff]  ;;  %v7566_v52 = vld [vmem:[#allocation2 + $0x100] sm:$0xff] }
 0x17e   : > { %v2242_v42 = vpack.c.bf16 %v2184_v15, %v2183_v48  ;;  %v3351_v40 = vsel %vm1916_vm4, %v3348_v16, %v3350_v47  ;;  %v3456_v18 = vmax.f32 %v3312_v12, %v3349_v6  ;;  %v3494_v5 = vrot.slane %v7495_v2, 4  ;;  %2553 = vst [vmem:[#allocation2 + $0xb2] sm:$0xff] %v2184_v15  ;;  %v7564_v15 = vld [vmem:[#allocation2 + $0xf8] sm:$0xff] }
 0x17f   : > { %v3457_v50 = vmax.f32 %v3313_v59, %v3351_v40  ;;  %v3493_v7 = vsel %vm448_vm0, %v3491_v43, %v3492_v61  ;;  %v850_v35 = vpack.c.bf16 %v7162_v32, %v7152_v4  ;;  %v1258_v53 = vmax.f32 %v7185_v51, %v7291_v49 }
 0x180   : > { %6137 = vmatmul.mubr.bf16.gmra.mrb[8].mxu1 %v2242_v42  ;;  %v3495_v2 = vsel %vm448_vm0, %v3492_v61, %v3494_v5  ;;  %v3600_v3 = vmax.f32 %v3456_v18, %v3493_v7  ;;  %v1259_v54 = vmax.f32 %v7196_v62, %v7293_v0  ;;  %v1260_v13 = vmax.f32 %v7198_v10, %v7295_v22 }
 0x181   : > { %v3601_v11 = vmax.f32 %v3457_v50, %v3495_v2  ;;  %6105 = vmatmul.mubr.bf16.gmra.mrb[56].mxu0 %v850_v35  ;;  %v1354_v4 = vmax.f32 %v1258_v53, %v7348_v57  ;;  %v2685_v32 = vmax.f32 %v7413_v29, %v7530_v46  ;;  %v2686_v51 = vmax.f32 %v7415_v63, %v7532_v17  ;;  %v7700_v63 = vld [vmem:[#allocation2 + $0x118] sm:$0xff] }
 0x182   : > { %3969 = vst [vmem:[#allocation2 + $0x4a] sm:$0xff] %v3600_v3  ;;  %v1355_v48 = vmax.f32 %v1259_v54, %v7351_v1  ;;  %v1356_v38 = vmax.f32 %v1260_v13, %v7353_v8  ;;  %v2687_v62 = vmax.f32 %v7429_v25, %v7539_v39  ;;  %v7561_v10 = vmax.f32 %v2682_v41, %v7530_v46 }
 0x183   : > { %3970 = vst [vmem:[#allocation2 + $0x52] sm:$0xff] %v3601_v11  ;;  %v1451_v16 = vmax.f32 %v1354_v4, %v7458_v26  ;;  %v7572_v12 = vmax.f32 %v2683_v37, %v7532_v17  ;;  %v7578_v44 = vmax.f32 %v2684_v14, %v7539_v39  ;;  %v2871_v41 = vmax.f32 %v7449_v33, %v7530_v46 }
 0x184   : > { %v1452_v47 = vmax.f32 %v1355_v48, %v7460_v60  ;;  %v1453_v59 = vmax.f32 %v1356_v38, %v7472_v56  ;;  %v2872_v6 = vmax.f32 %v7455_v9, %v7532_v17  ;;  %v7593_v19 = vmax.f32 %v2868_v55, %v7530_v46 }
 0x185   : > { %v1548_v37 = vmax.f32 %v1451_v16, %v7553_v31  ;;  %v7599_v14 = vmax.f32 %v2869_v27, %v7532_v17  ;;  %v9395_v43 = vmax.f32 %v7371_v30, %v7429_v25  ;;  %v1261_v23 = vmax.f32 %v7291_v49, %v7348_v57 }
 0x186   : > { %v1549_v36 = vmax.f32 %v1452_v47, %v7564_v15  ;;  %v1550_v42 = vmax.f32 %v1453_v59, %v7566_v52  ;;  %v1262_v55 = vmax.f32 %v7293_v0, %v7351_v1 }
 0x187   : > { %v7605_v61 = vmax.f32 %v9395_v43, %v7539_v39  ;;  %v1657_v40 = vrot.slane %v1548_v37, 1  ;;  %v1802_v24 = vrot.slane %v1548_v37, 2  ;;  %v1947_v27 = vrot.slane %v1548_v37, 3 }
 0x188   : > { %v2091_v18 = vrot.slane %v1548_v37, 4  ;;  %v1658_v5 = vrot.slane %v1549_v36, 1  ;;  %v1660_v50 = vrot.slane %v1550_v42, 1  ;;  %v1803_v7 = vrot.slane %v1549_v36, 2 }
 0x189   : > { %v1805_v30 = vrot.slane %v1550_v42, 2  ;;  %v1948_v35 = vrot.slane %v1549_v36, 3  ;;  %v1950_v53 = vrot.slane %v1550_v42, 3  ;;  %v2092_v2 = vrot.slane %v1549_v36, 4 }
 0x18a   : > { %v2094_v3 = vrot.slane %v1550_v42, 4  ;;  %v1659_v54 = vsel %vm1626_vm2, %v1657_v40, %v1658_v5  ;;  %v1661_v13 = vsel %vm1626_vm2, %v1658_v5, %v1660_v50  ;;  %v1804_v11 = vsel %vm1771_vm3, %v1802_v24, %v1803_v7 }
 0x18b   : > { %v1806_v4 = vsel %vm1771_vm3, %v1803_v7, %v1805_v30  ;;  %v1751_v48 = vmax.f32 %v1548_v37, %v1659_v54  ;;  %v1752_v38 = vmax.f32 %v1549_v36, %v1661_v13  ;;  %v1949_v16 = vsel %vm1916_vm4, %v1947_v27, %v1948_v35 }
 0x18c   : > { %v1951_v47 = vsel %vm1916_vm4, %v1948_v35, %v1950_v53  ;;  %v2093_v59 = vsel %vm448_vm0, %v2091_v18, %v2092_v2  ;;  %v2095_v43 = vsel %vm448_vm0, %v2092_v2, %v2094_v3  ;;  %v3064_v42 = vrot.slane %v7593_v19, 1 }
 0x18d   : > { %v3065_v40 = vrot.slane %v7599_v14, 1  ;;  %v1896_v34 = vmax.f32 %v1751_v48, %v1804_v11  ;;  %v1897_v5 = vmax.f32 %v1752_v38, %v1806_v4  ;;  %v3067_v24 = vrot.slane %v7605_v61, 1 }
 0x18e   : > { %v3208_v50 = vrot.slane %v7593_v19, 2  ;;  %v3209_v36 = vrot.slane %v7599_v14, 2  ;;  %v3211_v27 = vrot.slane %v7605_v61, 2  ;;  %v3352_v18 = vrot.slane %v7593_v19, 3 }
 0x18f   : > { %v3066_v37 = vsel %vm1626_vm2, %v3064_v42, %v3065_v40  ;;  %v2041_v7 = vmax.f32 %v1896_v34, %v1949_v16  ;;  %v2042_v30 = vmax.f32 %v1897_v5, %v1951_v47  ;;  %v3068_v35 = vsel %vm1626_vm2, %v3065_v40, %v3067_v24  ;;  %v7639_v40 = vld [vmem:[#allocation2 + $0xa8] sm:$0xff] }
 0x190   : > { %v3170_v53 = vmax.f32 %v7593_v19, %v3066_v37  ;;  %v3171_v2 = vmax.f32 %v7599_v14, %v3068_v35  ;;  %v3210_v3 = vsel %vm1771_vm3, %v3208_v50, %v3209_v36  ;;  %v3212_v54 = vsel %vm1771_vm3, %v3209_v36, %v3211_v27  ;;  %v6421_v5 = vld [vmem:[%s9390_s3 + $0xe8] sm:$0xff]   ;;  %v7649_v36 = vld [vmem:[#allocation2 + $0xb0] sm:$0xff] }
 0x191   : > { %v3353_v13 = vrot.slane %v7599_v14, 3  ;;  %v2185_v11 = vmax.f32 %v2041_v7, %v2093_v59  ;;  %v2186_v4 = vmax.f32 %v2042_v30, %v2095_v43  ;;  %v3355_v38 = vrot.slane %v7605_v61, 3  ;;  %v6422_v59 = vld [vmem:[%s9390_s3 + $0xb0] sm:$0xff]   ;;  %v7658_v7 = vld [vmem:[#allocation2 + $0xb8] sm:$0xff]  ;;  %6218 = vmatprep.subr.bf16.mxu0 %v6421_v5 }
 0x192   : > { %v3314_v48 = vmax.f32 %v3170_v53, %v3210_v3  ;;  %v3315_v42 = vmax.f32 %v3171_v2, %v3212_v54  ;;  %v3496_v16 = vrot.slane %v7593_v19, 4  ;;  %v3497_v47 = vrot.slane %v7599_v14, 4  ;;  %6172 = vmatprep.subr.bf16.mxu1 %v6422_v59  ;;  %v7672_v54 = vld [vmem:[#allocation2 + $0x108] sm:$0xff]  ;;  %6219 = vmatpush3.bf16.msra.mxu0 %v6421_v5 }
 0x193   : > { %v3354_v34 = vsel %vm1916_vm4, %v3352_v18, %v3353_v13  ;;  %v2243_v43 = vpack.c.bf16 %v2186_v4, %v2185_v11  ;;  %v3356_v24 = vsel %vm1916_vm4, %v3353_v13, %v3355_v38  ;;  %v3499_v37 = vrot.slane %v7605_v61, 4  ;;  %2554 = vst [vmem:[#allocation2 + $0xc2] sm:$0xff] %v2185_v11  ;;  %2555 = vst [vmem:[#allocation2 + $0xca] sm:$0xff] %v2186_v4  ;;  %v7689_v4 = vld [vmem:[#allocation2 + $0x110] sm:$0xff] }
 0x194   : > { %v3458_v50 = vmax.f32 %v3314_v48, %v3354_v34  ;;  %v3459_v19 = vmax.f32 %v3315_v42, %v3356_v24  ;;  %v3498_v14 = vsel %vm448_vm0, %v3496_v16, %v3497_v47  ;;  %v1263_v27 = vmax.f32 %v7295_v22, %v7353_v8  ;;  %6173 = vmatpush3.bf16.msra.mxu1 %v6422_v59 }
 0x195   : > { %v1357_v18 = vmax.f32 %v1261_v23, %v7458_v26  ;;  %6140 = vmatprep.mubr.bf16.mxu1 %v2243_v43  ;;  %v3500_v61 = vsel %vm448_vm0, %v3497_v47, %v3499_v37  ;;  %v1358_v35 = vmax.f32 %v1262_v55, %v7460_v60  ;;  %v2688_v22 = vmax.f32 %v7530_v46, %v7639_v40 }
 0x196   : > { %v3602_v30 = vmax.f32 %v3458_v50, %v3498_v14  ;;  %v3603_v53 = vmax.f32 %v3459_v19, %v3500_v61  ;;  %v1359_v2 = vmax.f32 %v1263_v27, %v7472_v56  ;;  %v2689_v23 = vmax.f32 %v7532_v17, %v7649_v36 }
 0x197   : > { %v1454_v49 = vmax.f32 %v1357_v18, %v7553_v31  ;;  %v1455_v3 = vmax.f32 %v1358_v35, %v7564_v15  ;;  %v2690_v0 = vmax.f32 %v7539_v39, %v7658_v7  ;;  %v7680_v55 = vmax.f32 %v2685_v32, %v7639_v40 }
 0x198   : > { %3971 = vst [vmem:[#allocation2 + $0x62] sm:$0xff] %v3602_v30  ;;  %v7686_v13 = vmax.f32 %v2686_v51, %v7649_v36  ;;  %3972 = vst [vmem:[#allocation2 + $0x6a] sm:$0xff] %v3603_v53  ;;  %v1456_v11 = vmax.f32 %v1359_v2, %v7566_v52  ;;  %v7696_v29 = vmax.f32 %v2687_v62, %v7658_v7 }
 0x199   : > { %v1551_v48 = vmax.f32 %v1454_v49, %v7672_v54  ;;  %v2874_v32 = vmax.f32 %v7561_v10, %v7639_v40  ;;  %v1552_v51 = vmax.f32 %v1455_v3, %v7689_v4  ;;  %v2875_v38 = vmax.f32 %v7572_v12, %v7649_v36 }
 0x19a   : > { %v2876_v42 = vmax.f32 %v7578_v44, %v7658_v7  ;;  %v7711_v25 = vmax.f32 %v2871_v41, %v7639_v40  ;;  %v1553_v62 = vmax.f32 %v1456_v11, %v7700_v63  ;;  %v2968_v11 = vmax.f32 %v2872_v6, %v7649_v36 }
 0x19b   : > { %v1662_v34 = vrot.slane %v1551_v48, 1  ;;  %v1807_v16 = vrot.slane %v1551_v48, 2  ;;  %v1952_v47 = vrot.slane %v1551_v48, 3  ;;  %v1663_v5 = vrot.slane %v1552_v51, 1 }
 0x19c   : > { %v1808_v59 = vrot.slane %v1552_v51, 2  ;;  %v1953_v43 = vrot.slane %v1552_v51, 3  ;;  %v2096_v24 = vrot.slane %v1551_v48, 4  ;;  %v1665_v50 = vrot.slane %v1553_v62, 1 }
 0x19d   : > { %v1810_v37 = vrot.slane %v1553_v62, 2  ;;  %v1955_v19 = vrot.slane %v1553_v62, 3  ;;  %v2097_v14 = vrot.slane %v1552_v51, 4  ;;  %v1664_v27 = vsel %vm1626_vm2, %v1662_v34, %v1663_v5 }
 0x19e   : > { %v1809_v18 = vsel %vm1771_vm3, %v1807_v16, %v1808_v59  ;;  %v1954_v33 = vsel %vm1916_vm4, %v1952_v47, %v1953_v43  ;;  %v2099_v41 = vrot.slane %v1553_v62, 4  ;;  %v1666_v61 = vsel %vm1626_vm2, %v1663_v5, %v1665_v50 }
 0x19f   : > { %v1753_v30 = vmax.f32 %v1551_v48, %v1664_v27  ;;  %v1811_v35 = vsel %vm1771_vm3, %v1808_v59, %v1810_v37  ;;  %v1956_v53 = vsel %vm1916_vm4, %v1953_v43, %v1955_v19  ;;  %v1754_v2 = vmax.f32 %v1552_v51, %v1666_v61 }
 0x1a0   : > { %v2098_v49 = vsel %vm448_vm0, %v2096_v24, %v2097_v14  ;;  %v2100_v3 = vsel %vm448_vm0, %v2097_v14, %v2099_v41  ;;  %v9396_v62 = vmax.f32 %v7466_v58, %v7539_v39  ;;  %v3069_v16 = vrot.slane %v7711_v25, 1 }
 0x1a1   : > { %v1898_v34 = vmax.f32 %v1753_v30, %v1809_v18  ;;  %v3213_v47 = vrot.slane %v7711_v25, 2  ;;  %v1899_v51 = vmax.f32 %v1754_v2, %v1811_v35  ;;  %v3070_v5 = vrot.slane %v2968_v11, 1 }
 0x1a2   : > { %v2969_v48 = vmax.f32 %v9396_v62, %v7658_v7  ;;  %v3214_v59 = vrot.slane %v2968_v11, 2  ;;  %v3357_v43 = vrot.slane %v7711_v25, 3  ;;  %v3358_v9 = vrot.slane %v2968_v11, 3 }
 0x1a3   : > { %v2043_v24 = vmax.f32 %v1898_v34, %v1954_v33  ;;  %v2044_v6 = vmax.f32 %v1899_v51, %v1956_v53  ;;  %v3071_v19 = vsel %vm1626_vm2, %v3069_v16, %v3070_v5  ;;  %v3501_v53 = vrot.slane %v7711_v25, 4 }
 0x1a4   : > { %v3072_v50 = vrot.slane %v2969_v48, 1  ;;  %v3216_v37 = vrot.slane %v2969_v48, 2  ;;  %v3215_v14 = vsel %vm1771_vm3, %v3213_v47, %v3214_v59  ;;  %v3360_v58 = vrot.slane %v2969_v48, 3 }
 0x1a5   : > { %v2187_v27 = vmax.f32 %v2043_v24, %v2098_v49  ;;  %v3172_v41 = vmax.f32 %v7711_v25, %v3071_v19  ;;  %v2188_v30 = vmax.f32 %v2044_v6, %v2100_v3  ;;  %v3359_v33 = vsel %vm1916_vm4, %v3357_v43, %v3358_v9  ;;  %v7745_v3 = vld [vmem:[#allocation2 + $0xc0] sm:$0xff] }
 0x1a6   : > { %v3073_v18 = vsel %vm1626_vm2, %v3070_v5, %v3072_v50  ;;  %v3217_v61 = vsel %vm1771_vm3, %v3214_v59, %v3216_v37  ;;  %v3361_v2 = vsel %vm1916_vm4, %v3358_v9, %v3360_v58  ;;  %v3502_v62 = vrot.slane %v2968_v11, 4  ;;  %v7747_v59 = vld [vmem:[#allocation2 + $0xc8] sm:$0xff] }
 0x1a7   : > { %v3173_v35 = vmax.f32 %v2968_v11, %v3073_v18  ;;  %v3316_v34 = vmax.f32 %v3172_v41, %v3215_v14  ;;  %v3504_v16 = vrot.slane %v2969_v48, 4  ;;  %2556 = vst [vmem:[#allocation2 + $0xda] sm:$0xff] %v2187_v27  ;;  %v2244_v47 = vpack.c.bf16 %v2188_v30, %v2187_v27  ;;  %2557 = vst [vmem:[#allocation2 + $0xe2] sm:$0xff] %v2188_v30  ;;  %v7753_v48 = vld [vmem:[#allocation2 + $0xd0] sm:$0xff]  ;;  %v7766_v14 = vld [vmem:[#allocation2 + $0x120] sm:$0xff] }
 0x1a8   : > { %v851_v51 = vpack.c.bf16 %v7225_v45, %v7205_v20  ;;  %v852_v5 = vpack.c.bf16 %v7211_v21, %v7194_v28  ;;  %v3503_v24 = vsel %vm448_vm0, %v3501_v53, %v3502_v62  ;;  %v1264_v11 = vmax.f32 %v7348_v57, %v7458_v26  ;;  %v7771_v58 = vld [vmem:[#allocation2 + $0x128] sm:$0xff]  ;;  %v7773_v27 = vld [vmem:[#allocation2 + $0x130] sm:$0xff] }
 0x1a9   : > { %v3317_v49 = vmax.f32 %v3173_v35, %v3217_v61  ;;  %v3460_v43 = vmax.f32 %v3316_v34, %v3359_v33  ;;  %v3505_v25 = vsel %vm448_vm0, %v3502_v62, %v3504_v16  ;;  %6141 = vmatmul.mubr.bf16.gmra.mrb[12].mxu1 %v2244_v47  ;;  %v1265_v28 = vmax.f32 %v7351_v1, %v7460_v60 }
 0x1aa   : > { %6108 = vmatprep.mubr.bf16.mxu0 %v851_v51  ;;  %v1266_v21 = vmax.f32 %v7353_v8, %v7472_v56  ;;  %v1360_v50 = vmax.f32 %v1264_v11, %v7553_v31  ;;  %v2691_v37 = vmax.f32 %v7639_v40, %v7745_v3  ;;  %v2692_v57 = vmax.f32 %v7649_v36, %v7747_v59  ;;  %v7915_v36 = vld [vmem:[#allocation2 + $0x148] sm:$0xff] }
 0x1ab   : > { %v3461_v20 = vmax.f32 %v3317_v49, %v3361_v2  ;;  %v3604_v45 = vmax.f32 %v3460_v43, %v3503_v24  ;;  %6109 = vmatmul.mubr.bf16.gmra.mrb[60].mxu0 %v852_v5  ;;  %v1361_v6 = vmax.f32 %v1265_v28, %v7564_v15  ;;  %v2693_v1 = vmax.f32 %v7658_v7, %v7753_v48 }
 0x1ac   : > { %v1362_v19 = vmax.f32 %v1266_v21, %v7566_v52  ;;  %v1457_v8 = vmax.f32 %v1360_v50, %v7672_v54  ;;  %v7779_v18 = vmax.f32 %v2688_v22, %v7745_v3  ;;  %v7785_v41 = vmax.f32 %v2689_v23, %v7747_v59 }
 0x1ad   : > { %v3605_v9 = vmax.f32 %v3461_v20, %v3505_v25  ;;  %3973 = vst [vmem:[#allocation2 + $0x7a] sm:$0xff] %v3604_v45  ;;  %v7791_v61 = vmax.f32 %v2690_v0, %v7753_v48  ;;  %v1458_v30 = vmax.f32 %v1361_v6, %v7689_v4  ;;  %v2877_v46 = vmax.f32 %v7680_v55, %v7745_v3 }
 0x1ae   : > { %v1459_v35 = vmax.f32 %v1362_v19, %v7700_v63  ;;  %v2878_v22 = vmax.f32 %v7686_v13, %v7747_v59  ;;  %v1554_v17 = vmax.f32 %v1457_v8, %v7766_v14  ;;  %v2879_v23 = vmax.f32 %v7696_v29, %v7753_v48 }
 0x1af   : > { %3974 = vst [vmem:[#allocation2 + $0x82] sm:$0xff] %v3605_v9  ;;  %v7806_v39 = vmax.f32 %v2874_v32, %v7745_v3  ;;  %v7812_v0 = vmax.f32 %v2875_v38, %v7747_v59  ;;  %v1555_v33 = vmax.f32 %v1458_v30, %v7771_v58  ;;  %v7820_v34 = vmax.f32 %v2876_v42, %v7753_v48 }
 0x1b0   : > { %v1556_v2 = vmax.f32 %v1459_v35, %v7773_v27  ;;  %v1267_v10 = vmax.f32 %v7458_v26, %v7553_v31  ;;  %v1667_v32 = vrot.slane %v1554_v17, 1  ;;  %v1812_v53 = vrot.slane %v1554_v17, 2 }
 0x1b1   : > { %v1957_v62 = vrot.slane %v1554_v17, 3  ;;  %v2101_v16 = vrot.slane %v1554_v17, 4  ;;  %v1668_v12 = vrot.slane %v1555_v33, 1  ;;  %v1813_v47 = vrot.slane %v1555_v33, 2 }
 0x1b2   : > { %v1670_v38 = vrot.slane %v1556_v2, 1  ;;  %v1815_v49 = vrot.slane %v1556_v2, 2  ;;  %v1958_v51 = vrot.slane %v1555_v33, 3  ;;  %v1960_v5 = vrot.slane %v1556_v2, 3 }
 0x1b3   : > { %v2102_v43 = vrot.slane %v1555_v33, 4  ;;  %v2104_v24 = vrot.slane %v1556_v2, 4  ;;  %v1669_v25 = vsel %vm1626_vm2, %v1667_v32, %v1668_v12  ;;  %v1814_v42 = vsel %vm1771_vm3, %v1812_v53, %v1813_v47 }
 0x1b4   : > { %v1671_v44 = vsel %vm1626_vm2, %v1668_v12, %v1670_v38  ;;  %v1816_v11 = vsel %vm1771_vm3, %v1813_v47, %v1815_v49  ;;  %v1755_v20 = vmax.f32 %v1554_v17, %v1669_v25  ;;  %v1959_v21 = vsel %vm1916_vm4, %v1957_v62, %v1958_v51  ;;  %v6423_v47 = vld [vmem:[%s9390_s3 + $0xf0] sm:$0xff]   ;;  %v6424_v49 = vld [vmem:[%s9390_s3 + $0xf8] sm:$0xff]  }
 0x1b5   : > { %v1756_v28 = vmax.f32 %v1555_v33, %v1671_v44  ;;  %v1961_v45 = vsel %vm1916_vm4, %v1958_v51, %v1960_v5  ;;  %v2103_v50 = vsel %vm448_vm0, %v2101_v16, %v2102_v43  ;;  %v2105_v9 = vsel %vm448_vm0, %v2102_v43, %v2104_v24  ;;  %v6425_v51 = vld [vmem:[%s9390_s3 + $0xb8] sm:$0xff]   ;;  %6220 = vmatprep.subr.bf16.mxu0 %v6423_v47 }
 0x1b6   : > { %v3074_v6 = vrot.slane %v7806_v39, 1  ;;  %v3075_v19 = vrot.slane %v7812_v0, 1  ;;  %v1900_v8 = vmax.f32 %v1755_v20, %v1814_v42  ;;  %v3077_v35 = vrot.slane %v7820_v34, 1  ;;  %6174 = vmatprep.subr.bf16.mxu1 %v6425_v51  ;;  %6221 = vmatpush3.bf16.msra.mxu0 %v6423_v47 }
 0x1b7   : > { %v1901_v30 = vmax.f32 %v1756_v28, %v1816_v11  ;;  %v3218_v2 = vrot.slane %v7806_v39, 2  ;;  %v3219_v33 = vrot.slane %v7812_v0, 2  ;;  %v3221_v32 = vrot.slane %v7820_v34, 2  ;;  %6175 = vmatpush3.bf16.msra.mxu1 %v6425_v51  ;;  %6222 = vmatprep.subr.bf16.mxu0 %v6424_v49 }
 0x1b8   : > { %v3076_v17 = vsel %vm1626_vm2, %v3074_v6, %v3075_v19  ;;  %v3362_v53 = vrot.slane %v7806_v39, 3  ;;  %v2045_v62 = vmax.f32 %v1900_v8, %v1959_v21  ;;  %v3078_v12 = vsel %vm1626_vm2, %v3075_v19, %v3077_v35  ;;  %v7859_v19 = vld [vmem:[#allocation2 + $0xd8] sm:$0xff]  ;;  %v7863_v35 = vld [vmem:[#allocation2 + $0xe0] sm:$0xff] }
 0x1b9   : > { %v2046_v16 = vmax.f32 %v1901_v30, %v1961_v45  ;;  %v3174_v38 = vmax.f32 %v7806_v39, %v3076_v17  ;;  %v3175_v5 = vmax.f32 %v7812_v0, %v3078_v12  ;;  %v3220_v43 = vsel %vm1771_vm3, %v3218_v2, %v3219_v33 }
 0x1ba   : > { %v3222_v24 = vsel %vm1771_vm3, %v3219_v33, %v3221_v32  ;;  %v3363_v25 = vrot.slane %v7812_v0, 3  ;;  %v2189_v44 = vmax.f32 %v2045_v62, %v2103_v50  ;;  %v3365_v20 = vrot.slane %v7820_v34, 3  ;;  %6223 = vmatpush3.bf16.msra.mxu0 %v6424_v49 }
 0x1bb   : > { %v2190_v42 = vmax.f32 %v2046_v16, %v2105_v9  ;;  %v3318_v11 = vmax.f32 %v3174_v38, %v3220_v43  ;;  %v3319_v28 = vmax.f32 %v3175_v5, %v3222_v24  ;;  %v3506_v45 = vrot.slane %v7806_v39, 4  ;;  %v6683_v39 = vld [vmem:[%s9390_s3 + $0xc0] sm:$0xff]   ;;  %v7903_v43 = vld [vmem:[#allocation2 + $0x138] sm:$0xff] }
 0x1bc   : > { %v3364_v21 = vsel %vm1916_vm4, %v3362_v53, %v3363_v25  ;;  %v3507_v6 = vrot.slane %v7812_v0, 4  ;;  %v3366_v50 = vsel %vm1916_vm4, %v3363_v25, %v3365_v20  ;;  %v3509_v30 = vrot.slane %v7820_v34, 4  ;;  %2558 = vst [vmem:[#allocation2 + $0xf2] sm:$0xff] %v2189_v44  ;;  %6256 = vmatprep.subr.bf16.mxu1 %v6683_v39  ;;  %v7873_v34 = vld [vmem:[#allocation2 + $0xe8] sm:$0xff]  ;;  %v7913_v24 = vld [vmem:[#allocation2 + $0x140] sm:$0xff] }
 0x1bd   : > { %v2245_v8 = vpack.c.bf16 %v2190_v42, %v2189_v44  ;;  %v3462_v9 = vmax.f32 %v3318_v11, %v3364_v21  ;;  %2559 = vst [vmem:[#allocation2 + $0xfa] sm:$0xff] %v2190_v42  ;;  %v3463_v0 = vmax.f32 %v3319_v28, %v3366_v50  ;;  %v1268_v17 = vmax.f32 %v7460_v60, %v7564_v15 }
 0x1be   : > { %v3508_v2 = vsel %vm448_vm0, %v3506_v45, %v3507_v6  ;;  %v1269_v33 = vmax.f32 %v7472_v56, %v7566_v52  ;;  %v3510_v32 = vsel %vm448_vm0, %v3507_v6, %v3509_v30  ;;  %v1363_v62 = vmax.f32 %v1267_v10, %v7672_v54 }
 0x1bf   : > { %6144 = vmatprep.mubr.bf16.mxu1 %v2245_v8  ;;  %v3606_v53 = vmax.f32 %v3462_v9, %v3508_v2  ;;  %v2694_v16 = vmax.f32 %v7745_v3, %v7859_v19  ;;  %v3607_v12 = vmax.f32 %v3463_v0, %v3510_v32  ;;  %v1364_v60 = vmax.f32 %v1268_v17, %v7689_v4 }
 0x1c0   : > { %v1365_v38 = vmax.f32 %v1269_v33, %v7700_v63  ;;  %v2695_v56 = vmax.f32 %v7747_v59, %v7863_v35  ;;  %v1460_v47 = vmax.f32 %v1363_v62, %v7766_v14  ;;  %v2696_v51 = vmax.f32 %v7753_v48, %v7873_v34 }
 0x1c1   : > { %3975 = vst [vmem:[#allocation2 + $0x92] sm:$0xff] %v3606_v53  ;;  %v7893_v26 = vmax.f32 %v2691_v37, %v7859_v19  ;;  %v7899_v10 = vmax.f32 %v2692_v57, %v7863_v35  ;;  %3976 = vst [vmem:[#allocation2 + $0x9a] sm:$0xff] %v3607_v12  ;;  %v1461_v49 = vmax.f32 %v1364_v60, %v7771_v58 }
 0x1c2   : > { %v1462_v5 = vmax.f32 %v1365_v38, %v7773_v27  ;;  %v7909_v40 = vmax.f32 %v2693_v1, %v7873_v34  ;;  %v2880_v37 = vmax.f32 %v7779_v18, %v7859_v19  ;;  %v1557_v57 = vmax.f32 %v1460_v47, %v7903_v43 }
 0x1c3   : > { %v2881_v25 = vmax.f32 %v7785_v41, %v7863_v35  ;;  %v2882_v44 = vmax.f32 %v7791_v61, %v7873_v34  ;;  %v7926_v7 = vmax.f32 %v2877_v46, %v7859_v19  ;;  %v1558_v1 = vmax.f32 %v1461_v49, %v7913_v24 }
 0x1c4   : > { %v1559_v42 = vmax.f32 %v1462_v5, %v7915_v36  ;;  %v7934_v11 = vmax.f32 %v2878_v22, %v7863_v35  ;;  %v7940_v20 = vmax.f32 %v2879_v23, %v7873_v34  ;;  %v1672_v28 = vrot.slane %v1557_v57, 1 }
 0x1c5   : > { %v1817_v55 = vrot.slane %v1557_v57, 2  ;;  %v1962_v46 = vrot.slane %v1557_v57, 3  ;;  %v2106_v21 = vrot.slane %v1557_v57, 4  ;;  %v1673_v45 = vrot.slane %v1558_v1, 1 }
 0x1c6   : > { %v1675_v6 = vrot.slane %v1559_v42, 1  ;;  %v1818_v8 = vrot.slane %v1558_v1, 2  ;;  %v1820_v50 = vrot.slane %v1559_v42, 2  ;;  %v1963_v9 = vrot.slane %v1558_v1, 3 }
 0x1c7   : > { %v1965_v30 = vrot.slane %v1559_v42, 3  ;;  %v2107_v39 = vrot.slane %v1558_v1, 4  ;;  %v2109_v13 = vrot.slane %v1559_v42, 4  ;;  %v1674_v22 = vsel %vm1626_vm2, %v1672_v28, %v1673_v45 }
 0x1c8   : > { %v1676_v0 = vsel %vm1626_vm2, %v1673_v45, %v1675_v6  ;;  %v1819_v29 = vsel %vm1771_vm3, %v1817_v55, %v1818_v8  ;;  %v1821_v23 = vsel %vm1771_vm3, %v1818_v8, %v1820_v50  ;;  %v1757_v2 = vmax.f32 %v1557_v57, %v1674_v22 }
 0x1c9   : > { %v1758_v17 = vmax.f32 %v1558_v1, %v1676_v0  ;;  %v1964_v33 = vsel %vm1916_vm4, %v1962_v46, %v1963_v9  ;;  %v1966_v32 = vsel %vm1916_vm4, %v1963_v9, %v1965_v30  ;;  %v2108_v53 = vsel %vm448_vm0, %v2106_v21, %v2107_v39 }
 0x1ca   : > { %v2110_v62 = vsel %vm448_vm0, %v2107_v39, %v2109_v13  ;;  %v3079_v12 = vrot.slane %v7926_v7, 1  ;;  %v3080_v60 = vrot.slane %v7934_v11, 1  ;;  %v1902_v38 = vmax.f32 %v1757_v2, %v1819_v29 }
 0x1cb   : > { %v1903_v47 = vmax.f32 %v1758_v17, %v1821_v23  ;;  %v3082_v49 = vrot.slane %v7940_v20, 1  ;;  %v3223_v5 = vrot.slane %v7926_v7, 2  ;;  %v3224_v1 = vrot.slane %v7934_v11, 2  ;;  %v7968_v17 = vld [vmem:[#allocation2 + $0xf0] sm:$0xff] }
 0x1cc   : > { %v3081_v57 = vsel %vm1626_vm2, %v3079_v12, %v3080_v60  ;;  %v3226_v42 = vrot.slane %v7940_v20, 2  ;;  %v3367_v28 = vrot.slane %v7926_v7, 3  ;;  %v2047_v55 = vmax.f32 %v1902_v38, %v1964_v33 }
 0x1cd   : > { %v2048_v46 = vmax.f32 %v1903_v47, %v1966_v32  ;;  %v3083_v21 = vsel %vm1626_vm2, %v3080_v60, %v3082_v49  ;;  %v3176_v45 = vmax.f32 %v7926_v7, %v3081_v57  ;;  %v3225_v8 = vsel %vm1771_vm3, %v3223_v5, %v3224_v1  ;;  %v7979_v47 = vld [vmem:[#allocation2 + $0x100] sm:$0xff] }
 0x1ce   : > { %v3177_v6 = vmax.f32 %v7934_v11, %v3083_v21  ;;  %v3227_v50 = vsel %vm1771_vm3, %v3224_v1, %v3226_v42  ;;  %v3368_v9 = vrot.slane %v7934_v11, 3  ;;  %v2191_v30 = vmax.f32 %v2047_v55, %v2108_v53  ;;  %v7972_v53 = vld [vmem:[#allocation2 + $0xf8] sm:$0xff]  ;;  %v7991_v55 = vld [vmem:[#allocation2 + $0x150] sm:$0xff] }
 0x1cf   : > { %v2192_v39 = vmax.f32 %v2048_v46, %v2110_v62  ;;  %v3320_v13 = vmax.f32 %v3176_v45, %v3225_v8  ;;  %v3370_v22 = vrot.slane %v7940_v20, 3  ;;  %v3511_v23 = vrot.slane %v7926_v7, 4  ;;  %v7993_v46 = vld [vmem:[#allocation2 + $0x158] sm:$0xff] }
 0x1d0   : > { %v3321_v0 = vmax.f32 %v3177_v6, %v3227_v50  ;;  %v3369_v29 = vsel %vm1916_vm4, %v3367_v28, %v3368_v9  ;;  %v3512_v2 = vrot.slane %v7934_v11, 4  ;;  %v3514_v60 = vrot.slane %v7940_v20, 4  ;;  %2560 = vst [vmem:[#allocation2 + $0x10a] sm:$0xff] %v2191_v30  ;;  %v8011_v50 = vld [vmem:[#allocation2 + $0x160] sm:$0xff] }
 0x1d1   : > { %v2246_v33 = vpack.c.bf16 %v2192_v39, %v2191_v30  ;;  %v3371_v32 = vsel %vm1916_vm4, %v3368_v9, %v3370_v22  ;;  %v3464_v12 = vmax.f32 %v3320_v13, %v3369_v29  ;;  %2561 = vst [vmem:[#allocation2 + $0x112] sm:$0xff] %v2192_v39  ;;  %v1270_v7 = vmax.f32 %v7553_v31, %v7672_v54 }
 0x1d2   : > { %v3465_v62 = vmax.f32 %v3321_v0, %v3371_v32  ;;  %v3513_v38 = vsel %vm448_vm0, %v3511_v23, %v3512_v2  ;;  %v1271_v11 = vmax.f32 %v7564_v15, %v7689_v4  ;;  %v3515_v49 = vsel %vm448_vm0, %v3512_v2, %v3514_v60 }
 0x1d3   : > { %6145 = vmatmul.mubr.bf16.gmra.mrb[16].mxu1 %v2246_v33  ;;  %v3608_v5 = vmax.f32 %v3464_v12, %v3513_v38  ;;  %v1272_v20 = vmax.f32 %v7566_v52, %v7700_v63  ;;  %v2697_v57 = vmax.f32 %v7859_v19, %v7968_v17  ;;  %v1366_v42 = vmax.f32 %v1270_v7, %v7766_v14 }
 0x1d4   : > { %v3609_v1 = vmax.f32 %v3465_v62, %v3515_v49  ;;  %v1367_v31 = vmax.f32 %v1271_v11, %v7771_v58  ;;  %v2698_v15 = vmax.f32 %v7863_v35, %v7972_v53  ;;  %v2699_v52 = vmax.f32 %v7873_v34, %v7979_v47 }
 0x1d5   : > { %3977 = vst [vmem:[#allocation2 + $0xaa] sm:$0xff] %v3608_v5  ;;  %v1368_v28 = vmax.f32 %v1272_v20, %v7773_v27  ;;  %v8001_v21 = vmax.f32 %v2694_v16, %v7968_v17  ;;  %v8007_v45 = vmax.f32 %v2695_v56, %v7972_v53  ;;  %v1463_v6 = vmax.f32 %v1366_v42, %v7903_v43 }
 0x1d6   : > { %3978 = vst [vmem:[#allocation2 + $0xb2] sm:$0xff] %v3609_v1  ;;  %v1464_v8 = vmax.f32 %v1367_v31, %v7913_v24  ;;  %v8017_v3 = vmax.f32 %v2696_v51, %v7979_v47  ;;  %v2883_v16 = vmax.f32 %v7893_v26, %v7968_v17  ;;  %v2884_v56 = vmax.f32 %v7899_v10, %v7972_v53 }
 0x1d7   : > { %v1465_v59 = vmax.f32 %v1368_v28, %v7915_v36  ;;  %v2885_v9 = vmax.f32 %v7909_v40, %v7979_v47  ;;  %v8030_v30 = vmax.f32 %v2880_v37, %v7968_v17  ;;  %v1560_v48 = vmax.f32 %v1463_v6, %v7991_v55 }
 0x1d8   : > { %v1561_v51 = vmax.f32 %v1464_v8, %v7993_v46  ;;  %v8038_v39 = vmax.f32 %v2881_v25, %v7972_v53  ;;  %v8044_v13 = vmax.f32 %v2882_v44, %v7979_v47 }
 0x1d9   : > { %v1562_v18 = vmax.f32 %v1465_v59, %v8011_v50  ;;  %v3084_v37 = vrot.slane %v8030_v30, 1  ;;  %v3228_v22 = vrot.slane %v8030_v30, 2  ;;  %v3372_v0 = vrot.slane %v8030_v30, 3 }
 0x1da   : > { %v1677_v29 = vrot.slane %v1560_v48, 1  ;;  %v1678_v23 = vrot.slane %v1561_v51, 1  ;;  %v1822_v2 = vrot.slane %v1560_v48, 2  ;;  %v1823_v41 = vrot.slane %v1561_v51, 2 }
 0x1db   : > { %v1680_v25 = vrot.slane %v1562_v18, 1  ;;  %v1825_v33 = vrot.slane %v1562_v18, 2  ;;  %v1967_v32 = vrot.slane %v1560_v48, 3  ;;  %v1968_v12 = vrot.slane %v1561_v51, 3 }
 0x1dc   : > { %v1679_v61 = vsel %vm1626_vm2, %v1677_v29, %v1678_v23  ;;  %v1824_v44 = vsel %vm1771_vm3, %v1822_v2, %v1823_v41  ;;  %v1970_v60 = vrot.slane %v1562_v18, 3  ;;  %v2111_v62 = vrot.slane %v1560_v48, 4 }
 0x1dd   : > { %v1681_v38 = vsel %vm1626_vm2, %v1678_v23, %v1680_v25  ;;  %v1759_v7 = vmax.f32 %v1560_v48, %v1679_v61  ;;  %v1826_v11 = vsel %vm1771_vm3, %v1823_v41, %v1825_v33  ;;  %v1969_v49 = vsel %vm1916_vm4, %v1967_v32, %v1968_v12 }
 0x1de   : > { %v1760_v5 = vmax.f32 %v1561_v51, %v1681_v38  ;;  %v1971_v20 = vsel %vm1916_vm4, %v1968_v12, %v1970_v60  ;;  %v2112_v1 = vrot.slane %v1561_v51, 4  ;;  %v2114_v42 = vrot.slane %v1562_v18, 4 }
 0x1df   : > { %v1904_v31 = vmax.f32 %v1759_v7, %v1824_v44  ;;  %v3085_v28 = vrot.slane %v8038_v39, 1  ;;  %v3087_v6 = vrot.slane %v8044_v13, 1  ;;  %v3229_v8 = vrot.slane %v8038_v39, 2 }
 0x1e0   : > { %v1905_v59 = vmax.f32 %v1760_v5, %v1826_v11  ;;  %v2113_v29 = vsel %vm448_vm0, %v2111_v62, %v2112_v1  ;;  %v2115_v48 = vsel %vm448_vm0, %v2112_v1, %v2114_v42  ;;  %v3231_v23 = vrot.slane %v8044_v13, 2  ;;  %v8077_v1 = vld [vmem:[#allocation2 + $0x108] sm:$0xff]  ;;  %v8079_v42 = vld [vmem:[#allocation2 + $0x110] sm:$0xff] }
 0x1e1   : > { %v2049_v2 = vmax.f32 %v1904_v31, %v1969_v49  ;;  %v3086_v41 = vsel %vm1626_vm2, %v3084_v37, %v3085_v28  ;;  %v3088_v51 = vsel %vm1626_vm2, %v3085_v28, %v3087_v6  ;;  %v3230_v18 = vsel %vm1771_vm3, %v3228_v22, %v3229_v8 }
 0x1e2   : > { %v2050_v25 = vmax.f32 %v1905_v59, %v1971_v20  ;;  %v3178_v33 = vmax.f32 %v8030_v30, %v3086_v41  ;;  %v3179_v32 = vmax.f32 %v8038_v39, %v3088_v51  ;;  %v3232_v12 = vsel %vm1771_vm3, %v3229_v8, %v3231_v23  ;;  %v8099_v51 = vld [vmem:[#allocation2 + $0x168] sm:$0xff] }
 0x1e3   : > { %v2193_v61 = vmax.f32 %v2049_v2, %v2113_v29  ;;  %v3373_v44 = vrot.slane %v8038_v39, 3  ;;  %v3375_v60 = vrot.slane %v8044_v13, 3  ;;  %v3516_v62 = vrot.slane %v8030_v30, 4 }
 0x1e4   : > { %v2194_v38 = vmax.f32 %v2050_v25, %v2115_v48  ;;  %v3322_v37 = vmax.f32 %v3178_v33, %v3230_v18  ;;  %v3323_v7 = vmax.f32 %v3179_v32, %v3232_v12  ;;  %v3517_v11 = vrot.slane %v8038_v39, 4  ;;  %v8082_v39 = vld [vmem:[#allocation2 + $0x118] sm:$0xff] }
 0x1e5   : > { %v3374_v22 = vsel %vm1916_vm4, %v3372_v0, %v3373_v44  ;;  %v3376_v49 = vsel %vm1916_vm4, %v3373_v44, %v3375_v60  ;;  %v3519_v5 = vrot.slane %v8044_v13, 4  ;;  %v1273_v20 = vmax.f32 %v7672_v54, %v7766_v14  ;;  %2562 = vst [vmem:[#allocation2 + $0x122] sm:$0xff] %v2193_v61 }
 0x1e6   : > { %v2247_v30 = vpack.c.bf16 %v2194_v38, %v2193_v61  ;;  %v3466_v31 = vmax.f32 %v3322_v37, %v3374_v22  ;;  %v3467_v28 = vmax.f32 %v3323_v7, %v3376_v49  ;;  %v3518_v6 = vsel %vm448_vm0, %v3516_v62, %v3517_v11  ;;  %2563 = vst [vmem:[#allocation2 + $0x12a] sm:$0xff] %v2194_v38  ;;  %v8128_v61 = vld [vmem:[#allocation2 + $0x178] sm:$0xff] }
 0x1e7   : > { %v3520_v0 = vsel %vm448_vm0, %v3517_v11, %v3519_v5  ;;  %v1274_v13 = vmax.f32 %v7689_v4, %v7771_v58  ;;  %v1275_v54 = vmax.f32 %v7700_v63, %v7773_v27  ;;  %v1369_v8 = vmax.f32 %v1273_v20, %v7903_v43 }
 0x1e8   : > { %6148 = vmatprep.mubr.bf16.mxu1 %v2247_v30  ;;  %v3610_v59 = vmax.f32 %v3466_v31, %v3518_v6  ;;  %v3611_v29 = vmax.f32 %v3467_v28, %v3520_v0  ;;  %v2700_v48 = vmax.f32 %v7968_v17, %v8077_v1  ;;  %v2701_v23 = vmax.f32 %v7972_v53, %v8079_v42 }
 0x1e9   : > { %v1370_v2 = vmax.f32 %v1274_v13, %v7913_v24  ;;  %v1371_v41 = vmax.f32 %v1275_v54, %v7915_v36  ;;  %v1466_v4 = vmax.f32 %v1369_v8, %v7991_v55  ;;  %v2702_v63 = vmax.f32 %v7979_v47, %v8082_v39 }
 0x1ea   : > { %3979 = vst [vmem:[#allocation2 + $0xc2] sm:$0xff] %v3610_v59  ;;  %3980 = vst [vmem:[#allocation2 + $0xca] sm:$0xff] %v3611_v29  ;;  %v8105_v18 = vmax.f32 %v2697_v57, %v8077_v1  ;;  %v8111_v25 = vmax.f32 %v2698_v15, %v8079_v42  ;;  %v8117_v33 = vmax.f32 %v2699_v52, %v8082_v39  ;;  %v8126_v15 = vld [vmem:[#allocation2 + $0x170] sm:$0xff] }
 0x1eb   : > { %v2886_v32 = vmax.f32 %v8001_v21, %v8077_v1  ;;  %v1467_v12 = vmax.f32 %v1370_v2, %v7993_v46  ;;  %v1468_v19 = vmax.f32 %v1371_v41, %v8011_v50  ;;  %v1563_v57 = vmax.f32 %v1466_v4, %v8099_v51 }
 0x1ec   : > { %v2887_v35 = vmax.f32 %v8007_v45, %v8079_v42  ;;  %v2888_v34 = vmax.f32 %v8017_v3, %v8082_v39  ;;  %v8136_v52 = vmax.f32 %v2883_v16, %v8077_v1  ;;  %v8142_v44 = vmax.f32 %v2884_v56, %v8079_v42 }
 0x1ed   : > { %v8148_v60 = vmax.f32 %v2885_v9, %v8082_v39  ;;  %v1564_v62 = vmax.f32 %v1467_v12, %v8126_v15  ;;  %v1565_v38 = vmax.f32 %v1468_v19, %v8128_v61  ;;  %v1682_v37 = vrot.slane %v1563_v57, 1 }
 0x1ee   : > { %v1827_v26 = vrot.slane %v1563_v57, 2  ;;  %v1972_v16 = vrot.slane %v1563_v57, 3  ;;  %v2116_v7 = vrot.slane %v1563_v57, 4  ;;  %v3089_v11 = vrot.slane %v8136_v52, 1 }
 0x1ef   : > { %v3090_v10 = vrot.slane %v8142_v44, 1  ;;  %v1683_v56 = vrot.slane %v1564_v62, 1  ;;  %v1685_v22 = vrot.slane %v1565_v38, 1  ;;  %v1828_v49 = vrot.slane %v1564_v62, 2 }
 0x1f0   : > { %v1830_v5 = vrot.slane %v1565_v38, 2  ;;  %v1973_v20 = vrot.slane %v1564_v62, 3  ;;  %v1975_v40 = vrot.slane %v1565_v38, 3  ;;  %v2117_v9 = vrot.slane %v1564_v62, 4 }
 0x1f1   : > { %v2119_v30 = vrot.slane %v1565_v38, 4  ;;  %v1684_v31 = vsel %vm1626_vm2, %v1682_v37, %v1683_v56  ;;  %v1686_v28 = vsel %vm1626_vm2, %v1683_v56, %v1685_v22  ;;  %v1829_v6 = vsel %vm1771_vm3, %v1827_v26, %v1828_v49 }
 0x1f2   : > { %v1831_v0 = vsel %vm1771_vm3, %v1828_v49, %v1830_v5  ;;  %v1761_v13 = vmax.f32 %v1563_v57, %v1684_v31  ;;  %v1762_v54 = vmax.f32 %v1564_v62, %v1686_v28  ;;  %v1974_v8 = vsel %vm1916_vm4, %v1972_v16, %v1973_v20 }
 0x1f3   : > { %v1976_v59 = vsel %vm1916_vm4, %v1973_v20, %v1975_v40  ;;  %v2118_v29 = vsel %vm448_vm0, %v2116_v7, %v2117_v9  ;;  %v2120_v2 = vsel %vm448_vm0, %v2117_v9, %v2119_v30  ;;  %v3091_v41 = vsel %vm1626_vm2, %v3089_v11, %v3090_v10 }
 0x1f4   : > { %v3092_v4 = vrot.slane %v8148_v60, 1  ;;  %v1906_v12 = vmax.f32 %v1761_v13, %v1829_v6  ;;  %v1907_v19 = vmax.f32 %v1762_v54, %v1831_v0  ;;  %v3180_v38 = vmax.f32 %v8136_v52, %v3091_v41  ;;  %v8180_v54 = vld [vmem:[#allocation2 + $0x120] sm:$0xff] }
 0x1f5   : > { %v3233_v37 = vrot.slane %v8136_v52, 2  ;;  %v3234_v62 = vrot.slane %v8142_v44, 2  ;;  %v3236_v26 = vrot.slane %v8148_v60, 2  ;;  %v3377_v16 = vrot.slane %v8136_v52, 3 }
 0x1f6   : > { %v3093_v57 = vsel %vm1626_vm2, %v3090_v10, %v3092_v4  ;;  %v2051_v7 = vmax.f32 %v1906_v12, %v1974_v8  ;;  %v2052_v56 = vmax.f32 %v1907_v19, %v1976_v59  ;;  %v3378_v22 = vrot.slane %v8142_v44, 3 }
 0x1f7   : > { %v3181_v11 = vmax.f32 %v8142_v44, %v3093_v57  ;;  %v3235_v49 = vsel %vm1771_vm3, %v3233_v37, %v3234_v62  ;;  %v3237_v5 = vsel %vm1771_vm3, %v3234_v62, %v3236_v26  ;;  %v3380_v20 = vrot.slane %v8148_v60, 3  ;;  %v8199_v26 = vld [vmem:[#allocation2 + $0x180] sm:$0xff] }
 0x1f8   : > { %v3521_v10 = vrot.slane %v8136_v52, 4  ;;  %v2195_v40 = vmax.f32 %v2051_v7, %v2118_v29  ;;  %v2196_v9 = vmax.f32 %v2052_v56, %v2120_v2  ;;  %v3324_v30 = vmax.f32 %v3180_v38, %v3235_v49  ;;  %v8184_v29 = vld [vmem:[#allocation2 + $0x128] sm:$0xff]  ;;  %v8186_v2 = vld [vmem:[#allocation2 + $0x130] sm:$0xff] }
 0x1f9   : > { %v3325_v31 = vmax.f32 %v3181_v11, %v3237_v5  ;;  %v3379_v28 = vsel %vm1916_vm4, %v3377_v16, %v3378_v22  ;;  %v3381_v6 = vsel %vm1916_vm4, %v3378_v22, %v3380_v20  ;;  %v3522_v0 = vrot.slane %v8142_v44, 4  ;;  %v8206_v7 = vld [vmem:[#allocation2 + $0x188] sm:$0xff]  ;;  %v8208_v56 = vld [vmem:[#allocation2 + $0x190] sm:$0xff] }
 0x1fa   : > { %v3524_v13 = vrot.slane %v8148_v60, 4  ;;  %v2248_v8 = vpack.c.bf16 %v2196_v9, %v2195_v40  ;;  %v3468_v59 = vmax.f32 %v3324_v30, %v3379_v28  ;;  %v1276_v52 = vmax.f32 %v7766_v14, %v7903_v43  ;;  %2564 = vst [vmem:[#allocation2 + $0x13a] sm:$0xff] %v2195_v40  ;;  %2565 = vst [vmem:[#allocation2 + $0x142] sm:$0xff] %v2196_v9 }
 0x1fb   : > { %v3469_v41 = vmax.f32 %v3325_v31, %v3381_v6  ;;  %v3523_v4 = vsel %vm448_vm0, %v3521_v10, %v3522_v0  ;;  %v1277_v60 = vmax.f32 %v7771_v58, %v7913_v24  ;;  %v1278_v12 = vmax.f32 %v7773_v27, %v7915_v36 }
 0x1fc   : > { %v3525_v44 = vsel %vm448_vm0, %v3522_v0, %v3524_v13  ;;  %6149 = vmatmul.mubr.bf16.gmra.mrb[20].mxu1 %v2248_v8  ;;  %v3612_v19 = vmax.f32 %v3468_v59, %v3523_v4  ;;  %v1372_v14 = vmax.f32 %v1276_v52, %v7991_v55  ;;  %v2703_v37 = vmax.f32 %v8077_v1, %v8180_v54 }
 0x1fd   : > { %v3613_v38 = vmax.f32 %v3469_v41, %v3525_v44  ;;  %v1373_v57 = vmax.f32 %v1277_v60, %v7993_v46  ;;  %v1374_v62 = vmax.f32 %v1278_v12, %v8011_v50  ;;  %v2704_v58 = vmax.f32 %v8079_v42, %v8184_v29 }
 0x1fe   : > { %v2705_v27 = vmax.f32 %v8082_v39, %v8186_v2  ;;  %3981 = vst [vmem:[#allocation2 + $0xda] sm:$0xff] %v3612_v19  ;;  %v1469_v16 = vmax.f32 %v1372_v14, %v8099_v51  ;;  %v8214_v11 = vmax.f32 %v2700_v48, %v8180_v54  ;;  %v8220_v22 = vmax.f32 %v2701_v23, %v8184_v29 }
 0x1ff   : > { %3982 = vst [vmem:[#allocation2 + $0xe2] sm:$0xff] %v3613_v38  ;;  %v8226_v49 = vmax.f32 %v2702_v63, %v8186_v2  ;;  %v1470_v5 = vmax.f32 %v1373_v57, %v8126_v15  ;;  %v1471_v20 = vmax.f32 %v1374_v62, %v8128_v61  ;;  %v2889_v17 = vmax.f32 %v8105_v18, %v8180_v54 }
 0x200   : > { %v2890_v48 = vmax.f32 %v8111_v25, %v8184_v29  ;;  %v1566_v53 = vmax.f32 %v1469_v16, %v8199_v26  ;;  %v2891_v23 = vmax.f32 %v8117_v33, %v8186_v2  ;;  %v8241_v47 = vmax.f32 %v2886_v32, %v8180_v54 }
 0x201   : > { %v8247_v63 = vmax.f32 %v2887_v35, %v8184_v29  ;;  %v1567_v10 = vmax.f32 %v1470_v5, %v8206_v7  ;;  %v1568_v40 = vmax.f32 %v1471_v20, %v8208_v56  ;;  %v8255_v9 = vmax.f32 %v2888_v34, %v8186_v2 }
 0x202   : > { %v1279_v21 = vmax.f32 %v7903_v43, %v7991_v55  ;;  %v1687_v32 = vrot.slane %v1566_v53, 1  ;;  %v1832_v30 = vrot.slane %v1566_v53, 2  ;;  %v1977_v31 = vrot.slane %v1566_v53, 3 }
 0x203   : > { %v2121_v28 = vrot.slane %v1566_v53, 4  ;;  %v1688_v45 = vrot.slane %v1567_v10, 1  ;;  %v1690_v35 = vrot.slane %v1568_v40, 1  ;;  %v1833_v6 = vrot.slane %v1567_v10, 2 }
 0x204   : > { %v1835_v0 = vrot.slane %v1568_v40, 2  ;;  %v1978_v13 = vrot.slane %v1567_v10, 3  ;;  %v1980_v8 = vrot.slane %v1568_v40, 3  ;;  %v2122_v59 = vrot.slane %v1567_v10, 4 }
 0x205   : > { %v2124_v41 = vrot.slane %v1568_v40, 4  ;;  %v1689_v52 = vsel %vm1626_vm2, %v1687_v32, %v1688_v45  ;;  %v1691_v3 = vsel %vm1626_vm2, %v1688_v45, %v1690_v35  ;;  %v1834_v34 = vsel %vm1771_vm3, %v1832_v30, %v1833_v6 }
 0x206   : > { %v1836_v4 = vsel %vm1771_vm3, %v1833_v6, %v1835_v0  ;;  %v1763_v44 = vmax.f32 %v1566_v53, %v1689_v52  ;;  %v1764_v60 = vmax.f32 %v1567_v10, %v1691_v3  ;;  %v1979_v12 = vsel %vm1916_vm4, %v1977_v31, %v1978_v13 }
 0x207   : > { %v1981_v19 = vsel %vm1916_vm4, %v1978_v13, %v1980_v8  ;;  %v2123_v38 = vsel %vm448_vm0, %v2121_v28, %v2122_v59  ;;  %v2125_v14 = vsel %vm448_vm0, %v2122_v59, %v2124_v41  ;;  %v3094_v57 = vrot.slane %v8241_v47, 1 }
 0x208   : > { %v3095_v62 = vrot.slane %v8247_v63, 1  ;;  %v1908_v16 = vmax.f32 %v1763_v44, %v1834_v34  ;;  %v1909_v5 = vmax.f32 %v1764_v60, %v1836_v4  ;;  %v3097_v20 = vrot.slane %v8255_v9, 1 }
 0x209   : > { %v3238_v40 = vrot.slane %v8241_v47, 2  ;;  %v3239_v10 = vrot.slane %v8247_v63, 2  ;;  %v3241_v32 = vrot.slane %v8255_v9, 2  ;;  %v3382_v30 = vrot.slane %v8241_v47, 3 }
 0x20a   : > { %v3096_v53 = vsel %vm1626_vm2, %v3094_v57, %v3095_v62  ;;  %v2053_v31 = vmax.f32 %v1908_v16, %v1979_v12  ;;  %v2054_v28 = vmax.f32 %v1909_v5, %v1981_v19  ;;  %v3098_v45 = vsel %vm1626_vm2, %v3095_v62, %v3097_v20  ;;  %v8285_v12 = vld [vmem:[#allocation2 + $0x138] sm:$0xff]  ;;  %v8296_v20 = vld [vmem:[#allocation2 + $0x148] sm:$0xff] }
 0x20b   : > { %v3182_v35 = vmax.f32 %v8241_v47, %v3096_v53  ;;  %v3183_v6 = vmax.f32 %v8247_v63, %v3098_v45  ;;  %v3240_v0 = vsel %vm1771_vm3, %v3238_v40, %v3239_v10  ;;  %v3242_v13 = vsel %vm1771_vm3, %v3239_v10, %v3241_v32  ;;  %v8342_v45 = vld [vmem:[#allocation2 + $0x1a8] sm:$0xff] }
 0x20c   : > { %v3383_v8 = vrot.slane %v8247_v63, 3  ;;  %v2197_v59 = vmax.f32 %v2053_v31, %v2123_v38  ;;  %v2198_v41 = vmax.f32 %v2054_v28, %v2125_v14  ;;  %v3385_v3 = vrot.slane %v8255_v9, 3  ;;  %v8289_v38 = vld [vmem:[#allocation2 + $0x140] sm:$0xff]  ;;  %v8330_v31 = vld [vmem:[#allocation2 + $0x198] sm:$0xff] }
 0x20d   : > { %v3326_v52 = vmax.f32 %v3182_v35, %v3240_v0  ;;  %v3327_v34 = vmax.f32 %v3183_v6, %v3242_v13  ;;  %v3526_v44 = vrot.slane %v8241_v47, 4  ;;  %v3527_v60 = vrot.slane %v8247_v63, 4 }
 0x20e   : > { %v3384_v4 = vsel %vm1916_vm4, %v3382_v30, %v3383_v8  ;;  %v2249_v19 = vpack.c.bf16 %v2198_v41, %v2197_v59  ;;  %v3386_v57 = vsel %vm1916_vm4, %v3383_v8, %v3385_v3  ;;  %v3529_v16 = vrot.slane %v8255_v9, 4  ;;  %2566 = vst [vmem:[#allocation2 + $0x152] sm:$0xff] %v2197_v59  ;;  %2567 = vst [vmem:[#allocation2 + $0x15a] sm:$0xff] %v2198_v41 }
 0x20f   : > { %v3470_v62 = vmax.f32 %v3326_v52, %v3384_v4  ;;  %v3471_v14 = vmax.f32 %v3327_v34, %v3386_v57  ;;  %v3528_v5 = vsel %vm448_vm0, %v3526_v44, %v3527_v60  ;;  %v1280_v47 = vmax.f32 %v7913_v24, %v7993_v46 }
 0x210   : > { %v1281_v63 = vmax.f32 %v7915_v36, %v8011_v50  ;;  %6152 = vmatprep.mubr.bf16.mxu1 %v2249_v19  ;;  %v3530_v40 = vsel %vm448_vm0, %v3527_v60, %v3529_v16  ;;  %v1375_v9 = vmax.f32 %v1279_v21, %v8099_v51  ;;  %v8307_v10 = vmax.f32 %v2703_v37, %v8285_v12 }
 0x211   : > { %v3614_v53 = vmax.f32 %v3470_v62, %v3528_v5  ;;  %v3615_v24 = vmax.f32 %v3471_v14, %v3530_v40  ;;  %v1376_v36 = vmax.f32 %v1280_v47, %v8126_v15  ;;  %v8315_v30 = vmax.f32 %v2704_v58, %v8289_v38 }
 0x212   : > { %v1377_v32 = vmax.f32 %v1281_v63, %v8128_v61  ;;  %v1472_v43 = vmax.f32 %v1375_v9, %v8199_v26  ;;  %v8322_v1 = vmax.f32 %v2705_v27, %v8296_v20  ;;  %v2892_v37 = vmax.f32 %v8214_v11, %v8285_v12  ;;  %v8340_v27 = vld [vmem:[#allocation2 + $0x1a0] sm:$0xff] }
 0x213   : > { %3983 = vst [vmem:[#allocation2 + $0xf2] sm:$0xff] %v3614_v53  ;;  %v2893_v21 = vmax.f32 %v8220_v22, %v8289_v38  ;;  %3984 = vst [vmem:[#allocation2 + $0xfa] sm:$0xff] %v3615_v24  ;;  %v1473_v42 = vmax.f32 %v1376_v36, %v8206_v7  ;;  %v2894_v28 = vmax.f32 %v8226_v49, %v8296_v20 }
 0x214   : > { %v1474_v58 = vmax.f32 %v1377_v32, %v8208_v56  ;;  %v8338_v39 = vmax.f32 %v2889_v17, %v8285_v12  ;;  %v1569_v35 = vmax.f32 %v1472_v43, %v8330_v31  ;;  %v8349_v6 = vmax.f32 %v2890_v48, %v8289_v38 }
 0x215   : > { %v8355_v0 = vmax.f32 %v2891_v23, %v8296_v20  ;;  %v1282_v18 = vmax.f32 %v7991_v55, %v8099_v51  ;;  %v1570_v17 = vmax.f32 %v1473_v42, %v8340_v27  ;;  %v1285_v11 = vmax.f32 %v8099_v51, %v8199_v26 }
 0x216   : > { %v1571_v13 = vmax.f32 %v1474_v58, %v8342_v45  ;;  %v3099_v8 = vrot.slane %v8338_v39, 1  ;;  %v3243_v59 = vrot.slane %v8338_v39, 2  ;;  %v1692_v25 = vrot.slane %v1569_v35, 1 }
 0x217   : > { %v1837_v48 = vrot.slane %v1569_v35, 2  ;;  %v1982_v41 = vrot.slane %v1569_v35, 3  ;;  %v2126_v52 = vrot.slane %v1569_v35, 4  ;;  %v1693_v3 = vrot.slane %v1570_v17, 1 }
 0x218   : > { %v1695_v34 = vrot.slane %v1571_v13, 1  ;;  %v1838_v33 = vrot.slane %v1570_v17, 2  ;;  %v1840_v23 = vrot.slane %v1571_v13, 2  ;;  %v1983_v4 = vrot.slane %v1570_v17, 3 }
 0x219   : > { %v1985_v44 = vrot.slane %v1571_v13, 3  ;;  %v2127_v60 = vrot.slane %v1570_v17, 4  ;;  %v2129_v19 = vrot.slane %v1571_v13, 4  ;;  %v1694_v57 = vsel %vm1626_vm2, %v1692_v25, %v1693_v3 }
 0x21a   : > { %v1696_v62 = vsel %vm1626_vm2, %v1693_v3, %v1695_v34  ;;  %v1839_v16 = vsel %vm1771_vm3, %v1837_v48, %v1838_v33  ;;  %v1841_v14 = vsel %vm1771_vm3, %v1838_v33, %v1840_v23  ;;  %v1765_v5 = vmax.f32 %v1569_v35, %v1694_v57 }
 0x21b   : > { %v1766_v47 = vmax.f32 %v1570_v17, %v1696_v62  ;;  %v1984_v63 = vsel %vm1916_vm4, %v1982_v41, %v1983_v4  ;;  %v1986_v40 = vsel %vm1916_vm4, %v1983_v4, %v1985_v44  ;;  %v2128_v53 = vsel %vm448_vm0, %v2126_v52, %v2127_v60 }
 0x21c   : > { %v2130_v9 = vsel %vm448_vm0, %v2127_v60, %v2129_v19  ;;  %v3100_v24 = vrot.slane %v8349_v6, 1  ;;  %v3102_v36 = vrot.slane %v8355_v0, 1  ;;  %v1910_v32 = vmax.f32 %v1765_v5, %v1839_v16  ;;  %v8389_v5 = vld [vmem:[#allocation2 + $0x150] sm:$0xff] }
 0x21d   : > { %v1911_v43 = vmax.f32 %v1766_v47, %v1841_v14  ;;  %v3244_v42 = vrot.slane %v8349_v6, 2  ;;  %v3246_v58 = vrot.slane %v8355_v0, 2  ;;  %v3387_v13 = vrot.slane %v8338_v39, 3 }
 0x21e   : > { %v3101_v35 = vsel %vm1626_vm2, %v3099_v8, %v3100_v24  ;;  %v3103_v17 = vsel %vm1626_vm2, %v3100_v24, %v3102_v36  ;;  %v3388_v25 = vrot.slane %v8349_v6, 3  ;;  %v2055_v48 = vmax.f32 %v1910_v32, %v1984_v63 }
 0x21f   : > { %v2056_v41 = vmax.f32 %v1911_v43, %v1986_v40  ;;  %v3184_v52 = vmax.f32 %v8338_v39, %v3101_v35  ;;  %v3185_v3 = vmax.f32 %v8349_v6, %v3103_v17  ;;  %v3245_v34 = vsel %vm1771_vm3, %v3243_v59, %v3244_v42  ;;  %v8406_v43 = vld [vmem:[#allocation2 + $0x1b0] sm:$0xff]  ;;  %v8417_v17 = vld [vmem:[#allocation2 + $0x1c0] sm:$0xff] }
 0x220   : > { %v3247_v33 = vsel %vm1771_vm3, %v3244_v42, %v3246_v58  ;;  %v3389_v23 = vsel %vm1916_vm4, %v3387_v13, %v3388_v25  ;;  %v3390_v8 = vrot.slane %v8355_v0, 3  ;;  %v2199_v4 = vmax.f32 %v2055_v48, %v2128_v53  ;;  %v8393_v53 = vld [vmem:[#allocation2 + $0x158] sm:$0xff] }
 0x221   : > { %v2200_v44 = vmax.f32 %v2056_v41, %v2130_v9  ;;  %v3328_v60 = vmax.f32 %v3184_v52, %v3245_v34  ;;  %v3329_v19 = vmax.f32 %v3185_v3, %v3247_v33  ;;  %v3531_v62 = vrot.slane %v8338_v39, 4  ;;  %v8395_v9 = vld [vmem:[#allocation2 + $0x160] sm:$0xff]  ;;  %v8443_v3 = vld [vmem:[#allocation2 + $0x8] sm:$0xff] }
 0x222   : > { %v3391_v57 = vsel %vm1916_vm4, %v3388_v25, %v3390_v8  ;;  %v3532_v16 = vrot.slane %v8349_v6, 4  ;;  %v3534_v14 = vrot.slane %v8355_v0, 4  ;;  %v1283_v40 = vmax.f32 %v7993_v46, %v8126_v15  ;;  %2568 = vst [vmem:[#allocation2 + $0x16a] sm:$0xff] %v2199_v4 }
 0x223   : > { %v2250_v59 = vpack.c.bf16 %v2200_v44, %v2199_v4  ;;  %v3472_v47 = vmax.f32 %v3328_v60, %v3389_v23  ;;  %v3473_v63 = vmax.f32 %v3329_v19, %v3391_v57  ;;  %2569 = vst [vmem:[#allocation2 + $0x172] sm:$0xff] %v2200_v44  ;;  %v1284_v0 = vmax.f32 %v8011_v50, %v8128_v61 }
 0x224   : > { %v3533_v39 = vsel %vm448_vm0, %v3531_v62, %v3532_v16  ;;  %v3535_v6 = vsel %vm448_vm0, %v3532_v16, %v3534_v14  ;;  %v1378_v24 = vmax.f32 %v1282_v18, %v8199_v26  ;;  %v1379_v32 = vmax.f32 %v1283_v40, %v8206_v7 }
 0x225   : > { %6153 = vmatmul.mubr.bf16.gmra.mrb[24].mxu1 %v2250_v59  ;;  %v3616_v46 = vmax.f32 %v3472_v47, %v3533_v39  ;;  %v3617_v36 = vmax.f32 %v3473_v63, %v3535_v6  ;;  %v2895_v42 = vmax.f32 %v8307_v10, %v8389_v5  ;;  %v1380_v58 = vmax.f32 %v1284_v0, %v8208_v56 }
 0x226   : > { %v1475_v35 = vmax.f32 %v1378_v24, %v8330_v31  ;;  %v2896_v50 = vmax.f32 %v8315_v30, %v8393_v53  ;;  %v2897_v55 = vmax.f32 %v8322_v1, %v8395_v9  ;;  %v1476_v18 = vmax.f32 %v1379_v32, %v8340_v27 }
 0x227   : > { %3985 = vst [vmem:[#allocation2 + $0x10a] sm:$0xff] %v3616_v46  ;;  %3986 = vst [vmem:[#allocation2 + $0x112] sm:$0xff] %v3617_v36  ;;  %v8423_v13 = vmax.f32 %v2892_v37, %v8389_v5  ;;  %v8429_v25 = vmax.f32 %v2893_v21, %v8393_v53  ;;  %v8435_v48 = vmax.f32 %v2894_v28, %v8395_v9 }
 0x228   : > { %v1477_v41 = vmax.f32 %v1380_v58, %v8342_v45  ;;  %v1572_v52 = vmax.f32 %v1475_v35, %v8406_v43  ;;  %v1286_v37 = vmax.f32 %v8126_v15, %v8206_v7  ;;  %v1573_v22 = vmax.f32 %v1476_v18, %v8443_v3 }
 0x229   : > { %v3104_v21 = vrot.slane %v8423_v13, 1  ;;  %v3105_v49 = vrot.slane %v8429_v25, 1  ;;  %v3107_v28 = vrot.slane %v8435_v48, 1  ;;  %v3248_v18 = vrot.slane %v8423_v13, 2 }
 0x22a   : > { %v1574_v34 = vmax.f32 %v1477_v41, %v8417_v17  ;;  %v1697_v33 = vrot.slane %v1572_v52, 1  ;;  %v1842_v23 = vrot.slane %v1572_v52, 2  ;;  %v1987_v8 = vrot.slane %v1572_v52, 3 }
 0x22b   : > { %v1698_v4 = vrot.slane %v1573_v22, 1  ;;  %v1843_v51 = vrot.slane %v1573_v22, 2  ;;  %v1988_v26 = vrot.slane %v1573_v22, 3  ;;  %v2131_v44 = vrot.slane %v1572_v52, 4 }
 0x22c   : > { %v1700_v60 = vrot.slane %v1574_v34, 1  ;;  %v1845_v19 = vrot.slane %v1574_v34, 2  ;;  %v1990_v57 = vrot.slane %v1574_v34, 3  ;;  %v2132_v62 = vrot.slane %v1573_v22, 4 }
 0x22d   : > { %v1699_v16 = vsel %vm1626_vm2, %v1697_v33, %v1698_v4  ;;  %v1844_v14 = vsel %vm1771_vm3, %v1842_v23, %v1843_v51  ;;  %v1989_v59 = vsel %vm1916_vm4, %v1987_v8, %v1988_v26  ;;  %v2134_v47 = vrot.slane %v1574_v34, 4 }
 0x22e   : > { %v1701_v63 = vsel %vm1626_vm2, %v1698_v4, %v1700_v60  ;;  %v1767_v40 = vmax.f32 %v1572_v52, %v1699_v16  ;;  %v1846_v39 = vsel %vm1771_vm3, %v1843_v51, %v1845_v19  ;;  %v1991_v6 = vsel %vm1916_vm4, %v1988_v26, %v1990_v57 }
 0x22f   : > { %v1768_v0 = vmax.f32 %v1573_v22, %v1701_v63  ;;  %v2133_v24 = vsel %vm448_vm0, %v2131_v44, %v2132_v62  ;;  %v2135_v46 = vsel %vm448_vm0, %v2132_v62, %v2134_v47  ;;  %v3106_v36 = vsel %vm1626_vm2, %v3104_v21, %v3105_v49 }
 0x230   : > { %v1912_v32 = vmax.f32 %v1767_v40, %v1844_v14  ;;  %v3108_v58 = vsel %vm1626_vm2, %v3105_v49, %v3107_v28  ;;  %v3186_v35 = vmax.f32 %v8423_v13, %v3106_v36  ;;  %v3249_v34 = vrot.slane %v8429_v25, 2  ;;  %v8484_v36 = vld [vmem:[#allocation2] sm:$0xff] }
 0x231   : > { %v1913_v41 = vmax.f32 %v1768_v0, %v1846_v39  ;;  %v3187_v52 = vmax.f32 %v8429_v25, %v3108_v58  ;;  %v3251_v22 = vrot.slane %v8435_v48, 2  ;;  %v3392_v23 = vrot.slane %v8423_v13, 3  ;;  %v2944_v39 = vld [vmem:[#allocation2 + $0x170] sm:$0xff] }
 0x232   : > { %v2057_v33 = vmax.f32 %v1912_v32, %v1989_v59  ;;  %v3393_v8 = vrot.slane %v8429_v25, 3  ;;  %v3395_v21 = vrot.slane %v8435_v48, 3  ;;  %v3250_v49 = vsel %vm1771_vm3, %v3248_v18, %v3249_v34 }
 0x233   : > { %v2058_v4 = vmax.f32 %v1913_v41, %v1991_v6  ;;  %v3252_v28 = vsel %vm1771_vm3, %v3249_v34, %v3251_v22  ;;  %v3536_v51 = vrot.slane %v8423_v13, 4  ;;  %v3330_v44 = vmax.f32 %v3186_v35, %v3250_v49  ;;  %v2943_v13 = vld [vmem:[#allocation2 + $0x168] sm:$0xff]  ;;  %v2945_v6 = vld [vmem:[#allocation2 + $0x178] sm:$0xff] }
 0x234   : > { %v2201_v26 = vmax.f32 %v2057_v33, %v2133_v24  ;;  %v3331_v60 = vmax.f32 %v3187_v52, %v3252_v28  ;;  %v3394_v19 = vsel %vm1916_vm4, %v3392_v23, %v3393_v8  ;;  %v3396_v62 = vsel %vm1916_vm4, %v3393_v8, %v3395_v21  ;;  %v1529_v35 = vld [vmem:[#allocation2 + $0x1d8] sm:$0xff] }
 0x235   : > { %v2202_v57 = vmax.f32 %v2058_v4, %v2135_v46  ;;  %v3537_v16 = vrot.slane %v8429_v25, 4  ;;  %v3539_v14 = vrot.slane %v8435_v48, 4  ;;  %v3474_v59 = vmax.f32 %v3330_v44, %v3394_v19  ;;  %v1527_v48 = vld [vmem:[#allocation2 + $0x1c8] sm:$0xff] }
 0x236   : > { %v3475_v47 = vmax.f32 %v3331_v60, %v3396_v62  ;;  %v1287_v63 = vmax.f32 %v8128_v61, %v8208_v56  ;;  %v1381_v40 = vmax.f32 %v1285_v11, %v8330_v31  ;;  %2570 = vst [vmem:[#allocation2 + $0x182] sm:$0xff] %v2201_v26  ;;  %v1382_v25 = vmax.f32 %v1286_v37, %v8340_v27  ;;  %v8486_v61 = vld [vmem:[#allocation2 + $0x18] sm:$0xff] }
 0x237   : > { %v2251_v0 = vpack.c.bf16 %v2202_v57, %v2201_v26  ;;  %v3538_v24 = vsel %vm448_vm0, %v3536_v51, %v3537_v16  ;;  %v3540_v46 = vsel %vm448_vm0, %v3537_v16, %v3539_v14  ;;  %2571 = vst [vmem:[#allocation2 + $0x18a] sm:$0xff] %v2202_v57  ;;  %v8494_v15 = vmax.f32 %v2895_v42, %v2943_v13 }
 0x238   : > { %v3618_v56 = vmax.f32 %v3474_v59, %v3538_v24  ;;  %v3619_v31 = vmax.f32 %v3475_v47, %v3540_v46  ;;  %v1383_v11 = vmax.f32 %v1287_v63, %v8342_v45  ;;  %v1478_v32 = vmax.f32 %v1381_v40, %v8406_v43 }
 0x239   : > { %6156 = vmatprep.mubr.bf16.mxu1 %v2251_v0  ;;  %v1479_v58 = vmax.f32 %v1382_v25, %v8443_v3  ;;  %v8499_v7 = vmax.f32 %v2896_v50, %v2944_v39  ;;  %v8504_v27 = vmax.f32 %v2897_v55, %v2945_v6  ;;  %v4095_v10 = vmax.f32 %v8484_v36, %v8486_v61 }
 0x23a   : > { %3987 = vst [vmem:[#allocation2 + $0x122] sm:$0xff] %v3618_v56  ;;  %3988 = vst [vmem:[#allocation2 + $0x12a] sm:$0xff] %v3619_v31  ;;  %v1480_v45 = vmax.f32 %v1383_v11, %v8417_v17  ;;  %v1575_v43 = vmax.f32 %v1478_v32, %v1527_v48  ;;  %v3109_v42 = vrot.slane %v8494_v15, 1  ;;  %v3253_v59 = vrot.slane %v8494_v15, 2  ;;  %v4001_v31 = vld [vmem:[#allocation2 + $0x10] sm:$0xff]  ;;  %v8534_v11 = vld [vmem:[#allocation2 + $0x28] sm:$0xff] }
 0x23b   : > { %v1576_v5 = vmax.f32 %v1479_v58, %v8443_v3  ;;  %v3110_v30 = vrot.slane %v8499_v7, 1  ;;  %v3112_v53 = vrot.slane %v8504_v27, 1  ;;  %v3254_v40 = vrot.slane %v8499_v7, 2  ;;  %v8536_v32 = vld [vmem:[#allocation2 + $0x30] sm:$0xff] }
 0x23c   : > { %v1577_v50 = vmax.f32 %v1480_v45, %v1529_v35  ;;  %v1702_v1 = vrot.slane %v1575_v43, 1  ;;  %v1847_v9 = vrot.slane %v1575_v43, 2  ;;  %v1992_v55 = vrot.slane %v1575_v43, 3 }
 0x23d   : > { %v1703_v37 = vrot.slane %v1576_v5, 1  ;;  %v1848_v18 = vrot.slane %v1576_v5, 2  ;;  %v1993_v41 = vrot.slane %v1576_v5, 3  ;;  %v2136_v17 = vrot.slane %v1575_v43, 4 }
 0x23e   : > { %v1705_v52 = vrot.slane %v1577_v50, 1  ;;  %v1850_v34 = vrot.slane %v1577_v50, 2  ;;  %v1995_v22 = vrot.slane %v1577_v50, 3  ;;  %v2137_v33 = vrot.slane %v1576_v5, 4 }
 0x23f   : > { %v1704_v23 = vsel %vm1626_vm2, %v1702_v1, %v1703_v37  ;;  %v1849_v8 = vsel %vm1771_vm3, %v1847_v9, %v1848_v18  ;;  %v1994_v21 = vsel %vm1916_vm4, %v1992_v55, %v1993_v41  ;;  %v2139_v4 = vrot.slane %v1577_v50, 4  ;;  %v8546_v1 = vld [vmem:[#allocation2 + $0x48] sm:$0xff] }
 0x240   : > { %v1706_v49 = vsel %vm1626_vm2, %v1703_v37, %v1705_v52  ;;  %v1769_v28 = vmax.f32 %v1575_v43, %v1704_v23  ;;  %v1851_v51 = vsel %vm1771_vm3, %v1848_v18, %v1850_v34  ;;  %v1996_v26 = vsel %vm1916_vm4, %v1993_v41, %v1995_v22  ;;  %v8553_v41 = vld [vmem:[#allocation2 + $0x50] sm:$0xff]  ;;  %v8559_v34 = vld [vmem:[#allocation2 + $0x58] sm:$0xff]  ;;  %v8561_v22 = vld [vmem:[#allocation2 + $0x60] sm:$0xff] }
 0x241   : > { %v1770_v44 = vmax.f32 %v1576_v5, %v1706_v49  ;;  %v2138_v60 = vsel %vm448_vm0, %v2136_v17, %v2137_v33  ;;  %v2140_v19 = vsel %vm448_vm0, %v2137_v33, %v2139_v4  ;;  %v3111_v57 = vsel %vm1626_vm2, %v3109_v42, %v3110_v30  ;;  %v8539_v5 = vld [vmem:[#allocation2 + $0x38] sm:$0xff]  ;;  %v8572_v4 = vld [vmem:[#allocation2 + $0x70] sm:$0xff] }
 0x242   : > { %v1914_v62 = vmax.f32 %v1769_v28, %v1849_v8  ;;  %v3113_v16 = vsel %vm1626_vm2, %v3110_v30, %v3112_v53  ;;  %v3188_v14 = vmax.f32 %v8494_v15, %v3111_v57  ;;  %v3256_v13 = vrot.slane %v8504_v27, 2  ;;  %v8569_v8 = vld [vmem:[#allocation2 + $0x68] sm:$0xff]  ;;  %v6686_v49 = vld [vmem:[#allocation2 + $0x3a] sm:$0xff]  ;;  %v6688_v57 = vld [vmem:[#allocation2 + $0x52] sm:$0xff] }
 0x243   : > { %v1915_v47 = vmax.f32 %v1770_v44, %v1851_v51  ;;  %v3189_v63 = vmax.f32 %v8499_v7, %v3113_v16  ;;  %v3397_v6 = vrot.slane %v8494_v15, 3  ;;  %v3398_v0 = vrot.slane %v8499_v7, 3 }
 0x244   : > { %v2059_v39 = vmax.f32 %v1914_v62, %v1994_v21  ;;  %v3400_v24 = vrot.slane %v8504_v27, 3  ;;  %v3255_v25 = vsel %vm1771_vm3, %v3253_v59, %v3254_v40  ;;  %v3257_v48 = vsel %vm1771_vm3, %v3254_v40, %v3256_v13 }
 0x245   : > { %v2060_v46 = vmax.f32 %v1915_v47, %v1996_v26  ;;  %v3541_v56 = vrot.slane %v8494_v15, 4  ;;  %v3332_v35 = vmax.f32 %v3188_v14, %v3255_v25  ;;  %v3333_v45 = vmax.f32 %v3189_v63, %v3257_v48  ;;  %v8544_v15 = vld [vmem:[#allocation2 + $0x40] sm:$0xff] }
 0x246   : > { %v2203_v58 = vmax.f32 %v2059_v39, %v2138_v60  ;;  %v3399_v43 = vsel %vm1916_vm4, %v3397_v6, %v3398_v0  ;;  %v3401_v30 = vsel %vm1916_vm4, %v3398_v0, %v3400_v24  ;;  %v3542_v53 = vrot.slane %v8499_v7, 4 }
 0x247   : > { %v2204_v42 = vmax.f32 %v2060_v46, %v2140_v19  ;;  %v3544_v50 = vrot.slane %v8504_v27, 4  ;;  %v3476_v9 = vmax.f32 %v3332_v35, %v3399_v43  ;;  %v3477_v55 = vmax.f32 %v3333_v45, %v3401_v30  ;;  %v6687_v19 = vld [vmem:[#allocation2 + $0x4a] sm:$0xff] }
 0x248   : > { %2572 = vst [vmem:[#allocation2 + $0x19a] sm:$0xff] %v2203_v58  ;;  %v4097_v37 = vmax.f32 %v4001_v31, %v8534_v11  ;;  %v4191_v18 = vmax.f32 %v4095_v10, %v8536_v32  ;;  %v3543_v7 = vsel %vm448_vm0, %v3541_v56, %v3542_v53  ;;  %v4192_v52 = vmax.f32 %v8443_v3, %v8539_v5  ;;  %v6685_v3 = vld [vmem:[#allocation2 + $0x32] sm:$0xff] }
 0x249   : > { %v2252_v17 = vpack.c.bf16 %v2204_v42, %v2203_v58  ;;  %2573 = vst [vmem:[#allocation2 + $0x1a2] sm:$0xff] %v2204_v42  ;;  %v3545_v27 = vsel %vm448_vm0, %v3542_v53, %v3544_v50  ;;  %v8563_v33 = vmax.f32 %v3476_v9, %v3543_v7  ;;  %v3662_v28 = vpack.c.bf16 %v6686_v49, %v6685_v3  ;;  %v8596_v9 = vld [vmem:[#allocation2 + $0x78] sm:$0xff]  ;;  %v6689_v7 = vld [vmem:[%s9390_s3 + $0xc0] sm:$0xff]   ;;  %v6690_v3 = vld [vmem:[%s9390_s3 + $0xc8] sm:$0xff]  }
 0x24a   : > { %v8565_v23 = vmax.f32 %v3477_v55, %v3545_v27  ;;  %v4193_v36 = vmax.f32 %v4097_v37, %v8544_v15  ;;  %v4287_v10 = vmax.f32 %v4191_v18, %v8546_v1  ;;  %v4288_v21 = vmax.f32 %v4192_v52, %v8553_v41  ;;  %v8598_v55 = vld [vmem:[#allocation2 + $0x80] sm:$0xff] }
 0x24b   : > { %6157 = vmatmul.mubr.bf16.gmra.mrb[28].mxu1 %v2252_v17  ;;  %v4098_v51 = vmax.f32 %v8486_v61, %v8536_v32  ;;  %3989 = vst [vmem:[#allocation2 + $0x13a] sm:$0xff] %v8563_v33  ;;  %v4100_v60 = vmax.f32 %v8534_v11, %v8544_v15  ;;  %v3663_v62 = vpack.c.bf16 %v6688_v57, %v6687_v19  ;;  %v8601_v17 = vld [vmem:[#allocation2 + $0x88] sm:$0xff] }
 0x24c   : > { %3990 = vst [vmem:[#allocation2 + $0x142] sm:$0xff] %v8565_v23  ;;  %v4289_v26 = vmax.f32 %v4193_v36, %v8559_v34  ;;  %v4383_v44 = vmax.f32 %v4287_v10, %v8561_v22  ;;  %v4384_v16 = vmax.f32 %v4288_v21, %v8569_v8  ;;  %6176 = vmatprep.mubr.bf16.mxu1 %v3662_v28 }
 0x24d   : > { %v4194_v14 = vmax.f32 %v4098_v51, %v8546_v1  ;;  %v4101_v61 = vmax.f32 %v8536_v32, %v8546_v1  ;;  %v4196_v50 = vmax.f32 %v4100_v60, %v8559_v34  ;;  %v4102_v27 = vmax.f32 %v8539_v5, %v8553_v41 }
 0x24e   : > { %v4385_v59 = vmax.f32 %v4289_v26, %v8572_v4  ;;  %v4479_v47 = vrot.slane %v4383_v44, 1  ;;  %v4623_v63 = vrot.slane %v4383_v44, 2  ;;  %v4767_v40 = vrot.slane %v4383_v44, 3 }
 0x24f   : > { %v4480_v13 = vrot.slane %v4384_v16, 1  ;;  %v4624_v39 = vrot.slane %v4384_v16, 2  ;;  %v4768_v6 = vrot.slane %v4384_v16, 3  ;;  %v4911_v0 = vrot.slane %v4383_v44, 4 }
 0x250   : > { %v4482_v24 = vrot.slane %v4385_v59, 1  ;;  %v4626_v46 = vrot.slane %v4385_v59, 2  ;;  %v4770_v25 = vrot.slane %v4385_v59, 3  ;;  %v4912_v48 = vrot.slane %v4384_v16, 4 }
 0x251   : > { %v4481_v56 = vsel %vm1626_vm2, %v4479_v47, %v4480_v13  ;;  %v4625_v31 = vsel %vm1771_vm3, %v4623_v63, %v4624_v39  ;;  %v4769_v11 = vsel %vm1916_vm4, %v4767_v40, %v4768_v6  ;;  %v4914_v32 = vrot.slane %v4385_v59, 4 }
 0x252   : > { %v4483_v58 = vsel %vm1626_vm2, %v4480_v13, %v4482_v24  ;;  %v4591_v35 = vmax.f32 %v4383_v44, %v4481_v56  ;;  %v4627_v45 = vsel %vm1771_vm3, %v4624_v39, %v4626_v46  ;;  %v4771_v43 = vsel %vm1916_vm4, %v4768_v6, %v4770_v25 }
 0x253   : > { %v4592_v42 = vmax.f32 %v4384_v16, %v4483_v58  ;;  %v4913_v30 = vsel %vm448_vm0, %v4911_v0, %v4912_v48  ;;  %v4915_v53 = vsel %vm448_vm0, %v4912_v48, %v4914_v32  ;;  %6177 = vmatmul.mubr.bf16.vlgmr.msra.gmra.mrb[0].mxu1 %v3663_v62  ;;  %v4290_v18 = vmax.f32 %v4194_v14, %v8561_v22  ;;  %v8627_v48 = vld [vmem:[#allocation2 + $0x90] sm:$0xff] }
 0x254   : > { %v4735_v37 = vmax.f32 %v4591_v35, %v4625_v31  ;;  %6264 = vmatpush3.bf16.msra.mxu1 %v6689_v7  ;;  %v4292_v36 = vmax.f32 %v4196_v50, %v8572_v4  ;;  %v4103_v10 = vmax.f32 %v8544_v15, %v8559_v34  ;;  %v4197_v21 = vmax.f32 %v4101_v61, %v8561_v22 }
 0x255   : > { %v4736_v52 = vmax.f32 %v4592_v42, %v4627_v45  ;;  %6257 = vmatprep.subr.bf16.mxu1 %v6690_v3  ;;  %v4386_v28 = vmax.f32 %v4290_v18, %v8596_v9  ;;  %v4387_v51 = vmax.f32 %v4384_v16, %v8598_v55  ;;  %v4198_v5 = vmax.f32 %v4102_v27, %v8569_v8  ;;  %v6691_v16 = vld [vmem:[%s9390_s3 + $0xd0] sm:$0xff]   ;;  %v8632_v42 = vld [vmem:[#allocation2 + $0x98] sm:$0xff] }
 0x256   : > { %v4879_v49 = vmax.f32 %v4735_v37, %v4769_v11  ;;  %v4388_v44 = vmax.f32 %v4292_v36, %v8601_v17  ;;  %v4199_v60 = vmax.f32 %v4103_v10, %v8572_v4  ;;  %v4293_v15 = vmax.f32 %v4197_v21, %v8596_v9  ;;  %v6693_v10 = vld [vmem:[#allocation2 + $0x62] sm:$0xff]  ;;  %v6694_v21 = vld [vmem:[#allocation2 + $0x6a] sm:$0xff] }
 0x257   : > { %v4880_v26 = vmax.f32 %v4736_v52, %v4771_v43  ;;  %v4484_v57 = vrot.slane %v4386_v28, 1  ;;  %v4485_v62 = vrot.slane %v4387_v51, 1  ;;  %v4628_v14 = vrot.slane %v4386_v28, 2 }
 0x258   : > { %v5023_v19 = vmax.f32 %v4879_v49, %v4913_v30  ;;  %6265 = vmatpush3.bf16.msra.mxu1 %v6690_v3  ;;  %v4487_v59 = vrot.slane %v4388_v44, 1  ;;  %v4629_v47 = vrot.slane %v4387_v51, 2  ;;  %v4631_v63 = vrot.slane %v4388_v44, 2  ;;  %v8634_v30 = vld [vmem:[#allocation2 + $0xa0] sm:$0xff] }
 0x259   : > { %v5024_v61 = vmax.f32 %v4880_v26, %v4915_v53  ;;  %6258 = vmatprep.subr.bf16.mxu1 %v6691_v16  ;;  %v4486_v40 = vsel %vm1626_vm2, %v4484_v57, %v4485_v62  ;;  %v4772_v13 = vrot.slane %v4386_v28, 3  ;;  %v4773_v39 = vrot.slane %v4387_v51, 3  ;;  %v6692_v53 = vld [vmem:[%s9390_s3 + $0xd8] sm:$0xff]  }
 0x25a   : > { %v4775_v6 = vrot.slane %v4388_v44, 3  ;;  %v4488_v24 = vsel %vm1626_vm2, %v4485_v62, %v4487_v59  ;;  %v4593_v46 = vmax.f32 %v4386_v28, %v4486_v40  ;;  %v4630_v25 = vsel %vm1771_vm3, %v4628_v14, %v4629_v47 }
 0x25b   : > { %v5087_v0 = vpack.c.bf16 %v5024_v61, %v5023_v19  ;;  %v4594_v56 = vmax.f32 %v4387_v51, %v4488_v24  ;;  %v4632_v31 = vsel %vm1771_vm3, %v4629_v47, %v4631_v63  ;;  %v4774_v11 = vsel %vm1916_vm4, %v4772_v13, %v4773_v39 }
 0x25c   : > { %v4776_v32 = vsel %vm1916_vm4, %v4773_v39, %v4775_v6  ;;  %6266 = vmatpush3.bf16.msra.mxu1 %v6691_v16  ;;  %v4737_v58 = vmax.f32 %v4593_v46, %v4630_v25  ;;  %v4916_v35 = vrot.slane %v4386_v28, 4  ;;  %v4917_v45 = vrot.slane %v4387_v51, 4 }
 0x25d   : > { %6224 = vmatprep.mubr.bf16.mxu0 %v5087_v0  ;;  %v4919_v43 = vrot.slane %v4388_v44, 4  ;;  %6259 = vmatprep.subr.bf16.mxu1 %v6692_v53  ;;  %v4738_v50 = vmax.f32 %v4594_v56, %v4632_v31  ;;  %v4294_v37 = vmax.f32 %v4198_v5, %v8598_v55  ;;  %v4295_v18 = vmax.f32 %v4199_v60, %v8601_v17  ;;  %v6696_v56 = vld [vmem:[%s9390_s3 + $0xe8] sm:$0xff]  }
 0x25e   : > { %v4389_v7 = vmax.f32 %v4293_v15, %v8627_v48  ;;  %v4881_v27 = vmax.f32 %v4737_v58, %v4774_v11  ;;  %v4918_v52 = vsel %vm448_vm0, %v4916_v35, %v4917_v45  ;;  %v3664_v3 = vpack.c.bf16 %v6694_v21, %v6693_v10  ;;  %v6695_v15 = vld [vmem:[%s9390_s3 + $0xe0] sm:$0xff]   ;;  %v8671_v21 = vld [vmem:[#allocation2 + $0xa8] sm:$0xff] }
 0x25f   : > { %v4920_v36 = vsel %vm448_vm0, %v4917_v45, %v4919_v43  ;;  %v4882_v49 = vmax.f32 %v4738_v50, %v4776_v32  ;;  %v4390_v28 = vmax.f32 %v4294_v37, %v8632_v42  ;;  %v4391_v51 = vmax.f32 %v4295_v18, %v8634_v30  ;;  %v6697_v18 = vld [vmem:[#allocation2 + $0x7a] sm:$0xff] }
 0x260   : > { %v4489_v26 = vrot.slane %v4389_v7, 1  ;;  %6267 = vmatpush3.bf16.msra.mxu1 %v6692_v53  ;;  %v5025_v5 = vmax.f32 %v4881_v27, %v4918_v52  ;;  %v4633_v44 = vrot.slane %v4389_v7, 2  ;;  %v4777_v60 = vrot.slane %v4389_v7, 3  ;;  %6180 = vmatprep.mubr.bf16.mxu1 %v3664_v3 }
 0x261   : > { %v4921_v19 = vrot.slane %v4389_v7, 4  ;;  %6260 = vmatprep.subr.bf16.mxu1 %v6695_v15  ;;  %v5026_v57 = vmax.f32 %v4882_v49, %v4920_v36  ;;  %v4490_v62 = vrot.slane %v4390_v28, 1  ;;  %v4492_v14 = vrot.slane %v4391_v51, 1  ;;  %v8677_v49 = vld [vmem:[#allocation2 + $0xb0] sm:$0xff] }
 0x262   : > { %v4634_v61 = vrot.slane %v4390_v28, 2  ;;  %v4636_v59 = vrot.slane %v4391_v51, 2  ;;  %v4778_v47 = vrot.slane %v4390_v28, 3  ;;  %v4780_v63 = vrot.slane %v4391_v51, 3 }
 0x263   : > { %v4922_v16 = vrot.slane %v4390_v28, 4  ;;  %v5088_v40 = vpack.c.bf16 %v5026_v57, %v5025_v5  ;;  %v4491_v13 = vsel %vm1626_vm2, %v4489_v26, %v4490_v62  ;;  %v4493_v39 = vsel %vm1626_vm2, %v4490_v62, %v4492_v14 }
 0x264   : > { %v4635_v6 = vsel %vm1771_vm3, %v4633_v44, %v4634_v61  ;;  %6268 = vmatpush3.bf16.msra.mxu1 %v6695_v15  ;;  %v4595_v0 = vmax.f32 %v4389_v7, %v4491_v13  ;;  %v4596_v24 = vmax.f32 %v4390_v28, %v4493_v39  ;;  %v4637_v46 = vsel %vm1771_vm3, %v4634_v61, %v4636_v59  ;;  %v6698_v7 = vld [vmem:[#allocation2 + $0x82] sm:$0xff]  ;;  %v8679_v28 = vld [vmem:[#allocation2 + $0xb8] sm:$0xff] }
 0x265   : > { %v4779_v25 = vsel %vm1916_vm4, %v4777_v60, %v4778_v47  ;;  %6261 = vmatprep.subr.bf16.mxu1 %v6696_v56  ;;  %6225 = vmatmul.mubr.bf16.vlgmr.msra.gmra.mrb[64].mxu0 %v5088_v40  ;;  %v4781_v31 = vsel %vm1916_vm4, %v4778_v47, %v4780_v63  ;;  %v4923_v11 = vsel %vm448_vm0, %v4921_v19, %v4922_v16  ;;  %v4924_v32 = vrot.slane %v4391_v51, 4  ;;  %v6700_v59 = vld [vmem:[#allocation2 + $0x92] sm:$0xff]  ;;  %v6701_v47 = vld [vmem:[#allocation2 + $0x9a] sm:$0xff] }
 0x266   : > { %v4104_v58 = vmax.f32 %v8546_v1, %v8561_v22  ;;  %v4739_v35 = vmax.f32 %v4595_v0, %v4635_v6  ;;  %v4740_v45 = vmax.f32 %v4596_v24, %v4637_v46  ;;  %v4105_v43 = vmax.f32 %v8553_v41, %v8569_v8 }
 0x267   : > { %v4106_v53 = vmax.f32 %v8559_v34, %v8572_v4  ;;  %v4925_v50 = vsel %vm448_vm0, %v4922_v16, %v4924_v32  ;;  %v3665_v27 = vpack.c.bf16 %v6698_v7, %v6697_v18  ;;  %v4107_v52 = vmax.f32 %v8561_v22, %v8596_v9  ;;  %v6699_v34 = vld [vmem:[%s9390_s3 + $0xf0] sm:$0xff]   ;;  %v6702_v16 = vld [vmem:[%s9390_s3 + $0xf8] sm:$0xff]  }
 0x268   : > { %v4200_v37 = vmax.f32 %v4104_v58, %v8596_v9  ;;  %6269 = vmatpush3.bf16.msra.mxu1 %v6696_v56  ;;  %v4883_v1 = vmax.f32 %v4739_v35, %v4779_v25  ;;  %v4884_v36 = vmax.f32 %v4740_v45, %v4781_v31  ;;  %v4201_v10 = vmax.f32 %v4105_v43, %v8598_v55 }
 0x269   : > { %v4202_v41 = vmax.f32 %v4106_v53, %v8601_v17  ;;  %6262 = vmatprep.subr.bf16.mxu1 %v6699_v34  ;;  %6181 = vmatmul.mubr.bf16.gmra.mrb[4].mxu1 %v3665_v27  ;;  %v4108_v22 = vmax.f32 %v8569_v8, %v8598_v55  ;;  %v4109_v51 = vmax.f32 %v8572_v4, %v8601_v17  ;;  %v8701_v53 = vld [vmem:[#allocation2 + $0xc0] sm:$0xff]  ;;  %v8705_v27 = vld [vmem:[#allocation2 + $0xc8] sm:$0xff] }
 0x26a   : > { %v4296_v3 = vmax.f32 %v4200_v37, %v8627_v48  ;;  %v4203_v26 = vmax.f32 %v4107_v52, %v8627_v48  ;;  %v5027_v5 = vmax.f32 %v4883_v1, %v4923_v11  ;;  %v5028_v44 = vmax.f32 %v4884_v36, %v4925_v50  ;;  %v8707_v52 = vld [vmem:[#allocation2 + $0xd0] sm:$0xff] }
 0x26b   : > { %v4297_v60 = vmax.f32 %v4201_v10, %v8632_v42  ;;  %v4298_v19 = vmax.f32 %v4202_v41, %v8634_v30  ;;  %v4204_v57 = vmax.f32 %v4108_v22, %v8632_v42  ;;  %v4205_v62 = vmax.f32 %v4109_v51, %v8634_v30 }
 0x26c   : > { %v4392_v15 = vmax.f32 %v4296_v3, %v8671_v21  ;;  %v4299_v14 = vmax.f32 %v4203_v26, %v8671_v21  ;;  %6270 = vmatpush3.bf16.msra.mxu1 %v6699_v34  ;;  %v5089_v8 = vpack.c.bf16 %v5028_v44, %v5027_v5  ;;  %v3666_v63 = vpack.c.bf16 %v6701_v47, %v6700_v59 }
 0x26d   : > { %v4393_v4 = vmax.f32 %v4297_v60, %v8677_v49  ;;  %v4394_v61 = vmax.f32 %v4298_v19, %v8679_v28  ;;  %6263 = vmatprep.subr.bf16.mxu1 %v6702_v16  ;;  %v4300_v10 = vmax.f32 %v4204_v57, %v8677_v49  ;;  %v4301_v41 = vmax.f32 %v4205_v62, %v8679_v28 }
 0x26e   : > { %v4494_v40 = vrot.slane %v4392_v15, 1  ;;  %v4638_v13 = vrot.slane %v4392_v15, 2  ;;  %v4782_v39 = vrot.slane %v4392_v15, 3  ;;  %v4926_v6 = vrot.slane %v4392_v15, 4  ;;  %6228 = vmatprep.mubr.bf16.mxu0 %v5089_v8  ;;  %6184 = vmatprep.mubr.bf16.mxu1 %v3666_v63 }
 0x26f   : > { %v4495_v0 = vrot.slane %v4393_v4, 1  ;;  %v4497_v24 = vrot.slane %v4394_v61, 1  ;;  %v4639_v46 = vrot.slane %v4393_v4, 2  ;;  %v4641_v25 = vrot.slane %v4394_v61, 2 }
 0x270   : > { %v4783_v56 = vrot.slane %v4393_v4, 3  ;;  %v4785_v31 = vrot.slane %v4394_v61, 3  ;;  %v4927_v11 = vrot.slane %v4393_v4, 4  ;;  %v4929_v32 = vrot.slane %v4394_v61, 4  ;;  %6271 = vmatpush3.bf16.msra.mxu1 %v6702_v16 }
 0x271   : > { %v4496_v58 = vsel %vm1626_vm2, %v4494_v40, %v4495_v0  ;;  %v4498_v35 = vsel %vm1626_vm2, %v4495_v0, %v4497_v24  ;;  %v4640_v45 = vsel %vm1771_vm3, %v4638_v13, %v4639_v46  ;;  %v4642_v43 = vsel %vm1771_vm3, %v4639_v46, %v4641_v25 }
 0x272   : > { %v4597_v50 = vmax.f32 %v4392_v15, %v4496_v58  ;;  %v4598_v37 = vmax.f32 %v4393_v4, %v4498_v35  ;;  %v4784_v18 = vsel %vm1916_vm4, %v4782_v39, %v4783_v56  ;;  %v4786_v7 = vsel %vm1916_vm4, %v4783_v56, %v4785_v31 }
 0x273   : > { %v4928_v1 = vsel %vm448_vm0, %v4926_v6, %v4927_v11  ;;  %v4930_v36 = vsel %vm448_vm0, %v4927_v11, %v4929_v32  ;;  %v4395_v22 = vmax.f32 %v4299_v14, %v8701_v53  ;;  %v4110_v51 = vmax.f32 %v8596_v9, %v8627_v48 }
 0x274   : > { %v4741_v34 = vmax.f32 %v4597_v50, %v4640_v45  ;;  %v4742_v3 = vmax.f32 %v4598_v37, %v4642_v43  ;;  %v4396_v26 = vmax.f32 %v4300_v10, %v8705_v27  ;;  %v4397_v5 = vmax.f32 %v4301_v41, %v8707_v52  ;;  %v8733_v37 = vld [vmem:[#allocation2 + $0xd8] sm:$0xff]  ;;  %v8739_v41 = vld [vmem:[#allocation2 + $0xe8] sm:$0xff] }
 0x275   : > { %v4111_v44 = vmax.f32 %v8598_v55, %v8632_v42  ;;  %v4112_v60 = vmax.f32 %v8601_v17, %v8634_v30  ;;  %v4499_v57 = vrot.slane %v4395_v22, 1  ;;  %v4643_v62 = vrot.slane %v4395_v22, 2 }
 0x276   : > { %v4885_v19 = vmax.f32 %v4741_v34, %v4784_v18  ;;  %v4886_v15 = vmax.f32 %v4742_v3, %v4786_v7  ;;  %v4500_v8 = vrot.slane %v4396_v26, 1  ;;  %v4502_v4 = vrot.slane %v4397_v5, 1  ;;  %v8735_v18 = vld [vmem:[#allocation2 + $0xe0] sm:$0xff]  ;;  %v6703_v3 = vld [vmem:[#allocation2 + $0xaa] sm:$0xff] }
 0x277   : > { %v4644_v14 = vrot.slane %v4396_v26, 2  ;;  %v4646_v61 = vrot.slane %v4397_v5, 2  ;;  %v4787_v47 = vrot.slane %v4395_v22, 3  ;;  %v4788_v63 = vrot.slane %v4396_v26, 3 }
 0x278   : > { %v5029_v59 = vmax.f32 %v4885_v19, %v4928_v1  ;;  %v5030_v9 = vmax.f32 %v4886_v15, %v4930_v36  ;;  %v4501_v16 = vsel %vm1626_vm2, %v4499_v57, %v4500_v8  ;;  %v4503_v40 = vsel %vm1626_vm2, %v4500_v8, %v4502_v4 }
 0x279   : > { %v4645_v55 = vsel %vm1771_vm3, %v4643_v62, %v4644_v14  ;;  %v4647_v17 = vsel %vm1771_vm3, %v4644_v14, %v4646_v61  ;;  %v4599_v39 = vmax.f32 %v4395_v22, %v4501_v16  ;;  %v4600_v6 = vmax.f32 %v4396_v26, %v4503_v40 }
 0x27a   : > { %v5090_v13 = vpack.c.bf16 %v5030_v9, %v5029_v59  ;;  %v4789_v0 = vsel %vm1916_vm4, %v4787_v47, %v4788_v63  ;;  %v4790_v24 = vrot.slane %v4397_v5, 3  ;;  %v4931_v46 = vrot.slane %v4395_v22, 4  ;;  %v6704_v22 = vld [vmem:[#allocation2 + $0xb2] sm:$0xff] }
 0x27b   : > { %v4932_v25 = vrot.slane %v4396_v26, 4  ;;  %v4934_v56 = vrot.slane %v4397_v5, 4  ;;  %v4743_v31 = vmax.f32 %v4599_v39, %v4645_v55  ;;  %v4744_v11 = vmax.f32 %v4600_v6, %v4647_v17 }
 0x27c   : > { %6229 = vmatmul.mubr.bf16.gmra.mrb[68].mxu0 %v5090_v13  ;;  %v4206_v32 = vmax.f32 %v4110_v51, %v8671_v21  ;;  %v4207_v58 = vmax.f32 %v4111_v44, %v8677_v49  ;;  %v4791_v35 = vsel %vm1916_vm4, %v4788_v63, %v4790_v24  ;;  %v4208_v50 = vmax.f32 %v4112_v60, %v8679_v28 }
 0x27d   : > { %v4933_v45 = vsel %vm448_vm0, %v4931_v46, %v4932_v25  ;;  %v4935_v43 = vsel %vm448_vm0, %v4932_v25, %v4934_v56  ;;  %v4887_v7 = vmax.f32 %v4743_v31, %v4789_v0  ;;  %v4888_v1 = vmax.f32 %v4744_v11, %v4791_v35  ;;  %v8759_v56 = vld [vmem:[#allocation2 + $0xf0] sm:$0xff]  ;;  %v8763_v35 = vld [vmem:[#allocation2 + $0xf8] sm:$0xff] }
 0x27e   : > { %v4302_v36 = vmax.f32 %v4206_v32, %v8701_v53  ;;  %v4303_v10 = vmax.f32 %v4207_v58, %v8705_v27  ;;  %v4304_v34 = vmax.f32 %v4208_v50, %v8707_v52  ;;  %v3667_v51 = vpack.c.bf16 %v6704_v22, %v6703_v3 }
 0x27f   : > { %v4113_v26 = vmax.f32 %v8627_v48, %v8671_v21  ;;  %v4114_v5 = vmax.f32 %v8632_v42, %v8677_v49  ;;  %v5031_v44 = vmax.f32 %v4887_v7, %v4933_v45  ;;  %v5032_v60 = vmax.f32 %v4888_v1, %v4935_v43  ;;  %v8767_v7 = vld [vmem:[#allocation2 + $0x100] sm:$0xff] }
 0x280   : > { %v4398_v19 = vmax.f32 %v4302_v36, %v8733_v37  ;;  %v4399_v15 = vmax.f32 %v4303_v10, %v8735_v18  ;;  %v4400_v57 = vmax.f32 %v4304_v34, %v8739_v41  ;;  %6185 = vmatmul.mubr.bf16.gmra.mrb[8].mxu1 %v3667_v51  ;;  %v4115_v62 = vmax.f32 %v8634_v30, %v8679_v28  ;;  %v6705_v1 = vld [vmem:[#allocation2 + $0xc2] sm:$0xff]  ;;  %v6706_v36 = vld [vmem:[#allocation2 + $0xca] sm:$0xff] }
 0x281   : > { %v4209_v8 = vmax.f32 %v4113_v26, %v8701_v53  ;;  %v4210_v4 = vmax.f32 %v4114_v5, %v8705_v27  ;;  %v5091_v48 = vpack.c.bf16 %v5032_v60, %v5031_v44  ;;  %v3668_v10 = vpack.c.bf16 %v6706_v36, %v6705_v1 }
 0x282   : > { %v4504_v14 = vrot.slane %v4398_v19, 1  ;;  %v4505_v61 = vrot.slane %v4399_v15, 1  ;;  %v4648_v42 = vrot.slane %v4398_v19, 2  ;;  %v4507_v59 = vrot.slane %v4400_v57, 1 }
 0x283   : > { %v4649_v9 = vrot.slane %v4399_v15, 2  ;;  %v4651_v47 = vrot.slane %v4400_v57, 2  ;;  %v4792_v63 = vrot.slane %v4398_v19, 3  ;;  %6232 = vmatprep.mubr.bf16.mxu0 %v5091_v48  ;;  %v4793_v40 = vrot.slane %v4399_v15, 3  ;;  %6188 = vmatprep.mubr.bf16.mxu1 %v3668_v10 }
 0x284   : > { %v4506_v16 = vsel %vm1626_vm2, %v4504_v14, %v4505_v61  ;;  %v4795_v55 = vrot.slane %v4400_v57, 3  ;;  %v4936_v17 = vrot.slane %v4398_v19, 4  ;;  %v4508_v30 = vsel %vm1626_vm2, %v4505_v61, %v4507_v59 }
 0x285   : > { %v4601_v13 = vmax.f32 %v4398_v19, %v4506_v16  ;;  %v4650_v39 = vsel %vm1771_vm3, %v4648_v42, %v4649_v9  ;;  %v4652_v6 = vsel %vm1771_vm3, %v4649_v9, %v4651_v47  ;;  %v4602_v0 = vmax.f32 %v4399_v15, %v4508_v30 }
 0x286   : > { %v4794_v24 = vsel %vm1916_vm4, %v4792_v63, %v4793_v40  ;;  %v4796_v46 = vsel %vm1916_vm4, %v4793_v40, %v4795_v55  ;;  %v4937_v25 = vrot.slane %v4399_v15, 4  ;;  %v4939_v11 = vrot.slane %v4400_v57, 4 }
 0x287   : > { %v4745_v31 = vmax.f32 %v4601_v13, %v4650_v39  ;;  %v4211_v32 = vmax.f32 %v4115_v62, %v8707_v52  ;;  %v4305_v58 = vmax.f32 %v4209_v8, %v8733_v37  ;;  %v4746_v45 = vmax.f32 %v4602_v0, %v4652_v6 }
 0x288   : > { %v4938_v43 = vsel %vm448_vm0, %v4936_v17, %v4937_v25  ;;  %v4306_v50 = vmax.f32 %v4210_v4, %v8735_v18  ;;  %v4940_v3 = vsel %vm448_vm0, %v4937_v25, %v4939_v11  ;;  %v4116_v44 = vmax.f32 %v8671_v21, %v8701_v53 }
 0x289   : > { %v4889_v34 = vmax.f32 %v4745_v31, %v4794_v24  ;;  %v4307_v22 = vmax.f32 %v4211_v32, %v8739_v41  ;;  %v4401_v51 = vmax.f32 %v4305_v58, %v8759_v56  ;;  %v4890_v26 = vmax.f32 %v4746_v45, %v4796_v46  ;;  %v8790_v58 = vld [vmem:[#allocation2 + $0x108] sm:$0xff]  ;;  %v8792_v45 = vld [vmem:[#allocation2 + $0x110] sm:$0xff] }
 0x28a   : > { %v4402_v5 = vmax.f32 %v4306_v50, %v8763_v35  ;;  %v4117_v60 = vmax.f32 %v8677_v49, %v8705_v27  ;;  %v4118_v24 = vmax.f32 %v8679_v28, %v8707_v52  ;;  %v4212_v46 = vmax.f32 %v4116_v44, %v8733_v37  ;;  %v6708_v50 = vld [vmem:[#allocation2 + $0xe2] sm:$0xff] }
 0x28b   : > { %v5033_v19 = vmax.f32 %v4889_v34, %v4938_v43  ;;  %v4403_v15 = vmax.f32 %v4307_v22, %v8767_v7  ;;  %v4509_v57 = vrot.slane %v4401_v51, 1  ;;  %v4653_v62 = vrot.slane %v4401_v51, 2  ;;  %v6707_v43 = vld [vmem:[#allocation2 + $0xda] sm:$0xff] }
 0x28c   : > { %v5034_v8 = vmax.f32 %v4890_v26, %v4940_v3  ;;  %v4510_v4 = vrot.slane %v4402_v5, 1  ;;  %v4654_v48 = vrot.slane %v4402_v5, 2  ;;  %v4797_v14 = vrot.slane %v4401_v51, 3  ;;  %v8797_v22 = vld [vmem:[#allocation2 + $0x118] sm:$0xff] }
 0x28d   : > { %v4512_v61 = vrot.slane %v4403_v15, 1  ;;  %v4656_v42 = vrot.slane %v4403_v15, 2  ;;  %v4798_v59 = vrot.slane %v4402_v5, 3  ;;  %v4800_v9 = vrot.slane %v4403_v15, 3 }
 0x28e   : > { %v5092_v47 = vpack.c.bf16 %v5034_v8, %v5033_v19  ;;  %v4511_v63 = vsel %vm1626_vm2, %v4509_v57, %v4510_v4  ;;  %v4655_v21 = vsel %vm1771_vm3, %v4653_v62, %v4654_v48  ;;  %v4941_v16 = vrot.slane %v4401_v51, 4 }
 0x28f   : > { %v4513_v49 = vsel %vm1626_vm2, %v4510_v4, %v4512_v61  ;;  %v4603_v40 = vmax.f32 %v4401_v51, %v4511_v63  ;;  %v4657_v55 = vsel %vm1771_vm3, %v4654_v48, %v4656_v42  ;;  %v4799_v17 = vsel %vm1916_vm4, %v4797_v14, %v4798_v59 }
 0x290   : > { %6233 = vmatmul.mubr.bf16.gmra.mrb[72].mxu0 %v5092_v47  ;;  %v4604_v30 = vmax.f32 %v4402_v5, %v4513_v49  ;;  %v4801_v13 = vsel %vm1916_vm4, %v4798_v59, %v4800_v9  ;;  %v4942_v39 = vrot.slane %v4402_v5, 4  ;;  %v4944_v6 = vrot.slane %v4403_v15, 4 }
 0x291   : > { %v4747_v0 = vmax.f32 %v4603_v40, %v4655_v21  ;;  %v4213_v25 = vmax.f32 %v4117_v60, %v8735_v18  ;;  %v3669_v1 = vpack.c.bf16 %v6708_v50, %v6707_v43  ;;  %v4214_v10 = vmax.f32 %v4118_v24, %v8739_v41 }
 0x292   : > { %v4748_v31 = vmax.f32 %v4604_v30, %v4657_v55  ;;  %v4943_v11 = vsel %vm448_vm0, %v4941_v16, %v4942_v39  ;;  %v4945_v32 = vsel %vm448_vm0, %v4942_v39, %v4944_v6  ;;  %v4308_v28 = vmax.f32 %v4212_v46, %v8759_v56  ;;  %v8818_v6 = vld [vmem:[#allocation2 + $0x120] sm:$0xff] }
 0x293   : > { %v4891_v36 = vmax.f32 %v4747_v0, %v4799_v17  ;;  %v4309_v34 = vmax.f32 %v4213_v25, %v8763_v35  ;;  %6189 = vmatmul.mubr.bf16.gmra.mrb[12].mxu1 %v3669_v1  ;;  %v4119_v51 = vmax.f32 %v8701_v53, %v8733_v37  ;;  %v4120_v26 = vmax.f32 %v8705_v27, %v8735_v18  ;;  %v6709_v1 = vld [vmem:[#allocation2 + $0xf2] sm:$0xff] }
 0x294   : > { %v4892_v3 = vmax.f32 %v4748_v31, %v4801_v13  ;;  %v4121_v5 = vmax.f32 %v8707_v52, %v8739_v41  ;;  %v4310_v60 = vmax.f32 %v4214_v10, %v8767_v7  ;;  %v4404_v19 = vmax.f32 %v4308_v28, %v8790_v58  ;;  %v8821_v31 = vld [vmem:[#allocation2 + $0x128] sm:$0xff] }
 0x295   : > { %v5035_v44 = vmax.f32 %v4891_v36, %v4943_v11  ;;  %v4405_v15 = vmax.f32 %v4309_v34, %v8792_v45  ;;  %v4215_v62 = vmax.f32 %v4119_v51, %v8759_v56  ;;  %v4216_v8 = vmax.f32 %v4120_v26, %v8763_v35  ;;  %v8823_v11 = vld [vmem:[#allocation2 + $0x130] sm:$0xff]  ;;  %v6710_v36 = vld [vmem:[#allocation2 + $0xfa] sm:$0xff] }
 0x296   : > { %v5036_v57 = vmax.f32 %v4892_v3, %v4945_v32  ;;  %v4217_v53 = vmax.f32 %v4121_v5, %v8767_v7  ;;  %v4406_v4 = vmax.f32 %v4310_v60, %v8797_v22  ;;  %v4514_v27 = vrot.slane %v4404_v19, 1 }
 0x297   : > { %v4515_v48 = vrot.slane %v4405_v15, 1  ;;  %v4658_v14 = vrot.slane %v4404_v19, 2  ;;  %v4659_v61 = vrot.slane %v4405_v15, 2  ;;  %v4802_v42 = vrot.slane %v4404_v19, 3 }
 0x298   : > { %v5093_v52 = vpack.c.bf16 %v5036_v57, %v5035_v44  ;;  %v4803_v59 = vrot.slane %v4405_v15, 3  ;;  %v4517_v47 = vrot.slane %v4406_v4, 1  ;;  %v4661_v63 = vrot.slane %v4406_v4, 2 }
 0x299   : > { %v4516_v9 = vsel %vm1626_vm2, %v4514_v27, %v4515_v48  ;;  %v4805_v21 = vrot.slane %v4406_v4, 3  ;;  %v4660_v49 = vsel %vm1771_vm3, %v4658_v14, %v4659_v61  ;;  %v4946_v55 = vrot.slane %v4404_v19, 4 }
 0x29a   : > { %6236 = vmatprep.mubr.bf16.mxu0 %v5093_v52  ;;  %v4605_v16 = vmax.f32 %v4404_v19, %v4516_v9  ;;  %v4804_v40 = vsel %vm1916_vm4, %v4802_v42, %v4803_v59  ;;  %v4518_v17 = vsel %vm1626_vm2, %v4515_v48, %v4517_v47  ;;  %v4662_v30 = vsel %vm1771_vm3, %v4659_v61, %v4661_v63 }
 0x29b   : > { %v4806_v13 = vsel %vm1916_vm4, %v4803_v59, %v4805_v21  ;;  %v4947_v39 = vrot.slane %v4405_v15, 4  ;;  %v4606_v0 = vmax.f32 %v4405_v15, %v4518_v17  ;;  %v4949_v46 = vrot.slane %v4406_v4, 4 }
 0x29c   : > { %v4749_v24 = vmax.f32 %v4605_v16, %v4660_v49  ;;  %v4311_v25 = vmax.f32 %v4215_v62, %v8790_v58  ;;  %v4312_v43 = vmax.f32 %v4216_v8, %v8792_v45  ;;  %v4313_v50 = vmax.f32 %v4217_v53, %v8797_v22  ;;  %v8836_v8 = vpop.f32.mrb[32].mxu0 }
 0x29d   : > { %v4948_v32 = vsel %vm448_vm0, %v4946_v55, %v4947_v39  ;;  %v3670_v10 = vpack.c.bf16 %v6710_v36, %v6709_v1  ;;  %v4750_v28 = vmax.f32 %v4606_v0, %v4662_v30  ;;  %v4950_v3 = vsel %vm448_vm0, %v4947_v39, %v4949_v46  ;;  %v8838_v14 = vpop.f32.mrb[33].mxu0 }
 0x29e   : > { %v4893_v34 = vmax.f32 %v4749_v24, %v4804_v40  ;;  %v4407_v51 = vmax.f32 %v4311_v25, %v8818_v6  ;;  %v4408_v26 = vmax.f32 %v4312_v43, %v8821_v31  ;;  %v4409_v5 = vmax.f32 %v4313_v50, %v8823_v11 }
 0x29f   : > { %6192 = vmatprep.mubr.bf16.mxu1 %v3670_v10  ;;  %v4122_v44 = vmax.f32 %v8733_v37, %v8759_v56  ;;  %v4123_v60 = vmax.f32 %v8735_v18, %v8763_v35  ;;  %v4894_v19 = vmax.f32 %v4750_v28, %v4806_v13  ;;  %v8840_v37 = vpop.f32.mrb[34].mxu0  ;;  %v8862_v28 = vld [vmem:[#allocation2 + $0x138] sm:$0xff] }
 0x2a0   : > { %v5037_v15 = vmax.f32 %v4893_v34, %v4948_v32  ;;  %v4519_v57 = vrot.slane %v4407_v51, 1  ;;  %v4663_v62 = vrot.slane %v4407_v51, 2  ;;  %v4520_v53 = vrot.slane %v4408_v26, 1  ;;  %v8846_v21 = vpop.f32.mrb[35].mxu0  ;;  %v6711_v34 = vld [vmem:[#allocation2 + $0x10a] sm:$0xff] }
 0x2a1   : > { %v4522_v4 = vrot.slane %v4409_v5, 1  ;;  %v4664_v27 = vrot.slane %v4408_v26, 2  ;;  %v4666_v48 = vrot.slane %v4409_v5, 2  ;;  %v5038_v52 = vmax.f32 %v4894_v19, %v4950_v3  ;;  %v8849_v17 = vpop.f32.mrb[36].mxu0  ;;  %v6712_v3 = vld [vmem:[#allocation2 + $0x112] sm:$0xff] }
 0x2a2   : > { %v4807_v61 = vrot.slane %v4407_v51, 3  ;;  %v4808_v42 = vrot.slane %v4408_v26, 3  ;;  %v4810_v59 = vrot.slane %v4409_v5, 3  ;;  %v4521_v18 = vsel %vm1626_vm2, %v4519_v57, %v4520_v53  ;;  %v8852_v24 = vpop.f32.mrb[37].mxu0  ;;  %v8870_v57 = vld [vmem:[#allocation2 + $0x150] sm:$0xff] }
 0x2a3   : > { %v4523_v9 = vsel %vm1626_vm2, %v4520_v53, %v4522_v4  ;;  %v4665_v47 = vsel %vm1771_vm3, %v4663_v62, %v4664_v27  ;;  %v4667_v63 = vsel %vm1771_vm3, %v4664_v27, %v4666_v48  ;;  %v5094_v16 = vpack.c.bf16 %v5038_v52, %v5037_v15  ;;  %v8857_v50 = vpop.f32.mrb[38].mxu0  ;;  %v8868_v15 = vld [vmem:[#allocation2 + $0x140] sm:$0xff]  ;;  %v8875_v53 = vld [vmem:[#allocation2 + $0x148] sm:$0xff] }
 0x2a4   : > { %v4607_v49 = vmax.f32 %v4407_v51, %v4521_v18  ;;  %v4608_v40 = vmax.f32 %v4408_v26, %v4523_v9  ;;  %v4809_v55 = vsel %vm1916_vm4, %v4807_v61, %v4808_v42  ;;  %v4811_v30 = vsel %vm1916_vm4, %v4808_v42, %v4810_v59  ;;  %v6713_v4 = vld [vmem:[#allocation2 + $0x122] sm:$0xff]  ;;  %v6714_v27 = vld [vmem:[#allocation2 + $0x12a] sm:$0xff] }
 0x2a5   : > { %v4951_v13 = vrot.slane %v4407_v51, 4  ;;  %v4952_v39 = vrot.slane %v4408_v26, 4  ;;  %v4954_v0 = vrot.slane %v4409_v5, 4  ;;  %6237 = vmatmul.mubr.bf16.gmra.mrb[76].mxu0 %v5094_v16  ;;  %v4124_v32 = vmax.f32 %v8739_v41, %v8767_v7  ;;  %v8864_v26 = vpop.f32.mrb[39].mxu0 }
 0x2a6   : > { %v4751_v46 = vmax.f32 %v4607_v49, %v4665_v47  ;;  %v4752_v25 = vmax.f32 %v4608_v40, %v4667_v63  ;;  %v4218_v43 = vmax.f32 %v4122_v44, %v8790_v58  ;;  %v4219_v10 = vmax.f32 %v4123_v60, %v8792_v45  ;;  %v8872_v62 = vpop.f32.mrb[40].mxu0 }
 0x2a7   : > { %v4953_v1 = vsel %vm448_vm0, %v4951_v13, %v4952_v39  ;;  %v4955_v36 = vsel %vm448_vm0, %v4952_v39, %v4954_v0  ;;  %v3671_v51 = vpack.c.bf16 %v6712_v3, %v6711_v34  ;;  %v4220_v41 = vmax.f32 %v4124_v32, %v8797_v22  ;;  %v8881_v42 = vpop.f32.mrb[41].mxu0 }
 0x2a8   : > { %v4895_v5 = vmax.f32 %v4751_v46, %v4809_v55  ;;  %v4896_v19 = vmax.f32 %v4752_v25, %v4811_v30  ;;  %v4314_v44 = vmax.f32 %v4218_v43, %v8818_v6  ;;  %v4315_v60 = vmax.f32 %v4219_v10, %v8821_v31  ;;  %v8885_v63 = vpop.f32.mrb[42].mxu0  ;;  %v8900_v10 = vld [vmem:[#allocation2 + $0x158] sm:$0xff] }
 0x2a9   : > { %6193 = vmatmul.mubr.bf16.gmra.mrb[16].mxu1 %v3671_v51  ;;  %v3672_v48 = vpack.c.bf16 %v6714_v27, %v6713_v4  ;;  %v3673_v52 = vpack.c.bf16 %v8565_v23, %v8563_v33  ;;  %v2706_v61 = vmax.f32 %v8180_v54, %v8285_v12  ;;  %v4316_v9 = vmax.f32 %v4220_v41, %v8823_v11  ;;  %v8893_v23 = vpop.f32.mrb[43].mxu0  ;;  %v8907_v41 = vld [vmem:[#allocation2 + $0x160] sm:$0xff] }
 0x2aa   : > { %v5039_v59 = vmax.f32 %v4895_v5, %v4953_v1  ;;  %v5040_v18 = vmax.f32 %v4896_v19, %v4955_v36  ;;  %v4410_v47 = vmax.f32 %v4314_v44, %v8862_v28  ;;  %v4411_v16 = vmax.f32 %v4315_v60, %v8868_v15  ;;  %v8896_v39 = vpop.f32.mrb[44].mxu0  ;;  %v8909_v44 = vld [vmem:[#allocation2 + $0x168] sm:$0xff] }
 0x2ab   : > { %6196 = vmatprep.mubr.bf16.mxu1 %v3672_v48  ;;  %v2707_v49 = vmax.f32 %v8184_v29, %v8289_v38  ;;  %v2708_v33 = vmax.f32 %v8186_v2, %v8296_v20  ;;  %v2802_v54 = vmax.f32 %v2706_v61, %v8870_v57  ;;  %v4412_v55 = vmax.f32 %v4316_v9, %v8875_v53  ;;  %v8898_v43 = vpop.f32.mrb[45].mxu0 }
 0x2ac   : > { %v5095_v40 = vpack.c.bf16 %v5040_v18, %v5039_v59  ;;  %v4524_v30 = vrot.slane %v4410_v47, 1  ;;  %v4668_v13 = vrot.slane %v4410_v47, 2  ;;  %v4525_v0 = vrot.slane %v4411_v16, 1  ;;  %v8902_v34 = vpop.f32.mrb[46].mxu0  ;;  %v8916_v59 = vld [vmem:[#allocation2 + $0x170] sm:$0xff] }
 0x2ad   : > { %v4669_v46 = vrot.slane %v4411_v16, 2  ;;  %v4812_v25 = vrot.slane %v4410_v47, 3  ;;  %v4813_v32 = vrot.slane %v4411_v16, 3  ;;  %v4527_v29 = vrot.slane %v4412_v55, 1  ;;  %9397 = vst [vmem:[#allocation4_spill] sm:$0xff] %v8902_v34  ;;  %v8911_v60 = vpop.f32.mrb[47].mxu0 }
 0x2ae   : > { %6240 = vmatprep.mubr.bf16.mxu0 %v5095_v40  ;;  %v4671_v2 = vrot.slane %v4412_v55, 2  ;;  %v4815_v1 = vrot.slane %v4412_v55, 3  ;;  %v4956_v36 = vrot.slane %v4410_v47, 4  ;;  %v4526_v3 = vsel %vm1626_vm2, %v4524_v30, %v4525_v0  ;;  %9398 = vst [vmem:[#allocation5_spill] sm:$0xff] %v8911_v60  ;;  %v8918_v18 = vpop.f32.mrb[48].mxu0  ;;  %v8924_v60 = vld [vmem:[#allocation2 + $0x180] sm:$0xff] }
 0x2af   : > { %v4670_v51 = vsel %vm1771_vm3, %v4668_v13, %v4669_v46  ;;  %v4814_v5 = vsel %vm1916_vm4, %v4812_v25, %v4813_v32  ;;  %v4957_v19 = vrot.slane %v4411_v16, 4  ;;  %v4528_v4 = vsel %vm1626_vm2, %v4525_v0, %v4527_v29  ;;  %9399 = vst [vmem:[#allocation6_spill] sm:$0xff] %v8918_v18  ;;  %v8922_v25 = vld [vmem:[#allocation2 + $0x178] sm:$0xff]  ;;  %v8930_v29 = vld [vmem:[#allocation2 + $0x188] sm:$0xff] }
 0x2b0   : > { %v4609_v27 = vmax.f32 %v4410_v47, %v4526_v3  ;;  %v4672_v48 = vsel %vm1771_vm3, %v4669_v46, %v4671_v2  ;;  %v4816_v61 = vsel %vm1916_vm4, %v4813_v32, %v4815_v1  ;;  %v4610_v9 = vmax.f32 %v4411_v16, %v4528_v4  ;;  %v8926_v47 = vpop.f32.mrb[49].mxu0  ;;  %v8938_v1 = vld [vmem:[#allocation2 + $0x190] sm:$0xff] }
 0x2b1   : > { %v4958_v40 = vsel %vm448_vm0, %v4956_v36, %v4957_v19  ;;  %v4959_v30 = vrot.slane %v4412_v55, 4  ;;  %6197 = vmatmul.mubr.bf16.gmra.mrb[20].mxu1 %v3673_v52  ;;  %v2803_v13 = vmax.f32 %v2707_v49, %v8900_v10  ;;  %9400 = vst [vmem:[#allocation7_spill] sm:$0xff] %v8926_v47  ;;  %v2804_v46 = vmax.f32 %v2708_v33, %v8907_v41  ;;  %v8934_v55 = vpop.f32.mrb[50].mxu0 }
 0x2b2   : > { %v4753_v0 = vmax.f32 %v4609_v27, %v4670_v51  ;;  %v2898_v32 = vmax.f32 %v2802_v54, %v8909_v44  ;;  %v2709_v16 = vmax.f32 %v8285_v12, %v8870_v57  ;;  %9401 = vst [vmem:[#allocation8_spill] sm:$0xff] %v8934_v55  ;;  %v4754_v52 = vmax.f32 %v4610_v9, %v4672_v48  ;;  %v8942_v33 = vpop.f32.mrb[51].mxu0 }
 0x2b3   : > { %v4960_v49 = vsel %vm448_vm0, %v4957_v19, %v4959_v30  ;;  %v2899_v2 = vmax.f32 %v2803_v13, %v8916_v59  ;;  %v2710_v36 = vmax.f32 %v8289_v38, %v8900_v10  ;;  %9402 = vst [vmem:[#allocation9_spill] sm:$0xff] %v8942_v33  ;;  %v2900_v3 = vmax.f32 %v2804_v46, %v8922_v25  ;;  %v8948_v4 = vpop.f32.mrb[52].mxu0 }
 0x2b4   : > { %v4897_v54 = vmax.f32 %v4753_v0, %v4814_v5  ;;  %v2994_v51 = vmax.f32 %v2898_v32, %v8924_v60  ;;  %v2711_v12 = vmax.f32 %v8296_v20, %v8907_v41  ;;  %9403 = vst [vmem:[#allocation10_spill] sm:$0xff] %v8948_v4  ;;  %v4898_v19 = vmax.f32 %v4754_v52, %v4816_v61  ;;  %v8953_v38 = vpop.f32.mrb[53].mxu0 }
 0x2b5   : > { %v2995_v27 = vmax.f32 %v2899_v2, %v8930_v29  ;;  %v2805_v48 = vmax.f32 %v2709_v16, %v8909_v44  ;;  %v2806_v9 = vmax.f32 %v2710_v36, %v8916_v59  ;;  %9404 = vst [vmem:[#allocation11_spill] sm:$0xff] %v8953_v38  ;;  %v2996_v5 = vmax.f32 %v2900_v3, %v8938_v1  ;;  %v8956_v46 = vpop.f32.mrb[54].mxu0 }
 0x2b6   : > { %v5041_v30 = vmax.f32 %v4897_v54, %v4958_v40  ;;  %v3114_v13 = vrot.slane %v2994_v51, 1  ;;  %v3258_v0 = vrot.slane %v2994_v51, 2  ;;  %9405 = vst [vmem:[#allocation12_spill] sm:$0xff] %v8956_v46  ;;  %v5042_v32 = vmax.f32 %v4898_v19, %v4960_v49  ;;  %v8958_v61 = vpop.f32.mrb[55].mxu0 }
 0x2b7   : > { %v3115_v20 = vrot.slane %v2995_v27, 1  ;;  %v3259_v33 = vrot.slane %v2995_v27, 2  ;;  %v3402_v4 = vrot.slane %v2994_v51, 3  ;;  %9406 = vst [vmem:[#allocation13_spill] sm:$0xff] %v8958_v61  ;;  %v3117_v52 = vrot.slane %v2996_v5, 1  ;;  %v8960_v36 = vpop.f32.mrb[56].mxu0 }
 0x2b8   : > { %v3261_v2 = vrot.slane %v2996_v5, 2  ;;  %v3403_v16 = vrot.slane %v2995_v27, 3  ;;  %v3405_v55 = vrot.slane %v2996_v5, 3  ;;  %9407 = vst [vmem:[#allocation14_spill] sm:$0xff] %v8960_v36  ;;  %v5096_v38 = vpack.c.bf16 %v5042_v32, %v5041_v30  ;;  %v8964_v47 = vpop.f32.mrb[57].mxu0  ;;  %v8972_v36 = vld [vmem:[#allocation2 + $0x198] sm:$0xff] }
 0x2b9   : > { %v3116_v40 = vsel %vm1626_vm2, %v3114_v13, %v3115_v20  ;;  %v3260_v54 = vsel %vm1771_vm3, %v3258_v0, %v3259_v33  ;;  %v3546_v3 = vrot.slane %v2994_v51, 4  ;;  %9408 = vst [vmem:[#allocation15_spill] sm:$0xff] %v8964_v47  ;;  %v3118_v49 = vsel %vm1626_vm2, %v3115_v20, %v3117_v52  ;;  %v8969_v18 = vpop.f32.mrb[58].mxu0  ;;  %v8974_v0 = vld [vmem:[#allocation2 + $0x1a0] sm:$0xff] }
 0x2ba   : > { %v3190_v19 = vmax.f32 %v2994_v51, %v3116_v40  ;;  %v3262_v46 = vsel %vm1771_vm3, %v3259_v33, %v3261_v2  ;;  %v3404_v61 = vsel %vm1916_vm4, %v3402_v4, %v3403_v16  ;;  %9409 = vst [vmem:[#allocation16_spill] sm:$0xff] %v8969_v18  ;;  %6241 = vmatmul.mubr.bf16.gmra.mrb[80].mxu0 %v5096_v38  ;;  %v3547_v32 = vrot.slane %v2995_v27, 4  ;;  %v8976_v47 = vpop.f32.mrb[59].mxu0  ;;  %v9010_v18 = vld [vmem:[#allocation2 + $0x1b0] sm:$0xff] }
 0x2bb   : > { %v3191_v34 = vmax.f32 %v2995_v27, %v3118_v49  ;;  %v3406_v30 = vsel %vm1916_vm4, %v3403_v16, %v3405_v55  ;;  %v3549_v13 = vrot.slane %v2996_v5, 4  ;;  %9410 = vst [vmem:[#allocation17_spill] sm:$0xff] %v8976_v47  ;;  %v2807_v51 = vmax.f32 %v2711_v12, %v8922_v25  ;;  %v8981_v52 = vpop.f32.mrb[60].mxu0  ;;  %v8985_v5 = vld [vmem:[#allocation2 + $0x1a8] sm:$0xff] }
 0x2bc   : > { %v3334_v20 = vmax.f32 %v3190_v19, %v3260_v54  ;;  %v2901_v33 = vmax.f32 %v2805_v48, %v8924_v60  ;;  %v2902_v4 = vmax.f32 %v2806_v9, %v8930_v29  ;;  %9411 = vst [vmem:[#allocation18_spill] sm:$0xff] %v8981_v52  ;;  %v3548_v55 = vsel %vm448_vm0, %v3546_v3, %v3547_v32  ;;  %v8989_v16 = vpop.f32.mrb[61].mxu0 }
 0x2bd   : > { %v3335_v38 = vmax.f32 %v3191_v34, %v3262_v46  ;;  %v3550_v27 = vsel %vm448_vm0, %v3547_v32, %v3549_v13  ;;  %v2712_v2 = vmax.f32 %v8870_v57, %v8909_v44  ;;  %9412 = vst [vmem:[#allocation19_spill] sm:$0xff] %v8989_v16  ;;  %v2903_v12 = vmax.f32 %v2807_v51, %v8938_v1  ;;  %v8994_v54 = vpop.f32.mrb[62].mxu0 }
 0x2be   : > { %v3478_v40 = vmax.f32 %v3334_v20, %v3404_v61  ;;  %v2997_v48 = vmax.f32 %v2901_v33, %v8972_v36  ;;  %v2998_v9 = vmax.f32 %v2902_v4, %v8974_v0  ;;  %9413 = vst [vmem:[#allocation20_spill] sm:$0xff] %v8994_v54  ;;  %v2713_v46 = vmax.f32 %v8900_v10, %v8916_v59  ;;  %v9001_v49 = vpop.f32.mrb[63].mxu0 }
 0x2bf   : > { %v3479_v34 = vmax.f32 %v3335_v38, %v3406_v30  ;;  %v2714_v3 = vmax.f32 %v8907_v41, %v8922_v25  ;;  %v2808_v57 = vmax.f32 %v2712_v2, %v8924_v60  ;;  %9414 = vst [vmem:[#allocation21_spill] sm:$0xff] %v9001_v49  ;;  %v2999_v19 = vmax.f32 %v2903_v12, %v8985_v5 }
 0x2c0   : > { %v3622_v61 = vmax.f32 %v3478_v40, %v3548_v55  ;;  %v3119_v32 = vrot.slane %v2997_v48, 1  ;;  %v3120_v13 = vrot.slane %v2998_v9, 1  ;;  %v3263_v51 = vrot.slane %v2997_v48, 2 }
 0x2c1   : > { %v3623_v20 = vmax.f32 %v3479_v34, %v3550_v27  ;;  %v3264_v33 = vrot.slane %v2998_v9, 2  ;;  %v3407_v4 = vrot.slane %v2997_v48, 3  ;;  %v3122_v38 = vrot.slane %v2999_v19, 1 }
 0x2c2   : > { %v3121_v30 = vsel %vm1626_vm2, %v3119_v32, %v3120_v13  ;;  %v3266_v10 = vrot.slane %v2999_v19, 2  ;;  %v3408_v54 = vrot.slane %v2998_v9, 3  ;;  %3991 = vst [vmem:[#allocation2 + $0x152] sm:$0xff] %v3622_v61  ;;  %v3410_v49 = vrot.slane %v2999_v19, 3 }
 0x2c3   : > { %v3674_v41 = vpack.c.bf16 %v3623_v20, %v3622_v61  ;;  %v3192_v16 = vmax.f32 %v2997_v48, %v3121_v30  ;;  %v3265_v2 = vsel %vm1771_vm3, %v3263_v51, %v3264_v33  ;;  %3992 = vst [vmem:[#allocation2 + $0x15a] sm:$0xff] %v3623_v20  ;;  %v3123_v55 = vsel %vm1626_vm2, %v3120_v13, %v3122_v38 }
 0x2c4   : > { %v3267_v40 = vsel %vm1771_vm3, %v3264_v33, %v3266_v10  ;;  %v3409_v27 = vsel %vm1916_vm4, %v3407_v4, %v3408_v54  ;;  %v3551_v12 = vrot.slane %v2997_v48, 4  ;;  %v3193_v34 = vmax.f32 %v2998_v9, %v3123_v55  ;;  %v9016_v48 = vld [vmem:[#allocation2 + $0x1c0] sm:$0xff]  ;;  %v9028_v10 = vld [vmem:[#allocation2 + $0x8] sm:$0xff] }
 0x2c5   : > { %6200 = vmatprep.mubr.bf16.mxu1 %v3674_v41  ;;  %v3336_v32 = vmax.f32 %v3192_v16, %v3265_v2  ;;  %v3411_v52 = vsel %vm1916_vm4, %v3408_v54, %v3410_v49  ;;  %v3552_v47 = vrot.slane %v2998_v9, 4  ;;  %v3554_v61 = vrot.slane %v2999_v19, 4 }
 0x2c6   : > { %v2809_v51 = vmax.f32 %v2713_v46, %v8930_v29  ;;  %v2810_v20 = vmax.f32 %v2714_v3, %v8938_v1  ;;  %v2904_v13 = vmax.f32 %v2808_v57, %v8972_v36  ;;  %v3337_v30 = vmax.f32 %v3193_v34, %v3267_v40 }
 0x2c7   : > { %v3480_v33 = vmax.f32 %v3336_v32, %v3409_v27  ;;  %v3553_v4 = vsel %vm448_vm0, %v3551_v12, %v3552_v47  ;;  %v2715_v16 = vmax.f32 %v8909_v44, %v8924_v60  ;;  %v3555_v9 = vsel %vm448_vm0, %v3552_v47, %v3554_v61 }
 0x2c8   : > { %v2905_v54 = vmax.f32 %v2809_v51, %v8974_v0  ;;  %v2906_v49 = vmax.f32 %v2810_v20, %v8985_v5  ;;  %v3000_v46 = vmax.f32 %v2904_v13, %v9010_v18  ;;  %v3481_v3 = vmax.f32 %v3337_v30, %v3411_v52 }
 0x2c9   : > { %v3624_v19 = vmax.f32 %v3480_v33, %v3553_v4  ;;  %v2716_v57 = vmax.f32 %v8916_v59, %v8930_v29  ;;  %v2717_v38 = vmax.f32 %v8922_v25, %v8938_v1  ;;  %v2811_v52 = vmax.f32 %v2715_v16, %v8972_v36 }
 0x2ca   : > { %v3001_v44 = vmax.f32 %v2905_v54, %v9028_v10  ;;  %v3002_v60 = vmax.f32 %v2906_v49, %v9016_v48  ;;  %v3124_v47 = vrot.slane %v3000_v46, 1  ;;  %v3268_v41 = vrot.slane %v3000_v46, 2 }
 0x2cb   : > { %v3625_v2 = vmax.f32 %v3481_v3, %v3555_v9  ;;  %v3412_v55 = vrot.slane %v3000_v46, 3  ;;  %v3556_v40 = vrot.slane %v3000_v46, 4  ;;  %3993 = vst [vmem:[#allocation2 + $0x16a] sm:$0xff] %v3624_v19  ;;  %v2812_v54 = vmax.f32 %v2716_v57, %v8974_v0  ;;  %v9042_v3 = vld [vmem:[#allocation2 + $0x1c8] sm:$0xff] }
 0x2cc   : > { %v3125_v27 = vrot.slane %v3001_v44, 1  ;;  %v3127_v12 = vrot.slane %v3002_v60, 1  ;;  %v3269_v59 = vrot.slane %v3001_v44, 2  ;;  %v3271_v29 = vrot.slane %v3002_v60, 2 }
 0x2cd   : > { %v3675_v34 = vpack.c.bf16 %v3625_v2, %v3624_v19  ;;  %v3413_v25 = vrot.slane %v3001_v44, 3  ;;  %v3415_v1 = vrot.slane %v3002_v60, 3  ;;  %v3557_v32 = vrot.slane %v3001_v44, 4  ;;  %3994 = vst [vmem:[#allocation2 + $0x172] sm:$0xff] %v3625_v2  ;;  %v9045_v2 = vld [vmem:[#allocation2 + $0x1d8] sm:$0xff] }
 0x2ce   : > { %v3126_v61 = vsel %vm1626_vm2, %v3124_v47, %v3125_v27  ;;  %v3128_v51 = vsel %vm1626_vm2, %v3125_v27, %v3127_v12  ;;  %v3270_v20 = vsel %vm1771_vm3, %v3268_v41, %v3269_v59  ;;  %v3272_v13 = vsel %vm1771_vm3, %v3269_v59, %v3271_v29 }
 0x2cf   : > { %6201 = vmatmul.mubr.bf16.gmra.mrb[24].mxu1 %v3675_v34  ;;  %v3194_v36 = vmax.f32 %v3000_v46, %v3126_v61  ;;  %v3195_v30 = vmax.f32 %v3001_v44, %v3128_v51  ;;  %v3414_v33 = vsel %vm1916_vm4, %v3412_v55, %v3413_v25  ;;  %v3416_v4 = vsel %vm1916_vm4, %v3413_v25, %v3415_v1 }
 0x2d0   : > { %v3558_v16 = vsel %vm448_vm0, %v3556_v40, %v3557_v32  ;;  %v3559_v9 = vrot.slane %v3002_v60, 4  ;;  %v2813_v49 = vmax.f32 %v2717_v38, %v8985_v5  ;;  %v2907_v41 = vmax.f32 %v2811_v52, %v9010_v18 }
 0x2d1   : > { %v3338_v19 = vmax.f32 %v3194_v36, %v3270_v20  ;;  %v3339_v47 = vmax.f32 %v3195_v30, %v3272_v13  ;;  %v4125_v46 = vmax.f32 %v8759_v56, %v8790_v58  ;;  %v2908_v55 = vmax.f32 %v2812_v54, %v9028_v10 }
 0x2d2   : > { %v3560_v44 = vsel %vm448_vm0, %v3557_v32, %v3559_v9  ;;  %v2909_v60 = vmax.f32 %v2813_v49, %v9016_v48  ;;  %v4126_v0 = vmax.f32 %v8763_v35, %v8792_v45  ;;  %v3003_v38 = vmax.f32 %v2907_v41, %v9042_v3 }
 0x2d3   : > { %v3482_v5 = vmax.f32 %v3338_v19, %v3414_v33  ;;  %v3483_v57 = vmax.f32 %v3339_v47, %v3416_v4  ;;  %v4127_v40 = vmax.f32 %v8767_v7, %v8797_v22  ;;  %v3004_v52 = vmax.f32 %v2908_v55, %v9028_v10  ;;  %v9070_v55 = vld [vmem:[#allocation2 + $0x158] sm:$0xff] }
 0x2d4   : > { %v3005_v56 = vmax.f32 %v2909_v60, %v9045_v2  ;;  %v4221_v27 = vmax.f32 %v4125_v46, %v8818_v6  ;;  %v4222_v12 = vmax.f32 %v4126_v0, %v8821_v31  ;;  %v3129_v34 = vrot.slane %v3003_v38, 1 }
 0x2d5   : > { %v3626_v59 = vmax.f32 %v3482_v5, %v3558_v16  ;;  %v3627_v29 = vmax.f32 %v3483_v57, %v3560_v44  ;;  %v3273_v25 = vrot.slane %v3003_v38, 2  ;;  %v3130_v35 = vrot.slane %v3004_v52, 1  ;;  %v9068_v44 = vld [vmem:[#allocation2 + $0x150] sm:$0xff] }
 0x2d6   : > { %v3132_v1 = vrot.slane %v3005_v56, 1  ;;  %v3274_v32 = vrot.slane %v3004_v52, 2  ;;  %v3276_v61 = vrot.slane %v3005_v56, 2  ;;  %v3417_v20 = vrot.slane %v3003_v38, 3 }
 0x2d7   : > { %v3676_v51 = vpack.c.bf16 %v3627_v29, %v3626_v59  ;;  %v3418_v13 = vrot.slane %v3004_v52, 3  ;;  %v3420_v7 = vrot.slane %v3005_v56, 3  ;;  %3995 = vst [vmem:[#allocation2 + $0x182] sm:$0xff] %v3626_v59  ;;  %3996 = vst [vmem:[#allocation2 + $0x18a] sm:$0xff] %v3627_v29  ;;  %v3131_v36 = vsel %vm1626_vm2, %v3129_v34, %v3130_v35  ;;  %v9074_v59 = vld [vmem:[#allocation2 + $0x160] sm:$0xff] }
 0x2d8   : > { %v3133_v30 = vsel %vm1626_vm2, %v3130_v35, %v3132_v1  ;;  %v3275_v33 = vsel %vm1771_vm3, %v3273_v25, %v3274_v32  ;;  %v3277_v4 = vsel %vm1771_vm3, %v3274_v32, %v3276_v61  ;;  %v3196_v16 = vmax.f32 %v3003_v38, %v3131_v36 }
 0x2d9   : > { %6204 = vmatprep.mubr.bf16.mxu1 %v3676_v51  ;;  %v3197_v9 = vmax.f32 %v3004_v52, %v3133_v30  ;;  %v3419_v54 = vsel %vm1916_vm4, %v3417_v20, %v3418_v13  ;;  %v3421_v49 = vsel %vm1916_vm4, %v3418_v13, %v3420_v7  ;;  %v3561_v19 = vrot.slane %v3003_v38, 4 }
 0x2da   : > { %v3562_v47 = vrot.slane %v3004_v52, 4  ;;  %v3564_v41 = vrot.slane %v3005_v56, 4  ;;  %v4223_v46 = vmax.f32 %v4127_v40, %v8823_v11  ;;  %v3340_v60 = vmax.f32 %v3196_v16, %v3275_v33 }
 0x2db   : > { %v3341_v0 = vmax.f32 %v3197_v9, %v3277_v4  ;;  %v4317_v5 = vmax.f32 %v4221_v27, %v8862_v28  ;;  %v4318_v57 = vmax.f32 %v4222_v12, %v8868_v15  ;;  %v4128_v40 = vmax.f32 %v8790_v58, %v8818_v6 }
 0x2dc   : > { %v3563_v29 = vsel %vm448_vm0, %v3561_v19, %v3562_v47  ;;  %v3565_v38 = vsel %vm448_vm0, %v3562_v47, %v3564_v41  ;;  %v4319_v52 = vmax.f32 %v4223_v46, %v8875_v53  ;;  %v3484_v56 = vmax.f32 %v3340_v60, %v3419_v54 }
 0x2dd   : > { %v3485_v34 = vmax.f32 %v3341_v0, %v3421_v49  ;;  %v4413_v25 = vmax.f32 %v4317_v5, %v9068_v44  ;;  %v4414_v35 = vmax.f32 %v4318_v57, %v9070_v55  ;;  %v4129_v12 = vmax.f32 %v8792_v45, %v8821_v31 }
 0x2de   : > { %v4415_v27 = vmax.f32 %v4319_v52, %v9074_v59  ;;  %v4130_v1 = vmax.f32 %v8797_v22, %v8823_v11  ;;  %v4224_v32 = vmax.f32 %v4128_v40, %v8862_v28  ;;  %v3628_v61 = vmax.f32 %v3484_v56, %v3563_v29  ;;  %v9095_v29 = vld [vmem:[#allocation2 + $0x168] sm:$0xff] }
 0x2df   : > { %v3629_v51 = vmax.f32 %v3485_v34, %v3565_v38  ;;  %v4529_v20 = vrot.slane %v4413_v25, 1  ;;  %v4530_v58 = vrot.slane %v4414_v35, 1  ;;  %v4673_v7 = vrot.slane %v4413_v25, 2  ;;  %v9100_v34 = vld [vmem:[#allocation2 + $0x170] sm:$0xff] }
 0x2e0   : > { %v4532_v13 = vrot.slane %v4415_v27, 1  ;;  %v4674_v36 = vrot.slane %v4414_v35, 2  ;;  %v4676_v30 = vrot.slane %v4415_v27, 2  ;;  %3997 = vst [vmem:[#allocation2 + $0x19a] sm:$0xff] %v3628_v61  ;;  %v4817_v16 = vrot.slane %v4413_v25, 3 }
 0x2e1   : > { %v3677_v33 = vpack.c.bf16 %v3629_v51, %v3628_v61  ;;  %3998 = vst [vmem:[#allocation2 + $0x1a2] sm:$0xff] %v3629_v51  ;;  %v4531_v4 = vsel %vm1626_vm2, %v4529_v20, %v4530_v58  ;;  %v4818_v45 = vrot.slane %v4414_v35, 3  ;;  %v4820_v41 = vrot.slane %v4415_v27, 3 }
 0x2e2   : > { %v4533_v9 = vsel %vm1626_vm2, %v4530_v58, %v4532_v13  ;;  %v4611_v22 = vmax.f32 %v4413_v25, %v4531_v4  ;;  %v4675_v54 = vsel %vm1771_vm3, %v4673_v7, %v4674_v36  ;;  %v4677_v49 = vsel %vm1771_vm3, %v4674_v36, %v4676_v30 }
 0x2e3   : > { %6205 = vmatmul.mubr.bf16.gmra.mrb[28].mxu1 %v3677_v33  ;;  %v4612_v19 = vmax.f32 %v4414_v35, %v4533_v9  ;;  %v4819_v47 = vsel %vm1916_vm4, %v4817_v16, %v4818_v45  ;;  %v4961_v46 = vrot.slane %v4413_v25, 4  ;;  %v4962_v0 = vrot.slane %v4414_v35, 4 }
 0x2e4   : > { %v4755_v60 = vmax.f32 %v4611_v22, %v4675_v54  ;;  %v4964_v5 = vrot.slane %v4415_v27, 4  ;;  %v4225_v57 = vmax.f32 %v4129_v12, %v8868_v15  ;;  %v4821_v52 = vsel %vm1916_vm4, %v4818_v45, %v4820_v41  ;;  %v9105_v27 = vld [vmem:[#allocation2 + $0x178] sm:$0xff] }
 0x2e5   : > { %v4756_v38 = vmax.f32 %v4612_v19, %v4677_v49  ;;  %v4226_v40 = vmax.f32 %v4130_v1, %v8875_v53  ;;  %v4320_v56 = vmax.f32 %v4224_v32, %v9068_v44  ;;  %v4963_v51 = vsel %vm448_vm0, %v4961_v46, %v4962_v0 }
 0x2e6   : > { %v4899_v61 = vmax.f32 %v4755_v60, %v4819_v47  ;;  %v4965_v25 = vsel %vm448_vm0, %v4962_v0, %v4964_v5  ;;  %v4321_v35 = vmax.f32 %v4225_v57, %v9070_v55  ;;  %v4131_v1 = vmax.f32 %v8818_v6, %v8862_v28 }
 0x2e7   : > { %v4900_v12 = vmax.f32 %v4756_v38, %v4821_v52  ;;  %v4322_v20 = vmax.f32 %v4226_v40, %v9074_v59  ;;  %v4416_v58 = vmax.f32 %v4320_v56, %v9095_v29  ;;  %v4132_v7 = vmax.f32 %v8821_v31, %v8868_v15 }
 0x2e8   : > { %v5043_v32 = vmax.f32 %v4899_v61, %v4963_v51  ;;  %v4417_v13 = vmax.f32 %v4321_v35, %v9100_v34  ;;  %v4133_v36 = vmax.f32 %v8823_v11, %v8875_v53  ;;  %v4227_v56 = vmax.f32 %v4131_v1, %v9068_v44  ;;  %v9126_v35 = vld [vmem:[#allocation2 + $0x180] sm:$0xff]  ;;  %v9135_v1 = vld [vmem:[#allocation2 + $0x190] sm:$0xff] }
 0x2e9   : > { %v5044_v30 = vmax.f32 %v4900_v12, %v4965_v25  ;;  %v4418_v33 = vmax.f32 %v4322_v20, %v9105_v27  ;;  %v4534_v4 = vrot.slane %v4416_v58, 1  ;;  %v4678_v16 = vrot.slane %v4416_v58, 2 }
 0x2ea   : > { %v4535_v45 = vrot.slane %v4417_v13, 1  ;;  %v4679_v9 = vrot.slane %v4417_v13, 2  ;;  %v4822_v22 = vrot.slane %v4416_v58, 3  ;;  %v4823_v54 = vrot.slane %v4417_v13, 3 }
 0x2eb   : > { %v5097_v49 = vpack.c.bf16 %v5044_v30, %v5043_v32  ;;  %v4537_v6 = vrot.slane %v4418_v33, 1  ;;  %v4681_v19 = vrot.slane %v4418_v33, 2  ;;  %v4825_v47 = vrot.slane %v4418_v33, 3  ;;  %v9133_v30 = vld [vmem:[#allocation2 + $0x188] sm:$0xff] }
 0x2ec   : > { %v4536_v41 = vsel %vm1626_vm2, %v4534_v4, %v4535_v45  ;;  %v4680_v31 = vsel %vm1771_vm3, %v4678_v16, %v4679_v9  ;;  %v4824_v46 = vsel %vm1916_vm4, %v4822_v22, %v4823_v54  ;;  %v4966_v11 = vrot.slane %v4416_v58, 4 }
 0x2ed   : > { %6244 = vmatprep.mubr.bf16.mxu1 %v5097_v49  ;;  %v4538_v60 = vsel %vm1626_vm2, %v4535_v45, %v4537_v6  ;;  %v4613_v0 = vmax.f32 %v4416_v58, %v4536_v41  ;;  %v4682_v5 = vsel %vm1771_vm3, %v4679_v9, %v4681_v19  ;;  %v4826_v57 = vsel %vm1916_vm4, %v4823_v54, %v4825_v47 }
 0x2ee   : > { %v4614_v38 = vmax.f32 %v4417_v13, %v4538_v60  ;;  %v4967_v52 = vrot.slane %v4417_v13, 4  ;;  %v4969_v40 = vrot.slane %v4418_v33, 4  ;;  %v4228_v51 = vmax.f32 %v4132_v7, %v9070_v55 }
 0x2ef   : > { %v4757_v61 = vmax.f32 %v4613_v0, %v4680_v31  ;;  %v4229_v25 = vmax.f32 %v4133_v36, %v9074_v59  ;;  %v4134_v12 = vmax.f32 %v8862_v28, %v9068_v44  ;;  %v4323_v13 = vmax.f32 %v4227_v56, %v9095_v29 }
 0x2f0   : > { %v4758_v20 = vmax.f32 %v4614_v38, %v4682_v5  ;;  %v4968_v58 = vsel %vm448_vm0, %v4966_v11, %v4967_v52  ;;  %v4970_v32 = vsel %vm448_vm0, %v4967_v52, %v4969_v40  ;;  %v4324_v7 = vmax.f32 %v4228_v51, %v9100_v34 }
 0x2f1   : > { %v4901_v33 = vmax.f32 %v4757_v61, %v4824_v46  ;;  %v4325_v36 = vmax.f32 %v4229_v25, %v9105_v27  ;;  %v4135_v4 = vmax.f32 %v8868_v15, %v9070_v55  ;;  %v4419_v16 = vmax.f32 %v4323_v13, %v9126_v35 }
 0x2f2   : > { %v4902_v28 = vmax.f32 %v4758_v20, %v4826_v57  ;;  %v4136_v45 = vmax.f32 %v8875_v53, %v9074_v59  ;;  %v4230_v9 = vmax.f32 %v4134_v12, %v9095_v29  ;;  %v4420_v54 = vmax.f32 %v4324_v7, %v9133_v30  ;;  %v9154_v20 = vld [vmem:[#allocation2 + $0x198] sm:$0xff]  ;;  %v4375_v7 = vld [vmem:[#allocation2 + $0x1a0] sm:$0xff] }
 0x2f3   : > { %v5045_v22 = vmax.f32 %v4901_v33, %v4968_v58  ;;  %v4421_v49 = vmax.f32 %v4325_v36, %v9135_v1  ;;  %v4231_v6 = vmax.f32 %v4135_v4, %v9100_v34  ;;  %v4539_v47 = vrot.slane %v4419_v16, 1 }
 0x2f4   : > { %v5046_v19 = vmax.f32 %v4902_v28, %v4970_v32  ;;  %v4683_v41 = vrot.slane %v4419_v16, 2  ;;  %v4827_v31 = vrot.slane %v4419_v16, 3  ;;  %v4540_v15 = vrot.slane %v4420_v54, 1 }
 0x2f5   : > { %v4542_v46 = vrot.slane %v4421_v49, 1  ;;  %v4684_v11 = vrot.slane %v4420_v54, 2  ;;  %v4686_v60 = vrot.slane %v4421_v49, 2  ;;  %v4828_v5 = vrot.slane %v4420_v54, 3 }
 0x2f6   : > { %v5098_v0 = vpack.c.bf16 %v5046_v19, %v5045_v22  ;;  %v4830_v53 = vrot.slane %v4421_v49, 3  ;;  %v4971_v57 = vrot.slane %v4419_v16, 4  ;;  %v4541_v38 = vsel %vm1626_vm2, %v4539_v47, %v4540_v15  ;;  %v4376_v22 = vld [vmem:[#allocation2 + $0x1a8] sm:$0xff] }
 0x2f7   : > { %v4543_v52 = vsel %vm1626_vm2, %v4540_v15, %v4542_v46  ;;  %v4685_v40 = vsel %vm1771_vm3, %v4683_v41, %v4684_v11  ;;  %v4687_v56 = vsel %vm1771_vm3, %v4684_v11, %v4686_v60  ;;  %v4615_v61 = vmax.f32 %v4419_v16, %v4541_v38 }
 0x2f8   : > { %6245 = vmatmul.mubr.bf16.vlgmr.msra.gmra.mrb[20].mxu1 %v5098_v0  ;;  %v4616_v51 = vmax.f32 %v4420_v54, %v4543_v52  ;;  %v4829_v25 = vsel %vm1916_vm4, %v4827_v31, %v4828_v5  ;;  %v4831_v12 = vsel %vm1916_vm4, %v4828_v5, %v4830_v53  ;;  %v4972_v58 = vrot.slane %v4420_v54, 4 }
 0x2f9   : > { %v4974_v32 = vrot.slane %v4421_v49, 4  ;;  %v4232_v13 = vmax.f32 %v4136_v45, %v9105_v27  ;;  %v4326_v33 = vmax.f32 %v4230_v9, %v9126_v35  ;;  %v4759_v36 = vmax.f32 %v4615_v61, %v4685_v40 }
 0x2fa   : > { %v4760_v4 = vmax.f32 %v4616_v51, %v4687_v56  ;;  %v4327_v28 = vmax.f32 %v4231_v6, %v9133_v30  ;;  %v4137_v16 = vmax.f32 %v9068_v44, %v9095_v29  ;;  %v4973_v19 = vsel %vm448_vm0, %v4971_v57, %v4972_v58 }
 0x2fb   : > { %v4975_v47 = vsel %vm448_vm0, %v4972_v58, %v4974_v32  ;;  %v4328_v54 = vmax.f32 %v4232_v13, %v9135_v1  ;;  %v4422_v49 = vmax.f32 %v4326_v33, %v9154_v20  ;;  %v4903_v45 = vmax.f32 %v4759_v36, %v4829_v25 }
 0x2fc   : > { %v4904_v41 = vmax.f32 %v4760_v4, %v4831_v12  ;;  %v4423_v9 = vmax.f32 %v4327_v28, %v4375_v7  ;;  %v4138_v31 = vmax.f32 %v9070_v55, %v9100_v34  ;;  %v4139_v28 = vmax.f32 %v9074_v59, %v9105_v27 }
 0x2fd   : > { %v4424_v15 = vmax.f32 %v4328_v54, %v4376_v22  ;;  %v4544_v6 = vrot.slane %v4422_v49, 1  ;;  %v4688_v46 = vrot.slane %v4422_v49, 2  ;;  %v4832_v11 = vrot.slane %v4422_v49, 3 }
 0x2fe   : > { %v5047_v60 = vmax.f32 %v4903_v45, %v4973_v19  ;;  %v5048_v44 = vmax.f32 %v4904_v41, %v4975_v47  ;;  %v4545_v0 = vrot.slane %v4423_v9, 1  ;;  %v4689_v5 = vrot.slane %v4423_v9, 2 }
 0x2ff   : > { %v4547_v53 = vrot.slane %v4424_v15, 1  ;;  %v4691_v57 = vrot.slane %v4424_v15, 2  ;;  %v4833_v38 = vrot.slane %v4423_v9, 3  ;;  %v4835_v52 = vrot.slane %v4424_v15, 3 }
 0x300   : > { %v5099_v40 = vpack.c.bf16 %v5048_v44, %v5047_v60  ;;  %v4546_v56 = vsel %vm1626_vm2, %v4544_v6, %v4545_v0  ;;  %v4690_v61 = vsel %vm1771_vm3, %v4688_v46, %v4689_v5  ;;  %v4976_v51 = vrot.slane %v4422_v49, 4 }
 0x301   : > { %v4548_v55 = vsel %vm1626_vm2, %v4545_v0, %v4547_v53  ;;  %v4617_v25 = vmax.f32 %v4422_v49, %v4546_v56  ;;  %v4692_v12 = vsel %vm1771_vm3, %v4689_v5, %v4691_v57  ;;  %v4834_v58 = vsel %vm1916_vm4, %v4832_v11, %v4833_v38 }
 0x302   : > { %6248 = vmatprep.mubr.bf16.mxu1 %v5099_v40  ;;  %v4618_v32 = vmax.f32 %v4423_v9, %v4548_v55  ;;  %v4836_v13 = vsel %vm1916_vm4, %v4833_v38, %v4835_v52  ;;  %v4977_v33 = vrot.slane %v4423_v9, 4  ;;  %v4979_v36 = vrot.slane %v4424_v15, 4 }
 0x303   : > { %v4761_v4 = vmax.f32 %v4617_v25, %v4690_v61  ;;  %v4233_v19 = vmax.f32 %v4137_v16, %v9126_v35  ;;  %v4234_v47 = vmax.f32 %v4138_v31, %v9133_v30  ;;  %v4140_v41 = vmax.f32 %v9095_v29, %v9126_v35 }
 0x304   : > { %v4762_v54 = vmax.f32 %v4618_v32, %v4692_v12  ;;  %v4978_v49 = vsel %vm448_vm0, %v4976_v51, %v4977_v33  ;;  %v4980_v45 = vsel %vm448_vm0, %v4977_v33, %v4979_v36  ;;  %v4235_v9 = vmax.f32 %v4139_v28, %v9135_v1 }
 0x305   : > { %v4905_v6 = vmax.f32 %v4761_v4, %v4834_v58  ;;  %v4329_v15 = vmax.f32 %v4233_v19, %v9154_v20  ;;  %v4330_v46 = vmax.f32 %v4234_v47, %v4375_v7  ;;  %v4141_v59 = vmax.f32 %v9100_v34, %v9133_v30 }
 0x306   : > { %v4906_v11 = vmax.f32 %v4762_v54, %v4836_v13  ;;  %v4142_v16 = vmax.f32 %v9105_v27, %v9135_v1  ;;  %v4236_v31 = vmax.f32 %v4140_v41, %v9154_v20  ;;  %v4331_v44 = vmax.f32 %v4235_v9, %v4376_v22 }
 0x307   : > { %v5049_v60 = vmax.f32 %v4905_v6, %v4978_v49  ;;  %v4425_v0 = vmax.f32 %v4329_v15, %v9010_v18  ;;  %v4426_v29 = vmax.f32 %v4330_v46, %v9028_v10  ;;  %v4237_v5 = vmax.f32 %v4141_v59, %v4375_v7 }
 0x308   : > { %v5050_v35 = vmax.f32 %v4906_v11, %v4980_v45  ;;  %v4238_v53 = vmax.f32 %v4142_v16, %v4376_v22  ;;  %v4427_v57 = vmax.f32 %v4331_v44, %v9016_v48  ;;  %v4332_v51 = vmax.f32 %v4236_v31, %v9010_v18 }
 0x309   : > { %v4549_v38 = vrot.slane %v4425_v0, 1  ;;  %v4550_v52 = vrot.slane %v4426_v29, 1  ;;  %v4693_v40 = vrot.slane %v4425_v0, 2  ;;  %v4694_v30 = vrot.slane %v4426_v29, 2 }
 0x30a   : > { %v5100_v34 = vpack.c.bf16 %v5050_v35, %v5049_v60  ;;  %v4837_v56 = vrot.slane %v4425_v0, 3  ;;  %v4838_v27 = vrot.slane %v4426_v29, 3  ;;  %v4552_v20 = vrot.slane %v4427_v57, 1 }
 0x30b   : > { %v4551_v1 = vsel %vm1626_vm2, %v4549_v38, %v4550_v52  ;;  %v4696_v61 = vrot.slane %v4427_v57, 2  ;;  %v4840_v25 = vrot.slane %v4427_v57, 3  ;;  %v4695_v22 = vsel %vm1771_vm3, %v4693_v40, %v4694_v30 }
 0x30c   : > { %6249 = vmatmul.mubr.bf16.gmra.mrb[24].mxu1 %v5100_v34  ;;  %v4619_v55 = vmax.f32 %v4425_v0, %v4551_v1  ;;  %v4553_v7 = vsel %vm1626_vm2, %v4550_v52, %v4552_v20  ;;  %v4981_v12 = vrot.slane %v4425_v0, 4  ;;  %v4982_v58 = vrot.slane %v4426_v29, 4 }
 0x30d   : > { %v4620_v32 = vmax.f32 %v4426_v29, %v4553_v7  ;;  %v4839_v33 = vsel %vm1916_vm4, %v4837_v56, %v4838_v27  ;;  %v4333_v36 = vmax.f32 %v4237_v5, %v9028_v10  ;;  %v4697_v4 = vsel %vm1771_vm3, %v4694_v30, %v4696_v61 }
 0x30e   : > { %v4763_v13 = vmax.f32 %v4619_v55, %v4695_v22  ;;  %v4984_v28 = vrot.slane %v4427_v57, 4  ;;  %v4334_v18 = vmax.f32 %v4238_v53, %v9016_v48  ;;  %v4428_v19 = vmax.f32 %v4332_v51, %v9042_v3 }
 0x30f   : > { %v4764_v47 = vmax.f32 %v4620_v32, %v4697_v4  ;;  %v4841_v54 = vsel %vm1916_vm4, %v4838_v27, %v4840_v25  ;;  %v4429_v45 = vmax.f32 %v4333_v36, %v9028_v10  ;;  %v4983_v41 = vsel %vm448_vm0, %v4981_v12, %v4982_v58 }
 0x310   : > { %v4907_v49 = vmax.f32 %v4763_v13, %v4839_v33  ;;  %v4430_v6 = vmax.f32 %v4334_v18, %v9045_v2  ;;  %v4554_v9 = vrot.slane %v4428_v19, 1  ;;  %v4698_v15 = vrot.slane %v4428_v19, 2 }
 0x311   : > { %v4908_v46 = vmax.f32 %v4764_v47, %v4841_v54  ;;  %v4555_v59 = vrot.slane %v4429_v45, 1  ;;  %v4699_v16 = vrot.slane %v4429_v45, 2  ;;  %v4985_v48 = vsel %vm448_vm0, %v4982_v58, %v4984_v28 }
 0x312   : > { %v5051_v11 = vmax.f32 %v4907_v49, %v4983_v41  ;;  %v4557_v31 = vrot.slane %v4430_v6, 1  ;;  %v4701_v3 = vrot.slane %v4430_v6, 2  ;;  %v4842_v0 = vrot.slane %v4428_v19, 3 }
 0x313   : > { %v5052_v60 = vmax.f32 %v4908_v46, %v4985_v48  ;;  %v4556_v44 = vsel %vm1626_vm2, %v4554_v9, %v4555_v59  ;;  %v4843_v29 = vrot.slane %v4429_v45, 3  ;;  %v4700_v2 = vsel %vm1771_vm3, %v4698_v15, %v4699_v16 }
 0x314   : > { %v4558_v10 = vsel %vm1626_vm2, %v4555_v59, %v4557_v31  ;;  %v4621_v35 = vmax.f32 %v4428_v19, %v4556_v44  ;;  %v4845_v5 = vrot.slane %v4430_v6, 3  ;;  %v4986_v38 = vrot.slane %v4428_v19, 4  ;;  %v9220_v19 = vld [vmem:[%s9391_s4] ss:$0 sm:$0xff] }
 0x315   : > { %v5101_v53 = vpack.c.bf16 %v5052_v60, %v5051_v11  ;;  %v4622_v57 = vmax.f32 %v4429_v45, %v4558_v10  ;;  %v4987_v52 = vrot.slane %v4429_v45, 4  ;;  %v4702_v40 = vsel %vm1771_vm3, %v4699_v16, %v4701_v3 }
 0x316   : > { %v4765_v34 = vmax.f32 %v4621_v35, %v4700_v2  ;;  %v4989_v30 = vrot.slane %v4430_v6, 4  ;;  %v4844_v27 = vsel %vm1916_vm4, %v4842_v0, %v4843_v29  ;;  %v4846_v1 = vsel %vm1916_vm4, %v4843_v29, %v4845_v5 }
 0x317   : > { %6252 = vmatprep.mubr.bf16.mxu1 %v5101_v53  ;;  %v4766_v56 = vmax.f32 %v4622_v57, %v4702_v40  ;;  %v4988_v51 = vsel %vm448_vm0, %v4986_v38, %v4987_v52 }
 0x318   : > { %v4909_v20 = vmax.f32 %v4765_v34, %v4844_v27  ;;  %v4990_v55 = vsel %vm448_vm0, %v4987_v52, %v4989_v30 }
 0x319   : > { %v4910_v61 = vmax.f32 %v4766_v56, %v4846_v1 }
 0x31a   : > { %v5053_v25 = vmax.f32 %v4909_v20, %v4988_v51 }
 0x31b   : > { %v5054_v7 = vmax.f32 %v4910_v61, %v4990_v55 }
 0x31d   : > { %v5102_v22 = vpack.c.bf16 %v5054_v7, %v5053_v25 }
 0x31f   : > { %6253 = vmatmul.mubr.bf16.gmra.mrb[28].mxu1 %v5102_v22 }
 0x326   : > { %v6178_v12 = vpop.f32.mrb[0].mxu1 }
 0x327   : > { %v6272_v58 = vadd.f32 %v6178_v12, %v8836_v8  ;;  %v3776_v32 = vpop.f32.mrb[1].mxu1 }
 0x328   : > { %v6274_v13 = vadd.f32 %v3776_v32, %v8838_v14  ;;  %v6179_v33 = vpop.f32.mrb[2].mxu1 }
 0x329   : > { %v6276_v36 = vadd.f32 %v6179_v33, %v8840_v37  ;;  %v3779_v4 = vpop.f32.mrb[3].mxu1 }
 0x32a   : > { %v6278_v28 = vadd.f32 %v3779_v4, %v8846_v21 }
 0x338   : > { %v6226_v18 = vpop.f32.mrb[64].mxu0 }
 0x339   : > { %v5201_v47 = vpop.f32.mrb[65].mxu0  ;;  %v6273_v54 = vadd.f32 %v6272_v58, %v6226_v18 }
 0x33a   : > { %v6227_v49 = vpop.f32.mrb[66].mxu0  ;;  %v6275_v45 = vadd.f32 %v6274_v13, %v5201_v47 }
 0x33b   : > { %v5204_v8 = vpop.f32.mrb[67].mxu0  ;;  %v9223_v41 = vadd.f32 %v6273_v54, %v9220_v19  ;;  %v6277_v14 = vadd.f32 %v6276_v36, %v6227_v49 }
 0x33c   : > { %v9226_v37 = vadd.f32 %v6275_v45, %v9220_v19  ;;  %v6279_v6 = vadd.f32 %v6278_v28, %v5204_v8  ;;  %v6182_v21 = vpop.f32.mrb[4].mxu1 }
 0x33d   : > { %v5883_v9 = vmul.f32 -1.442695, %v9223_v41  ;;  %v9230_v15 = vadd.f32 %v6277_v14, %v9220_v19  ;;  %v6280_v46 = vadd.f32 %v6182_v21, %v8849_v17  ;;  %v3792_v11 = vpop.f32.mrb[5].mxu1 }
 0x33e   : > { %v5881_v59 = vmul.f32 -1.442695, %v9226_v37  ;;  %v9235_v16 = vadd.f32 %v6279_v6, %v9220_v19  ;;  %v6282_v48 = vadd.f32 %v3792_v11, %v8852_v24  ;;  %v6183_v31 = vpop.f32.mrb[6].mxu1 }
 0x33f   : > { %6554 = vpow2.f32 %v5883_v9  ;;  %v5884_v3 = vmul.f32 -1.442695, %v9230_v15  ;;  %v6284_v60 = vadd.f32 %v6183_v31, %v8857_v50  ;;  %v3795_v44 = vpop.f32.mrb[7].mxu1 }
 0x340   : > { %6556 = vpow2.f32 %v5881_v59  ;;  %v5882_v0 = vmul.f32 -1.442695, %v9235_v16  ;;  %v6286_v17 = vadd.f32 %v3795_v44, %v8864_v26 }
 0x341   : > { %6558 = vpow2.f32 %v5884_v3 }
 0x342   : > { %6560 = vpow2.f32 %v5882_v0 }
 0x349   : > { %v6555_v29 = vpop.eup %6554 }
 0x34a   : > { %v6557_v10 = vpop.eup %6556  ;;  %v5561_v35 = vadd.f32 1.0, %v6555_v29 }
 0x34b   : > { %v6559_v2 = vpop.eup %6558  ;;  %v5559_v5 = vadd.f32 1.0, %v6557_v10 }
 0x34c   : > { %v6561_v24 = vpop.eup %6560  ;;  %6562 = vrcp.f32 %v5561_v35  ;;  %v5562_v53 = vadd.f32 1.0, %v6559_v2 }
 0x34d   : > { %6564 = vrcp.f32 %v5559_v5  ;;  %v5560_v57 = vadd.f32 1.0, %v6561_v24 }
 0x34e   : > { %6566 = vrcp.f32 %v5562_v53 }
 0x34f   : > { %v6230_v50 = vpop.f32.mrb[68].mxu0  ;;  %6568 = vrcp.f32 %v5560_v57  ;;  %v9415_v57 = vld [vmem:[#allocation4_spill] sm:$0xff] }
 0x350   : > { %v5217_v38 = vpop.f32.mrb[69].mxu0  ;;  %v6281_v52 = vadd.f32 %v6280_v46, %v6230_v50 }
 0x351   : > { %v6231_v40 = vpop.f32.mrb[70].mxu0  ;;  %v6283_v26 = vadd.f32 %v6282_v48, %v5217_v38 }
 0x352   : > { %v5220_v34 = vpop.f32.mrb[71].mxu0  ;;  %v9243_v30 = vadd.f32 %v6281_v52, %v9220_v19  ;;  %v6285_v56 = vadd.f32 %v6284_v60, %v6231_v40  ;;  %v9416_v52 = vld [vmem:[#allocation5_spill] sm:$0xff] }
 0x353   : > { %v9246_v27 = vadd.f32 %v6283_v26, %v9220_v19  ;;  %v6287_v1 = vadd.f32 %v6286_v17, %v5220_v34  ;;  %v6186_v51 = vpop.f32.mrb[8].mxu1 }
 0x354   : > { %v5887_v20 = vmul.f32 -1.442695, %v9243_v30  ;;  %v9251_v61 = vadd.f32 %v6285_v56, %v9220_v19  ;;  %v6288_v7 = vadd.f32 %v6186_v51, %v8872_v62  ;;  %v3808_v22 = vpop.f32.mrb[9].mxu1 }
 0x355   : > { %v5885_v55 = vmul.f32 -1.442695, %v9246_v27  ;;  %v9255_v25 = vadd.f32 %v6287_v1, %v9220_v19  ;;  %v6290_v58 = vadd.f32 %v3808_v22, %v8881_v42  ;;  %v6187_v32 = vpop.f32.mrb[10].mxu1 }
 0x356   : > { %6570 = vpow2.f32 %v5887_v20  ;;  %v5888_v12 = vmul.f32 -1.442695, %v9251_v61  ;;  %v6563_v13 = vpop.eup %6562  ;;  %v6292_v62 = vadd.f32 %v6187_v32, %v8885_v63  ;;  %v3811_v36 = vpop.f32.mrb[11].mxu1 }
 0x357   : > { %6572 = vpow2.f32 %v5885_v55  ;;  %v5886_v33 = vmul.f32 -1.442695, %v9255_v25  ;;  %v6565_v4 = vpop.eup %6564  ;;  %v5657_v42 = vmul.f32 %v6563_v13, %v9223_v41  ;;  %v6294_v28 = vadd.f32 %v3811_v36, %v8893_v23 }
 0x358   : > { %6574 = vpow2.f32 %v5888_v12  ;;  %v6567_v18 = vpop.eup %6566  ;;  %v5655_v47 = vmul.f32 %v6565_v4, %v9226_v37 }
 0x359   : > { %6576 = vpow2.f32 %v5886_v33  ;;  %v6569_v54 = vpop.eup %6568  ;;  %5689 = vst [vmem:[%s9263_s22 + $0x10] sm:$0xff] %v5657_v42  ;;  %v5658_v49 = vmul.f32 %v6567_v18, %v9230_v15 }
 0x35a   : > { %5687 = vst [vmem:[%s9263_s22] sm:$0xff] %v5655_v47  ;;  %v5656_v45 = vmul.f32 %v6569_v54, %v9235_v16 }
 0x35b   : > { %5690 = vst [vmem:[%s9263_s22 + $0x18] sm:$0xff] %v5658_v49  ;;  %v9417_v49 = vld [vmem:[#allocation6_spill] sm:$0xff] }
 0x35c   : > { %5688 = vst [vmem:[%s9263_s22 + $0x8] sm:$0xff] %v5656_v45 }
 0x360   : > { %v6571_v63 = vpop.eup %6570 }
 0x361   : > { %v6573_v8 = vpop.eup %6572  ;;  %v5565_v14 = vadd.f32 1.0, %v6571_v63 }
 0x362   : > { %v6575_v41 = vpop.eup %6574  ;;  %v5563_v6 = vadd.f32 1.0, %v6573_v8 }
 0x363   : > { %v6577_v21 = vpop.eup %6576  ;;  %6578 = vrcp.f32 %v5565_v14  ;;  %v5566_v23 = vadd.f32 1.0, %v6575_v41  ;;  %v6234_v9 = vpop.f32.mrb[72].mxu0  ;;  %v9418_v41 = vld [vmem:[#allocation7_spill] sm:$0xff] }
 0x364   : > { %6580 = vrcp.f32 %v5563_v6  ;;  %v5564_v37 = vadd.f32 1.0, %v6577_v21  ;;  %v5233_v46 = vpop.f32.mrb[73].mxu0  ;;  %v6289_v11 = vadd.f32 %v6288_v7, %v6234_v9 }
 0x365   : > { %6582 = vrcp.f32 %v5566_v23  ;;  %v6235_v15 = vpop.f32.mrb[74].mxu0  ;;  %v6291_v59 = vadd.f32 %v6290_v58, %v5233_v46 }
 0x366   : > { %6584 = vrcp.f32 %v5564_v37  ;;  %v5236_v16 = vpop.f32.mrb[75].mxu0  ;;  %v9277_v48 = vadd.f32 %v6289_v11, %v9220_v19  ;;  %v6293_v31 = vadd.f32 %v6292_v62, %v6235_v15  ;;  %v6190_v44 = vpop.f32.mrb[12].mxu1  ;;  %v9419_v37 = vld [vmem:[#allocation8_spill] sm:$0xff] }
 0x367   : > { %v9280_v3 = vadd.f32 %v6291_v59, %v9220_v19  ;;  %v6295_v60 = vadd.f32 %v6294_v28, %v5236_v16  ;;  %v6296_v29 = vadd.f32 %v6190_v44, %v8896_v39  ;;  %v3824_v10 = vpop.f32.mrb[13].mxu1  ;;  %v9420_v59 = vld [vmem:[#allocation9_spill] sm:$0xff] }
 0x368   : > { %v5891_v0 = vmul.f32 -1.442695, %v9277_v48  ;;  %v9284_v17 = vadd.f32 %v6293_v31, %v9220_v19  ;;  %v6298_v5 = vadd.f32 %v3824_v10, %v8898_v43  ;;  %v6191_v24 = vpop.f32.mrb[14].mxu1 }
 0x369   : > { %v5889_v35 = vmul.f32 -1.442695, %v9280_v3  ;;  %v9289_v2 = vadd.f32 %v6295_v60, %v9220_v19  ;;  %v6300_v50 = vadd.f32 %v6191_v24, %v9415_v57  ;;  %v3827_v38 = vpop.f32.mrb[15].mxu1 }
 0x36a   : > { %6586 = vpow2.f32 %v5891_v0  ;;  %v5892_v53 = vmul.f32 -1.442695, %v9284_v17  ;;  %v6302_v40 = vadd.f32 %v3827_v38, %v9416_v52 }
 0x36b   : > { %6588 = vpow2.f32 %v5889_v35  ;;  %v5890_v39 = vmul.f32 -1.442695, %v9289_v2 }
 0x36c   : > { %6590 = vpow2.f32 %v5892_v53 }
 0x36d   : > { %v6579_v26 = vpop.eup %6578  ;;  %6592 = vpow2.f32 %v5890_v39 }
 0x36e   : > { %v6581_v43 = vpop.eup %6580  ;;  %v5661_v34 = vmul.f32 %v6579_v26, %v9243_v30 }
 0x36f   : > { %v6583_v56 = vpop.eup %6582  ;;  %v5659_v1 = vmul.f32 %v6581_v43, %v9246_v27 }
 0x370   : > { %v6585_v20 = vpop.eup %6584  ;;  %5693 = vst [vmem:[%s9263_s22 + $0x30] sm:$0xff] %v5661_v34  ;;  %v5662_v51 = vmul.f32 %v6583_v56, %v9251_v61 }
 0x371   : > { %5691 = vst [vmem:[%s9263_s22 + $0x20] sm:$0xff] %v5659_v1  ;;  %v5660_v55 = vmul.f32 %v6585_v20, %v9255_v25 }
 0x372   : > { %5694 = vst [vmem:[%s9263_s22 + $0x38] sm:$0xff] %v5662_v51 }
 0x373   : > { %5692 = vst [vmem:[%s9263_s22 + $0x28] sm:$0xff] %v5660_v55 }
 0x374   : > { %v6587_v7 = vpop.eup %6586 }
 0x375   : > { %v6589_v22 = vpop.eup %6588  ;;  %v5569_v12 = vadd.f32 1.0, %v6587_v7 }
 0x376   : > { %v6591_v58 = vpop.eup %6590  ;;  %v5567_v32 = vadd.f32 1.0, %v6589_v22 }
 0x377   : > { %v6593_v13 = vpop.eup %6592  ;;  %6594 = vrcp.f32 %v5569_v12  ;;  %v5570_v30 = vadd.f32 1.0, %v6591_v58 }
 0x378   : > { %6596 = vrcp.f32 %v5567_v32  ;;  %v5568_v33 = vadd.f32 1.0, %v6593_v13  ;;  %v6238_v27 = vpop.f32.mrb[76].mxu0 }
 0x379   : > { %6598 = vrcp.f32 %v5570_v30  ;;  %v5249_v62 = vpop.f32.mrb[77].mxu0  ;;  %v6297_v61 = vadd.f32 %v6296_v29, %v6238_v27 }
 0x37a   : > { %6600 = vrcp.f32 %v5568_v33  ;;  %v6239_v36 = vpop.f32.mrb[78].mxu0  ;;  %v6299_v4 = vadd.f32 %v6298_v5, %v5249_v62 }
 0x37b   : > { %v5252_v25 = vpop.f32.mrb[79].mxu0  ;;  %v9305_v42 = vadd.f32 %v6297_v61, %v9220_v19  ;;  %v6301_v28 = vadd.f32 %v6300_v50, %v6239_v36 }
 0x37c   : > { %v6194_v18 = vpop.f32.mrb[16].mxu1  ;;  %v9308_v47 = vadd.f32 %v6299_v4, %v9220_v19  ;;  %v6303_v54 = vadd.f32 %v6302_v40, %v5252_v25 }
 0x37d   : > { %v6304_v45 = vadd.f32 %v6194_v18, %v9417_v49  ;;  %v3840_v63 = vpop.f32.mrb[17].mxu1  ;;  %v5895_v8 = vmul.f32 -1.442695, %v9305_v42  ;;  %v9313_v14 = vadd.f32 %v6301_v28, %v9220_v19 }
 0x37e   : > { %v6306_v6 = vadd.f32 %v3840_v63, %v9418_v41  ;;  %v6195_v21 = vpop.f32.mrb[18].mxu1  ;;  %v5893_v23 = vmul.f32 -1.442695, %v9308_v47  ;;  %v9318_v9 = vadd.f32 %v6303_v54, %v9220_v19 }
 0x37f   : > { %v6308_v46 = vadd.f32 %v6195_v21, %v9419_v37  ;;  %v3843_v11 = vpop.f32.mrb[19].mxu1  ;;  %6602 = vpow2.f32 %v5895_v8  ;;  %v5896_v15 = vmul.f32 -1.442695, %v9313_v14 }
 0x380   : > { %v6310_v16 = vadd.f32 %v3843_v11, %v9420_v59  ;;  %6604 = vpow2.f32 %v5893_v23  ;;  %v5894_v60 = vmul.f32 -1.442695, %v9318_v9  ;;  %v9422_v59 = vld [vmem:[#allocation11_spill] sm:$0xff] }
 0x381   : > { %v6595_v31 = vpop.eup %6594  ;;  %6606 = vpow2.f32 %v5896_v15 }
 0x382   : > { %v6597_v44 = vpop.eup %6596  ;;  %v5665_v0 = vmul.f32 %v6595_v31, %v9277_v48  ;;  %6608 = vpow2.f32 %v5894_v60 }
 0x383   : > { %v6599_v29 = vpop.eup %6598  ;;  %v5663_v10 = vmul.f32 %v6597_v44, %v9280_v3  ;;  %v9423_v44 = vld [vmem:[#allocation12_spill] sm:$0xff] }
 0x384   : > { %v6601_v35 = vpop.eup %6600  ;;  %5697 = vst [vmem:[%s9263_s22 + $0x50] sm:$0xff] %v5665_v0  ;;  %v5666_v5 = vmul.f32 %v6599_v29, %v9284_v17 }
 0x385   : > { %5695 = vst [vmem:[%s9263_s22 + $0x40] sm:$0xff] %v5663_v10  ;;  %v5664_v24 = vmul.f32 %v6601_v35, %v9289_v2  ;;  %v9424_v35 = vld [vmem:[#allocation13_spill] sm:$0xff] }
 0x386   : > { %5698 = vst [vmem:[%s9263_s22 + $0x58] sm:$0xff] %v5666_v5 }
 0x387   : > { %5696 = vst [vmem:[%s9263_s22 + $0x48] sm:$0xff] %v5664_v24 }
 0x389   : > { %v6603_v53 = vpop.eup %6602 }
 0x38a   : > { %v6605_v57 = vpop.eup %6604  ;;  %v5573_v50 = vadd.f32 1.0, %v6603_v53 }
 0x38b   : > { %v6607_v38 = vpop.eup %6606  ;;  %v5571_v39 = vadd.f32 1.0, %v6605_v57 }
 0x38c   : > { %v6609_v48 = vpop.eup %6608  ;;  %6610 = vrcp.f32 %v5573_v50  ;;  %v5574_v52 = vadd.f32 1.0, %v6607_v38 }
 0x38d   : > { %6612 = vrcp.f32 %v5571_v39  ;;  %v6242_v3 = vpop.f32.mrb[80].mxu0  ;;  %v5572_v40 = vadd.f32 1.0, %v6609_v48 }
 0x38e   : > { %6614 = vrcp.f32 %v5574_v52  ;;  %v5265_v26 = vpop.f32.mrb[81].mxu0  ;;  %v6305_v43 = vadd.f32 %v6304_v45, %v6242_v3 }
 0x38f   : > { %6616 = vrcp.f32 %v5572_v40  ;;  %v6243_v17 = vpop.f32.mrb[82].mxu0  ;;  %v6307_v34 = vadd.f32 %v6306_v6, %v5265_v26 }
 0x390   : > { %v5268_v2 = vpop.f32.mrb[83].mxu0  ;;  %v5449_v56 = vadd.f32 %v6305_v43, %v9220_v19  ;;  %v6309_v1 = vadd.f32 %v6308_v46, %v6243_v17  ;;  %v9421_v46 = vld [vmem:[#allocation10_spill] sm:$0xff] }
 0x391   : > { %v5447_v20 = vadd.f32 %v6307_v34, %v9220_v19  ;;  %v6311_v51 = vadd.f32 %v6310_v16, %v5268_v2 }
 0x392   : > { %v5899_v55 = vmul.f32 -1.442695, %v5449_v56  ;;  %v5450_v7 = vadd.f32 %v6309_v1, %v9220_v19 }
 0x393   : > { %v5897_v22 = vmul.f32 -1.442695, %v5447_v20  ;;  %v5448_v12 = vadd.f32 %v6311_v51, %v9220_v19  ;;  %v9426_v51 = vld [vmem:[#allocation15_spill] sm:$0xff] }
 0x394   : > { %6618 = vpow2.f32 %v5899_v55  ;;  %v5900_v58 = vmul.f32 -1.442695, %v5450_v7 }
 0x395   : > { %6620 = vpow2.f32 %v5897_v22  ;;  %v5898_v32 = vmul.f32 -1.442695, %v5448_v12 }
 0x396   : > { %v6611_v13 = vpop.eup %6610  ;;  %6622 = vpow2.f32 %v5900_v58 }
 0x397   : > { %v6613_v30 = vpop.eup %6612  ;;  %v5669_v33 = vmul.f32 %v6611_v13, %v9305_v42  ;;  %6624 = vpow2.f32 %v5898_v32 }
 0x398   : > { %v6615_v27 = vpop.eup %6614  ;;  %v5667_v62 = vmul.f32 %v6613_v30, %v9308_v47  ;;  %v9428_v30 = vld [vmem:[#allocation17_spill] sm:$0xff] }
 0x399   : > { %v6617_v61 = vpop.eup %6616  ;;  %5701 = vst [vmem:[%s9263_s22 + $0x70] sm:$0xff] %v5669_v33  ;;  %v5670_v36 = vmul.f32 %v6615_v27, %v9313_v14 }
 0x39a   : > { %5699 = vst [vmem:[%s9263_s22 + $0x60] sm:$0xff] %v5667_v62  ;;  %v5668_v4 = vmul.f32 %v6617_v61, %v9318_v9 }
 0x39b   : > { %5702 = vst [vmem:[%s9263_s22 + $0x78] sm:$0xff] %v5670_v36 }
 0x39c   : > { %5700 = vst [vmem:[%s9263_s22 + $0x68] sm:$0xff] %v5668_v4 }
 0x39e   : > { %v6619_v25 = vpop.eup %6618 }
 0x39f   : > { %v6621_v28 = vpop.eup %6620  ;;  %v5577_v18 = vadd.f32 1.0, %v6619_v25 }
 0x3a0   : > { %v6623_v54 = vpop.eup %6622  ;;  %v5575_v49 = vadd.f32 1.0, %v6621_v28 }
 0x3a1   : > { %v6625_v42 = vpop.eup %6624  ;;  %6626 = vrcp.f32 %v5577_v18  ;;  %v5578_v47 = vadd.f32 1.0, %v6623_v54 }
 0x3a2   : > { %6628 = vrcp.f32 %v5575_v49  ;;  %v5576_v45 = vadd.f32 1.0, %v6625_v42 }
 0x3a3   : > { %6630 = vrcp.f32 %v5578_v47 }
 0x3a4   : > { %6632 = vrcp.f32 %v5576_v45 }
 0x3ab   : > { %v6627_v63 = vpop.eup %6626 }
 0x3ac   : > { %v6629_v8 = vpop.eup %6628  ;;  %v5673_v14 = vmul.f32 %v6627_v63, %v5449_v56  ;;  %v9425_v56 = vld [vmem:[#allocation14_spill] sm:$0xff] }
 0x3ad   : > { %v6631_v41 = vpop.eup %6630  ;;  %v5671_v6 = vmul.f32 %v6629_v8, %v5447_v20 }
 0x3ae   : > { %v6633_v21 = vpop.eup %6632  ;;  %5705 = vst [vmem:[%s9263_s22 + $0x90] sm:$0xff] %v5673_v14  ;;  %v5674_v23 = vmul.f32 %v6631_v41, %v5450_v7 }
 0x3af   : > { %5703 = vst [vmem:[%s9263_s22 + $0x80] sm:$0xff] %v5671_v6  ;;  %v5672_v9 = vmul.f32 %v6633_v21, %v5448_v12  ;;  %v9427_v12 = vld [vmem:[#allocation16_spill] sm:$0xff] }
 0x3b0   : > { %5706 = vst [vmem:[%s9263_s22 + $0x98] sm:$0xff] %v5674_v23 }
 0x3b1   : > { %5704 = vst [vmem:[%s9263_s22 + $0x88] sm:$0xff] %v5672_v9 }
 0x3cb   : > { %v6246_v37 = vpop.f32.mrb[20].mxu1 }
 0x3cc   : > { %v6312_v11 = vadd.f32 %v6246_v37, %v9421_v46  ;;  %v5281_v15 = vpop.f32.mrb[21].mxu1 }
 0x3cd   : > { %v6313_v16 = vadd.f32 %v5281_v15, %v9422_v59  ;;  %v6247_v31 = vpop.f32.mrb[22].mxu1 }
 0x3ce   : > { %v5453_v60 = vadd.f32 %v6312_v11, %v9220_v19  ;;  %v6314_v0 = vadd.f32 %v6247_v31, %v9423_v44  ;;  %v5284_v29 = vpop.f32.mrb[23].mxu1  ;;  %v9429_v11 = vld [vmem:[#allocation18_spill] sm:$0xff] }
 0x3cf   : > { %v5451_v10 = vadd.f32 %v6313_v16, %v9220_v19  ;;  %v6315_v5 = vadd.f32 %v5284_v29, %v9424_v35  ;;  %v9430_v16 = vld [vmem:[#allocation19_spill] sm:$0xff] }
 0x3d0   : > { %v5903_v24 = vmul.f32 -1.442695, %v5453_v60  ;;  %v5454_v53 = vadd.f32 %v6314_v0, %v9220_v19  ;;  %v9431_v0 = vld [vmem:[#allocation20_spill] sm:$0xff] }
 0x3d1   : > { %v5901_v57 = vmul.f32 -1.442695, %v5451_v10  ;;  %v5452_v50 = vadd.f32 %v6315_v5, %v9220_v19  ;;  %v9432_v5 = vld [vmem:[#allocation21_spill] sm:$0xff] }
 0x3d2   : > { %6634 = vpow2.f32 %v5903_v24  ;;  %v5904_v38 = vmul.f32 -1.442695, %v5454_v53 }
 0x3d3   : > { %6636 = vpow2.f32 %v5901_v57  ;;  %v5902_v39 = vmul.f32 -1.442695, %v5452_v50 }
 0x3d4   : > { %6638 = vpow2.f32 %v5904_v38 }
 0x3d5   : > { %6640 = vpow2.f32 %v5902_v39 }
 0x3dc   : > { %v6635_v48 = vpop.eup %6634 }
 0x3dd   : > { %v6637_v52 = vpop.eup %6636  ;;  %v5581_v3 = vadd.f32 1.0, %v6635_v48 }
 0x3de   : > { %v6639_v40 = vpop.eup %6638  ;;  %v5579_v26 = vadd.f32 1.0, %v6637_v52 }
 0x3df   : > { %v6641_v43 = vpop.eup %6640  ;;  %6642 = vrcp.f32 %v5581_v3  ;;  %v5582_v17 = vadd.f32 1.0, %v6639_v40  ;;  %v6250_v34 = vpop.f32.mrb[24].mxu1 }
 0x3e0   : > { %6644 = vrcp.f32 %v5579_v26  ;;  %v5580_v2 = vadd.f32 1.0, %v6641_v43  ;;  %v6316_v1 = vadd.f32 %v6250_v34, %v9425_v56  ;;  %v5297_v20 = vpop.f32.mrb[25].mxu1 }
 0x3e1   : > { %6646 = vrcp.f32 %v5582_v17  ;;  %v6317_v55 = vadd.f32 %v5297_v20, %v9426_v51  ;;  %v6251_v7 = vpop.f32.mrb[26].mxu1 }
 0x3e2   : > { %6648 = vrcp.f32 %v5580_v2  ;;  %v5457_v22 = vadd.f32 %v6316_v1, %v9220_v19  ;;  %v6318_v58 = vadd.f32 %v6251_v7, %v9427_v12  ;;  %v5300_v32 = vpop.f32.mrb[27].mxu1 }
 0x3e3   : > { %v5455_v13 = vadd.f32 %v6317_v55, %v9220_v19  ;;  %v6319_v33 = vadd.f32 %v5300_v32, %v9428_v30 }
 0x3e4   : > { %v5907_v27 = vmul.f32 -1.442695, %v5457_v22  ;;  %v5458_v62 = vadd.f32 %v6318_v58, %v9220_v19 }
 0x3e5   : > { %v5905_v61 = vmul.f32 -1.442695, %v5455_v13  ;;  %v5456_v36 = vadd.f32 %v6319_v33, %v9220_v19 }
 0x3e6   : > { %6650 = vpow2.f32 %v5907_v27  ;;  %v5908_v4 = vmul.f32 -1.442695, %v5458_v62 }
 0x3e7   : > { %6652 = vpow2.f32 %v5905_v61  ;;  %v5906_v25 = vmul.f32 -1.442695, %v5456_v36 }
 0x3e8   : > { %6654 = vpow2.f32 %v5908_v4 }
 0x3e9   : > { %v6643_v28 = vpop.eup %6642  ;;  %6656 = vpow2.f32 %v5906_v25 }
 0x3ea   : > { %v6645_v18 = vpop.eup %6644  ;;  %v5677_v54 = vmul.f32 %v6643_v28, %v5453_v60 }
 0x3eb   : > { %v6647_v49 = vpop.eup %6646  ;;  %v5675_v42 = vmul.f32 %v6645_v18, %v5451_v10 }
 0x3ec   : > { %v6649_v47 = vpop.eup %6648  ;;  %5709 = vst [vmem:[%s9263_s22 + $0xb0] sm:$0xff] %v5677_v54  ;;  %v5678_v45 = vmul.f32 %v6647_v49, %v5454_v53 }
 0x3ed   : > { %5707 = vst [vmem:[%s9263_s22 + $0xa0] sm:$0xff] %v5675_v42  ;;  %v5676_v63 = vmul.f32 %v6649_v47, %v5452_v50 }
 0x3ee   : > { %5710 = vst [vmem:[%s9263_s22 + $0xb8] sm:$0xff] %v5678_v45 }
 0x3ef   : > { %5708 = vst [vmem:[%s9263_s22 + $0xa8] sm:$0xff] %v5676_v63 }
 0x3f0   : > { %v6651_v8 = vpop.eup %6650 }
 0x3f1   : > { %v6653_v14 = vpop.eup %6652  ;;  %v5585_v41 = vadd.f32 1.0, %v6651_v8 }
 0x3f2   : > { %v6655_v6 = vpop.eup %6654  ;;  %v5583_v21 = vadd.f32 1.0, %v6653_v14  ;;  %v6254_v37 = vpop.f32.mrb[28].mxu1 }
 0x3f3   : > { %v6657_v23 = vpop.eup %6656  ;;  %6658 = vrcp.f32 %v5585_v41  ;;  %v5586_v9 = vadd.f32 1.0, %v6655_v6  ;;  %v6320_v15 = vadd.f32 %v6254_v37, %v9429_v11  ;;  %v5313_v59 = vpop.f32.mrb[29].mxu1 }
 0x3f4   : > { %6660 = vrcp.f32 %v5583_v21  ;;  %v5584_v46 = vadd.f32 1.0, %v6657_v23  ;;  %v6321_v31 = vadd.f32 %v5313_v59, %v9430_v16  ;;  %v6255_v60 = vpop.f32.mrb[30].mxu1 }
 0x3f5   : > { %6662 = vrcp.f32 %v5586_v9  ;;  %v5461_v44 = vadd.f32 %v6320_v15, %v9220_v19  ;;  %v6322_v29 = vadd.f32 %v6255_v60, %v9431_v0  ;;  %v5316_v10 = vpop.f32.mrb[31].mxu1 }
 0x3f6   : > { %6664 = vrcp.f32 %v5584_v46  ;;  %v5459_v35 = vadd.f32 %v6321_v31, %v9220_v19  ;;  %v6323_v24 = vadd.f32 %v5316_v10, %v9432_v5 }
 0x3f7   : > { %v5911_v53 = vmul.f32 -1.442695, %v5461_v44  ;;  %v5462_v57 = vadd.f32 %v6322_v29, %v9220_v19 }
 0x3f8   : > { %v5909_v50 = vmul.f32 -1.442695, %v5459_v35  ;;  %v5460_v38 = vadd.f32 %v6323_v24, %v9220_v19 }
 0x3f9   : > { %6666 = vpow2.f32 %v5911_v53  ;;  %v5912_v39 = vmul.f32 -1.442695, %v5462_v57 }
 0x3fa   : > { %6668 = vpow2.f32 %v5909_v50  ;;  %v5910_v48 = vmul.f32 -1.442695, %v5460_v38 }
 0x3fb   : > { %6670 = vpow2.f32 %v5912_v39 }
 0x3fc   : > { %6672 = vpow2.f32 %v5910_v48 }
 0x3fd   : > { %v6659_v52 = vpop.eup %6658 }
 0x3fe   : > { %v6661_v3 = vpop.eup %6660  ;;  %v5681_v40 = vmul.f32 %v6659_v52, %v5457_v22 }
 0x3ff   : > { %v6663_v26 = vpop.eup %6662  ;;  %v5679_v43 = vmul.f32 %v6661_v3, %v5455_v13 }
 0x400   : > { %v6665_v17 = vpop.eup %6664  ;;  %5713 = vst [vmem:[%s9263_s22 + $0xd0] sm:$0xff] %v5681_v40  ;;  %v5682_v34 = vmul.f32 %v6663_v26, %v5458_v62 }
 0x401   : > { %5711 = vst [vmem:[%s9263_s22 + $0xc0] sm:$0xff] %v5679_v43  ;;  %v5680_v2 = vmul.f32 %v6665_v17, %v5456_v36 }
 0x402   : > { %5714 = vst [vmem:[%s9263_s22 + $0xd8] sm:$0xff] %v5682_v34 }
 0x403   : > { %5712 = vst [vmem:[%s9263_s22 + $0xc8] sm:$0xff] %v5680_v2  ;;  %v6667_v19 = vpop.eup %6666 }
 0x404   : > { %v6669_v56 = vpop.eup %6668  ;;  %v5589_v1 = vadd.f32 1.0, %v6667_v19 }
 0x405   : > { %v6671_v20 = vpop.eup %6670  ;;  %v5587_v51 = vadd.f32 1.0, %v6669_v56 }
 0x406   : > { %v6673_v55 = vpop.eup %6672  ;;  %6674 = vrcp.f32 %v5589_v1  ;;  %v5590_v7 = vadd.f32 1.0, %v6671_v20 }
 0x407   : > { %6676 = vrcp.f32 %v5587_v51  ;;  %v5588_v22 = vadd.f32 1.0, %v6673_v55 }
 0x408   : > { %6678 = vrcp.f32 %v5590_v7 }
 0x409   : > { %6680 = vrcp.f32 %v5588_v22 }
 0x410   : > { %v6675_v12 = vpop.eup %6674 }
 0x411   : > { %v6677_v58 = vpop.eup %6676  ;;  %v5685_v32 = vmul.f32 %v6675_v12, %v5461_v44 }
 0x412   : > { %v6679_v13 = vpop.eup %6678  ;;  %v5683_v30 = vmul.f32 %v6677_v58, %v5459_v35 }
 0x413   : > { %v6681_v33 = vpop.eup %6680  ;;  %5717 = vst [vmem:[%s9263_s22 + $0xf0] sm:$0xff] %v5685_v32  ;;  %v5686_v27 = vmul.f32 %v6679_v13, %v5462_v57 }
 0x414   : > { %5715 = vst [vmem:[%s9263_s22 + $0xe0] sm:$0xff] %v5683_v30  ;;  %v5684_v62 = vmul.f32 %v6681_v33, %v5460_v38 }
 0x415   : > { %5718 = vst [vmem:[%s9263_s22 + $0xf8] sm:$0xff] %v5686_v27 }
 0x416   : > { %5716 = vst [vmem:[%s9263_s22 + $0xe8] sm:$0xff] %v5684_v62 }
 0x417 PF: > { %s15_s18 = sadd.s32 1, %s6722_s18  }
 0x418   : > { %p12_p4 = scmp.ge.s32.totalorder %s15_s18, 4  }
 0x41a   :  { %14 = sbr.rel (!%p12_p4) target bundleno = 1 (0x1), region = 75 }

</bundles_post_ra>
